<compile_context>
chip_gen: v7x
topology: tpu7x:2x2x1
jax: 0.10.0
libtpu: 0.0.40
codegen_flags: <defaults>
</compile_context>

<pallas_src>
import jax
import jax.numpy as jnp
from jax.experimental import pallas as pl
from jax.experimental.pallas import tpu as pltpu

D_MODEL = 128
NHEAD = 4
HEAD_DIM = D_MODEL // NHEAD
NUM_LAYERS = 2
D_FF = 2048          # nn.TransformerEncoderLayer default dim_feedforward
LN_EPS = 1e-5        # nn.LayerNorm default eps


def _layer_norm(x, g, b):
    # Two-pass form (x - mu)^2: avoids the E[x^2] - mu^2 cancellation as the residual grows.
    mu = jnp.mean(x, axis=-1, keepdims=True)
    xc = x - mu
    var = jnp.mean(xc * xc, axis=-1, keepdims=True)
    return xc * jax.lax.rsqrt(var + LN_EPS) * g + b


def transformer_kernel(x_ref, wqkv_ref, bqkv_ref, wo_ref, bo_ref,
                       ln1g_ref, ln1b_ref, w1_ref, b1_ref, w2_ref, b2_ref,
                       ln2g_ref, ln2b_ref, fcw_ref, fcb_ref,
                       o_ref, x_acc):
    """One grid step == one encoder layer; fc_out fused into the last step."""
    layer = pl.program_id(0)
    n_layers = pl.num_programs(0)
    B, S, V = o_ref.shape
    D = x_acc.shape[-1]
    BS = B * S
    scale = 1.0 / (HEAD_DIM ** 0.5)

    # Initialize the VMEM-resident residual stream from the embeddings on the first step.
    @pl.when(layer == 0)
    def _():
        x_acc[...] = x_ref[...].reshape(BS, D)

    x = x_acc[...]                                                 # (BS, D) f32

    # ---------- multi-head self-attention (post-norm, dropout = identity) ----------
    qkv = jnp.dot(x.astype(jnp.bfloat16), wqkv_ref[...],
                  preferred_element_type=jnp.float32) + bqkv_ref[...]        # (BS, 3D) f32
    qkv_bf = qkv.astype(jnp.bfloat16)                              # single cast per layer

    heads = []
    for h in range(NHEAD):                                         # tiny static unroll
        q_sl = slice(0 * D + h * HEAD_DIM, 0 * D + (h + 1) * HEAD_DIM)
        k_sl = slice(1 * D + h * HEAD_DIM, 1 * D + (h + 1) * HEAD_DIM)
        v_sl = slice(2 * D + h * HEAD_DIM, 2 * D + (h + 1) * HEAD_DIM)
        qh = qkv_bf[:, q_sl].reshape(B, S, HEAD_DIM)
        kh = qkv_bf[:, k_sl].reshape(B, S, HEAD_DIM)
        vh = qkv_bf[:, v_sl].reshape(B, S, HEAD_DIM)
        # Batched over B via dot_general batch dims; contraction on the last dims,
        # so no explicit kh transpose is ever materialized.
        s = jnp.einsum('bqd,bkd->bqk', qh, kh,
                       preferred_element_type=jnp.float32) * scale          # (B, S, S)
        s = s - jnp.max(s, axis=-1, keepdims=True)
        p = jnp.exp(s)
        p = p * pl.reciprocal(jnp.sum(p, axis=-1, keepdims=True), approx=True)
        pv = jnp.einsum('bqk,bkd->bqd', p.astype(jnp.bfloat16), vh,
                        preferred_element_type=jnp.float32)                 # (B, S, hd)
        heads.append(pv.reshape(BS, HEAD_DIM))

    # Single full-depth (BS,128)x(128,128) output projection on the concatenated heads.
    attn_heads = jnp.concatenate(heads, axis=-1).astype(jnp.bfloat16)       # (BS, D)
    attn = jnp.dot(attn_heads, wo_ref[...],
                   preferred_element_type=jnp.float32) + bo_ref[...]
    x = _layer_norm(x + attn, ln1g_ref[...], ln1b_ref[...])

    # ---------- feed-forward (ReLU activation, dropout = identity) ----------
    hdn = jnp.maximum(
        jnp.dot(x.astype(jnp.bfloat16), w1_ref[...],
                preferred_element_type=jnp.float32) + b1_ref[...], 0.0)
    ff = jnp.dot(hdn.astype(jnp.bfloat16), w2_ref[...],
                 preferred_element_type=jnp.float32) + b2_ref[...]
    x = _layer_norm(x + ff, ln2g_ref[...], ln2b_ref[...])
    x_acc[...] = x

    # ---------- output projection (fc_out), last grid step only ----------
    @pl.when(layer == n_layers - 1)
    def _():
        logits = jnp.dot(x.astype(jnp.bfloat16), fcw_ref[...],
                         preferred_element_type=jnp.float32) + fcb_ref[...]
        o_ref[...] = logits.reshape(B, S, V)


def tiny_transformer(x_ids, params):
    """x_ids: int32 token ids of shape (B, S). Returns logits (B, S, vocab) in f32."""
    # Embedding lookup (gather) kept in plain JAX glue; padding_idx=0 row is zeroed at init.
    emb = jnp.take(params["embed"], x_ids, axis=0).astype(jnp.float32)       # (B, S, D)
    B, S, _ = emb.shape
    vocab = params["fc_w"].shape[1]

    def per_layer(a):
        # (NUM_LAYERS, ...) weights: stream one layer's slice per grid step (pipelined DMA).
        trailing = a.shape[1:]
        nd = len(trailing)
        return pl.BlockSpec((None,) + trailing, lambda l, _nd=nd: (l,) + (0,) * _nd)

    def const(a):
        zeros = (0,) * a.ndim
        return pl.BlockSpec(a.shape, lambda l, _z=zeros: _z)

    layer_keys = ("wqkv", "bqkv", "wo", "bo", "ln1_g", "ln1_b",
                  "w1", "b1", "w2", "b2", "ln2_g", "ln2_b")
    args = (emb,) + tuple(params[k] for k in layer_keys) + (params["fc_w"], params["fc_b"])
    in_specs = ([const(emb)]
                + [per_layer(params[k]) for k in layer_keys]
                + [const(params["fc_w"]), const(params["fc_b"])])

    return pl.pallas_call(
        transformer_kernel,
        out_shape=jax.ShapeDtypeStruct((B, S, vocab), jnp.float32),
        grid=(NUM_LAYERS,),
        in_specs=in_specs,
        out_specs=pl.BlockSpec((B, S, vocab), lambda l: (0, 0, 0)),
        scratch_shapes=[pltpu.VMEM((B * S, D_MODEL), jnp.float32)],   # residual stream
        compiler_params=pltpu.CompilerParams(
            dimension_semantics=("arbitrary",),        # sequential: scratch carries state
            vmem_limit_bytes=32 * 1024 * 1024),
    )(*args)


def init_params(key, vocab_size):
    ks = jax.random.split(key, 11)

    def nrm(k, shape, dtype=jnp.float32, scale=0.02):
        return (scale * jax.random.normal(k, shape)).astype(dtype)

    embed = nrm(ks[0], (vocab_size, D_MODEL))
    embed = embed.at[0].set(0.0)      # nn.Embedding(padding_idx=0)

    return dict(
        embed=embed,
        # Linear weights pre-transposed to (in, out) so the kernel does x @ W.
        # Large matmul weights live in bf16 (halved HBM->VMEM traffic, native MXU path);
        # biases / LayerNorm params stay f32.
        wqkv=nrm(ks[1], (NUM_LAYERS, D_MODEL, 3 * D_MODEL), jnp.bfloat16),
        bqkv=nrm(ks[2], (NUM_LAYERS, 1, 3 * D_MODEL)),
        wo=nrm(ks[3], (NUM_LAYERS, D_MODEL, D_MODEL), jnp.bfloat16),
        bo=nrm(ks[4], (NUM_LAYERS, 1, D_MODEL)),
        ln1_g=jnp.ones((NUM_LAYERS, 1, D_MODEL), jnp.float32),
        ln1_b=jnp.zeros((NUM_LAYERS, 1, D_MODEL), jnp.float32),
        w1=nrm(ks[5], (NUM_LAYERS, D_MODEL, D_FF), jnp.bfloat16),
        b1=nrm(ks[6], (NUM_LAYERS, 1, D_FF)),
        w2=nrm(ks[7], (NUM_LAYERS, D_FF, D_MODEL), jnp.bfloat16),
        b2=nrm(ks[8], (NUM_LAYERS, 1, D_MODEL)),
        ln2_g=jnp.ones((NUM_LAYERS, 1, D_MODEL), jnp.float32),
        ln2_b=jnp.zeros((NUM_LAYERS, 1, D_MODEL), jnp.float32),
        fc_w=nrm(ks[9], (D_MODEL, vocab_size), jnp.bfloat16),
        fc_b=nrm(ks[10], (1, vocab_size)),
    )


if __name__ == "__main__":
    vocab_size = 128
    B, S = 2, 8

    key = jax.random.PRNGKey(0)
    pkey, xkey = jax.random.split(key)
    params = init_params(pkey, vocab_size)
    x_ids = jax.random.randint(xkey, (B, S), 0, vocab_size, dtype=jnp.int32)

    out = tiny_transformer(x_ids, params)
    jax.block_until_ready(out)
    assert out.shape == (B, S, vocab_size), out.shape
    assert bool(jnp.all(jnp.isfinite(out)))
    print("KERNEL_OK")
</pallas_src>

<mosaic_0001>
module attributes {stable_mosaic.version = 11 : i64} {
  func.func @transformer_kernel(%arg0: i32, %arg1: memref<2x8x128xf32, #tpu.memory_space<vmem>>, %arg2: memref<1x128x384xbf16, #tpu.memory_space<vmem>>, %arg3: memref<1x1x384xf32, #tpu.memory_space<vmem>>, %arg4: memref<1x128x128xbf16, #tpu.memory_space<vmem>>, %arg5: memref<1x1x128xf32, #tpu.memory_space<vmem>>, %arg6: memref<1x1x128xf32, #tpu.memory_space<vmem>>, %arg7: memref<1x1x128xf32, #tpu.memory_space<vmem>>, %arg8: memref<1x128x2048xbf16, #tpu.memory_space<vmem>>, %arg9: memref<1x1x2048xf32, #tpu.memory_space<vmem>>, %arg10: memref<1x2048x128xbf16, #tpu.memory_space<vmem>>, %arg11: memref<1x1x128xf32, #tpu.memory_space<vmem>>, %arg12: memref<1x1x128xf32, #tpu.memory_space<vmem>>, %arg13: memref<1x1x128xf32, #tpu.memory_space<vmem>>, %arg14: memref<128x128xbf16, #tpu.memory_space<vmem>>, %arg15: memref<1x128xf32, #tpu.memory_space<vmem>>, %arg16: memref<2x8x128xf32, #tpu.memory_space<vmem>>, %arg17: memref<16x128xf32, #tpu.memory_space<vmem>>) attributes {dimension_semantics = [#tpu.dimension_semantics<arbitrary>], iteration_bounds = array<i64: 2>, scalar_prefetch = 0 : i64, scratch_operands = 1 : i64, tpu.core_type = #tpu.core_type<tc>, window_params = [{pipeline_mode = #tpu.pipeline_mode<synchronous>, transform_indices = @transform_0, window_bounds = array<i64: 2, 8, 128>}, {transform_indices = @transform_1, window_bounds = array<i64: 1, 128, 384>}, {transform_indices = @transform_2, window_bounds = array<i64: 1, 1, 384>}, {transform_indices = @transform_3, window_bounds = array<i64: 1, 128, 128>}, {transform_indices = @transform_4, window_bounds = array<i64: 1, 1, 128>}, {transform_indices = @transform_5, window_bounds = array<i64: 1, 1, 128>}, {transform_indices = @transform_6, window_bounds = array<i64: 1, 1, 128>}, {transform_indices = @transform_7, window_bounds = array<i64: 1, 128, 2048>}, {transform_indices = @transform_8, window_bounds = array<i64: 1, 1, 2048>}, {transform_indices = @transform_9, window_bounds = array<i64: 1, 2048, 128>}, {transform_indices = @transform_10, window_bounds = array<i64: 1, 1, 128>}, {transform_indices = @transform_11, window_bounds = array<i64: 1, 1, 128>}, {transform_indices = @transform_12, window_bounds = array<i64: 1, 1, 128>}, {pipeline_mode = #tpu.pipeline_mode<synchronous>, transform_indices = @transform_13, window_bounds = array<i64: 128, 128>}, {pipeline_mode = #tpu.pipeline_mode<synchronous>, transform_indices = @transform_14, window_bounds = array<i64: 1, 128>}, {pipeline_mode = #tpu.pipeline_mode<synchronous>, transform_indices = @transform_15, window_bounds = array<i64: 2, 8, 128>}]} {
    %c0_i32 = arith.constant 0 : i32
    %0 = arith.cmpi eq, %arg0, %c0_i32 : i32
    %1 = arith.extui %0 : i1 to i32
    %c0_i32_0 = arith.constant 0 : i32
    %2 = arith.cmpi ne, %1, %c0_i32_0 : i32
    scf.if %2 {
      %c0_75 = arith.constant 0 : index
      %c0_76 = arith.constant 0 : index
      %c0_77 = arith.constant 0 : index
      %182 = vector.load %arg1[%c0_75, %c0_76, %c0_77] : memref<2x8x128xf32, #tpu.memory_space<vmem>>, vector<2x8x128xf32>
      %183 = vector.shape_cast %182 : vector<2x8x128xf32> to vector<16x128xf32>
      %c0_78 = arith.constant 0 : index
      %c0_79 = arith.constant 0 : index
      %184 = vector.load %arg17[%c0_78, %c0_79] : memref<16x128xf32, #tpu.memory_space<vmem>>, vector<16x128xf32>
      tpu.vector_store %arg17[%c0_78, %c0_79], %183 {strides = array<i32>} : memref<16x128xf32, #tpu.memory_space<vmem>>, vector<16x128xf32>,
    } else {
    }
    %c0 = arith.constant 0 : index
    %c0_1 = arith.constant 0 : index
    %3 = vector.load %arg17[%c0, %c0_1] : memref<16x128xf32, #tpu.memory_space<vmem>>, vector<16x128xf32>
    %4 = arith.truncf %3 : vector<16x128xf32> to vector<16x128xbf16>
    %c0_2 = arith.constant 0 : index
    %c0_3 = arith.constant 0 : index
    %c0_4 = arith.constant 0 : index
    %5 = vector.load %arg2[%c0_2, %c0_3, %c0_4] : memref<1x128x384xbf16, #tpu.memory_space<vmem>>, vector<1x128x384xbf16>
    %6 = vector.shape_cast %5 : vector<1x128x384xbf16> to vector<128x384xbf16>
    %cst = arith.constant dense<0.000000e+00> : vector<16x384xf32>
    %7 = tpu.matmul %4, %6, %cst {dimension_numbers = #tpu.dot_dimension_numbers<[1], [0], [0], [1], [0, 0, 1, 1], [], []>} : vector<16x128xbf16>, vector<128x384xbf16>, vector<16x384xf32> -> vector<16x384xf32>
    %c0_5 = arith.constant 0 : index
    %c0_6 = arith.constant 0 : index
    %c0_7 = arith.constant 0 : index
    %8 = vector.load %arg3[%c0_5, %c0_6, %c0_7] : memref<1x1x384xf32, #tpu.memory_space<vmem>>, vector<1x1x384xf32>
    %9 = vector.shape_cast %8 : vector<1x1x384xf32> to vector<1x384xf32>
    %10 = vector.broadcast %9 : vector<1x384xf32> to vector<16x384xf32>
    %11 = arith.addf %7, %10 : vector<16x384xf32>
    %12 = arith.truncf %11 : vector<16x384xf32> to vector<16x384xbf16>
    %13 = vector.extract_strided_slice %12 {offsets = [0, 0], sizes = [16, 32], strides = [1, 1]} : vector<16x384xbf16> to vector<16x32xbf16>
    %14 = vector.shape_cast %13 : vector<16x32xbf16> to vector<2x8x32xbf16>
    %15 = vector.extract_strided_slice %12 {offsets = [0, 128], sizes = [16, 32], strides = [1, 1]} : vector<16x384xbf16> to vector<16x32xbf16>
    %16 = vector.shape_cast %15 : vector<16x32xbf16> to vector<2x8x32xbf16>
    %17 = vector.extract_strided_slice %12 {offsets = [0, 256], sizes = [16, 32], strides = [1, 1]} : vector<16x384xbf16> to vector<16x32xbf16>
    %18 = vector.shape_cast %17 : vector<16x32xbf16> to vector<2x8x32xbf16>
    "tpu.trace_start"() <{level = 10 : i32, message = "bqd,bkd->bqk"}> : () -> ()
    %cst_8 = arith.constant dense<0.000000e+00> : vector<2x8x8xf32>
    %19 = tpu.matmul %14, %16, %cst_8 {dimension_numbers = #tpu.dot_dimension_numbers<[2], [2], [1], [1], [0, 0, 0, 1, 1, 1], [0], [0]>} : vector<2x8x32xbf16>, vector<2x8x32xbf16>, vector<2x8x8xf32> -> vector<2x8x8xf32>
    "tpu.trace_stop"() : () -> ()
    %cst_9 = arith.constant 0.176776692 : f32
    %20 = vector.broadcast %cst_9 : f32 to vector<2x8x8xf32>
    %21 = arith.mulf %19, %20 : vector<2x8x8xf32>
    %cst_10 = arith.constant dense<0xFF800000> : vector<2x8xf32>
    %22 = vector.multi_reduction <maximumf>, %21, %cst_10 [2] : vector<2x8x8xf32> to vector<2x8xf32>
    %23 = vector.shape_cast %22 : vector<2x8xf32> to vector<2x8x1xf32>
    %24 = vector.broadcast %23 : vector<2x8x1xf32> to vector<2x8x8xf32>
    %25 = arith.subf %21, %24 : vector<2x8x8xf32>
    %26 = math.exp %25 : vector<2x8x8xf32>
    %cst_11 = arith.constant dense<0.000000e+00> : vector<2x8xf32>
    %27 = vector.multi_reduction <add>, %26, %cst_11 [2] : vector<2x8x8xf32> to vector<2x8xf32>
    %28 = vector.shape_cast %27 : vector<2x8xf32> to vector<2x8x1xf32>
    %29 = tpu.reciprocal %28 {approx = true} : vector<2x8x1xf32> -> vector<2x8x1xf32>
    %30 = vector.broadcast %29 : vector<2x8x1xf32> to vector<2x8x8xf32>
    %31 = arith.mulf %26, %30 : vector<2x8x8xf32>
    %32 = arith.truncf %31 : vector<2x8x8xf32> to vector<2x8x8xbf16>
    "tpu.trace_start"() <{level = 10 : i32, message = "bqk,bkd->bqd"}> : () -> ()
    %cst_12 = arith.constant dense<0.000000e+00> : vector<2x8x32xf32>
    %33 = tpu.matmul %32, %18, %cst_12 {dimension_numbers = #tpu.dot_dimension_numbers<[2], [1], [1], [2], [0, 0, 0, 1, 1, 2], [0], [0]>} : vector<2x8x8xbf16>, vector<2x8x32xbf16>, vector<2x8x32xf32> -> vector<2x8x32xf32>
    "tpu.trace_stop"() : () -> ()
    %34 = vector.shape_cast %33 : vector<2x8x32xf32> to vector<16x32xf32>
    %35 = vector.extract_strided_slice %12 {offsets = [0, 32], sizes = [16, 32], strides = [1, 1]} : vector<16x384xbf16> to vector<16x32xbf16>
    %36 = vector.shape_cast %35 : vector<16x32xbf16> to vector<2x8x32xbf16>
    %37 = vector.extract_strided_slice %12 {offsets = [0, 160], sizes = [16, 32], strides = [1, 1]} : vector<16x384xbf16> to vector<16x32xbf16>
    %38 = vector.shape_cast %37 : vector<16x32xbf16> to vector<2x8x32xbf16>
    %39 = vector.extract_strided_slice %12 {offsets = [0, 288], sizes = [16, 32], strides = [1, 1]} : vector<16x384xbf16> to vector<16x32xbf16>
    %40 = vector.shape_cast %39 : vector<16x32xbf16> to vector<2x8x32xbf16>
    "tpu.trace_start"() <{level = 10 : i32, message = "bqd,bkd->bqk"}> : () -> ()
    %cst_13 = arith.constant dense<0.000000e+00> : vector<2x8x8xf32>
    %41 = tpu.matmul %36, %38, %cst_13 {dimension_numbers = #tpu.dot_dimension_numbers<[2], [2], [1], [1], [0, 0, 0, 1, 1, 1], [0], [0]>} : vector<2x8x32xbf16>, vector<2x8x32xbf16>, vector<2x8x8xf32> -> vector<2x8x8xf32>
    "tpu.trace_stop"() : () -> ()
    %cst_14 = arith.constant 0.176776692 : f32
    %42 = vector.broadcast %cst_14 : f32 to vector<2x8x8xf32>
    %43 = arith.mulf %41, %42 : vector<2x8x8xf32>
    %cst_15 = arith.constant dense<0xFF800000> : vector<2x8xf32>
    %44 = vector.multi_reduction <maximumf>, %43, %cst_15 [2] : vector<2x8x8xf32> to vector<2x8xf32>
    %45 = vector.shape_cast %44 : vector<2x8xf32> to vector<2x8x1xf32>
    %46 = vector.broadcast %45 : vector<2x8x1xf32> to vector<2x8x8xf32>
    %47 = arith.subf %43, %46 : vector<2x8x8xf32>
    %48 = math.exp %47 : vector<2x8x8xf32>
    %cst_16 = arith.constant dense<0.000000e+00> : vector<2x8xf32>
    %49 = vector.multi_reduction <add>, %48, %cst_16 [2] : vector<2x8x8xf32> to vector<2x8xf32>
    %50 = vector.shape_cast %49 : vector<2x8xf32> to vector<2x8x1xf32>
    %51 = tpu.reciprocal %50 {approx = true} : vector<2x8x1xf32> -> vector<2x8x1xf32>
    %52 = vector.broadcast %51 : vector<2x8x1xf32> to vector<2x8x8xf32>
    %53 = arith.mulf %48, %52 : vector<2x8x8xf32>
    %54 = arith.truncf %53 : vector<2x8x8xf32> to vector<2x8x8xbf16>
    "tpu.trace_start"() <{level = 10 : i32, message = "bqk,bkd->bqd"}> : () -> ()
    %cst_17 = arith.constant dense<0.000000e+00> : vector<2x8x32xf32>
    %55 = tpu.matmul %54, %40, %cst_17 {dimension_numbers = #tpu.dot_dimension_numbers<[2], [1], [1], [2], [0, 0, 0, 1, 1, 2], [0], [0]>} : vector<2x8x8xbf16>, vector<2x8x32xbf16>, vector<2x8x32xf32> -> vector<2x8x32xf32>
    "tpu.trace_stop"() : () -> ()
    %56 = vector.shape_cast %55 : vector<2x8x32xf32> to vector<16x32xf32>
    %57 = vector.extract_strided_slice %12 {offsets = [0, 64], sizes = [16, 32], strides = [1, 1]} : vector<16x384xbf16> to vector<16x32xbf16>
    %58 = vector.shape_cast %57 : vector<16x32xbf16> to vector<2x8x32xbf16>
    %59 = vector.extract_strided_slice %12 {offsets = [0, 192], sizes = [16, 32], strides = [1, 1]} : vector<16x384xbf16> to vector<16x32xbf16>
    %60 = vector.shape_cast %59 : vector<16x32xbf16> to vector<2x8x32xbf16>
    %61 = vector.extract_strided_slice %12 {offsets = [0, 320], sizes = [16, 32], strides = [1, 1]} : vector<16x384xbf16> to vector<16x32xbf16>
    %62 = vector.shape_cast %61 : vector<16x32xbf16> to vector<2x8x32xbf16>
    "tpu.trace_start"() <{level = 10 : i32, message = "bqd,bkd->bqk"}> : () -> ()
    %cst_18 = arith.constant dense<0.000000e+00> : vector<2x8x8xf32>
    %63 = tpu.matmul %58, %60, %cst_18 {dimension_numbers = #tpu.dot_dimension_numbers<[2], [2], [1], [1], [0, 0, 0, 1, 1, 1], [0], [0]>} : vector<2x8x32xbf16>, vector<2x8x32xbf16>, vector<2x8x8xf32> -> vector<2x8x8xf32>
    "tpu.trace_stop"() : () -> ()
    %cst_19 = arith.constant 0.176776692 : f32
    %64 = vector.broadcast %cst_19 : f32 to vector<2x8x8xf32>
    %65 = arith.mulf %63, %64 : vector<2x8x8xf32>
    %cst_20 = arith.constant dense<0xFF800000> : vector<2x8xf32>
    %66 = vector.multi_reduction <maximumf>, %65, %cst_20 [2] : vector<2x8x8xf32> to vector<2x8xf32>
    %67 = vector.shape_cast %66 : vector<2x8xf32> to vector<2x8x1xf32>
    %68 = vector.broadcast %67 : vector<2x8x1xf32> to vector<2x8x8xf32>
    %69 = arith.subf %65, %68 : vector<2x8x8xf32>
    %70 = math.exp %69 : vector<2x8x8xf32>
    %cst_21 = arith.constant dense<0.000000e+00> : vector<2x8xf32>
    %71 = vector.multi_reduction <add>, %70, %cst_21 [2] : vector<2x8x8xf32> to vector<2x8xf32>
    %72 = vector.shape_cast %71 : vector<2x8xf32> to vector<2x8x1xf32>
    %73 = tpu.reciprocal %72 {approx = true} : vector<2x8x1xf32> -> vector<2x8x1xf32>
    %74 = vector.broadcast %73 : vector<2x8x1xf32> to vector<2x8x8xf32>
    %75 = arith.mulf %70, %74 : vector<2x8x8xf32>
    %76 = arith.truncf %75 : vector<2x8x8xf32> to vector<2x8x8xbf16>
    "tpu.trace_start"() <{level = 10 : i32, message = "bqk,bkd->bqd"}> : () -> ()
    %cst_22 = arith.constant dense<0.000000e+00> : vector<2x8x32xf32>
    %77 = tpu.matmul %76, %62, %cst_22 {dimension_numbers = #tpu.dot_dimension_numbers<[2], [1], [1], [2], [0, 0, 0, 1, 1, 2], [0], [0]>} : vector<2x8x8xbf16>, vector<2x8x32xbf16>, vector<2x8x32xf32> -> vector<2x8x32xf32>
    "tpu.trace_stop"() : () -> ()
    %78 = vector.shape_cast %77 : vector<2x8x32xf32> to vector<16x32xf32>
    %79 = vector.extract_strided_slice %12 {offsets = [0, 96], sizes = [16, 32], strides = [1, 1]} : vector<16x384xbf16> to vector<16x32xbf16>
    %80 = vector.shape_cast %79 : vector<16x32xbf16> to vector<2x8x32xbf16>
    %81 = vector.extract_strided_slice %12 {offsets = [0, 224], sizes = [16, 32], strides = [1, 1]} : vector<16x384xbf16> to vector<16x32xbf16>
    %82 = vector.shape_cast %81 : vector<16x32xbf16> to vector<2x8x32xbf16>
    %83 = vector.extract_strided_slice %12 {offsets = [0, 352], sizes = [16, 32], strides = [1, 1]} : vector<16x384xbf16> to vector<16x32xbf16>
    %84 = vector.shape_cast %83 : vector<16x32xbf16> to vector<2x8x32xbf16>
    "tpu.trace_start"() <{level = 10 : i32, message = "bqd,bkd->bqk"}> : () -> ()
    %cst_23 = arith.constant dense<0.000000e+00> : vector<2x8x8xf32>
    %85 = tpu.matmul %80, %82, %cst_23 {dimension_numbers = #tpu.dot_dimension_numbers<[2], [2], [1], [1], [0, 0, 0, 1, 1, 1], [0], [0]>} : vector<2x8x32xbf16>, vector<2x8x32xbf16>, vector<2x8x8xf32> -> vector<2x8x8xf32>
    "tpu.trace_stop"() : () -> ()
    %cst_24 = arith.constant 0.176776692 : f32
    %86 = vector.broadcast %cst_24 : f32 to vector<2x8x8xf32>
    %87 = arith.mulf %85, %86 : vector<2x8x8xf32>
    %cst_25 = arith.constant dense<0xFF800000> : vector<2x8xf32>
    %88 = vector.multi_reduction <maximumf>, %87, %cst_25 [2] : vector<2x8x8xf32> to vector<2x8xf32>
    %89 = vector.shape_cast %88 : vector<2x8xf32> to vector<2x8x1xf32>
    %90 = vector.broadcast %89 : vector<2x8x1xf32> to vector<2x8x8xf32>
    %91 = arith.subf %87, %90 : vector<2x8x8xf32>
    %92 = math.exp %91 : vector<2x8x8xf32>
    %cst_26 = arith.constant dense<0.000000e+00> : vector<2x8xf32>
    %93 = vector.multi_reduction <add>, %92, %cst_26 [2] : vector<2x8x8xf32> to vector<2x8xf32>
    %94 = vector.shape_cast %93 : vector<2x8xf32> to vector<2x8x1xf32>
    %95 = tpu.reciprocal %94 {approx = true} : vector<2x8x1xf32> -> vector<2x8x1xf32>
    %96 = vector.broadcast %95 : vector<2x8x1xf32> to vector<2x8x8xf32>
    %97 = arith.mulf %92, %96 : vector<2x8x8xf32>
    %98 = arith.truncf %97 : vector<2x8x8xf32> to vector<2x8x8xbf16>
    "tpu.trace_start"() <{level = 10 : i32, message = "bqk,bkd->bqd"}> : () -> ()
    %cst_27 = arith.constant dense<0.000000e+00> : vector<2x8x32xf32>
    %99 = tpu.matmul %98, %84, %cst_27 {dimension_numbers = #tpu.dot_dimension_numbers<[2], [1], [1], [2], [0, 0, 0, 1, 1, 2], [0], [0]>} : vector<2x8x8xbf16>, vector<2x8x32xbf16>, vector<2x8x32xf32> -> vector<2x8x32xf32>
    "tpu.trace_stop"() : () -> ()
    %100 = vector.shape_cast %99 : vector<2x8x32xf32> to vector<16x32xf32>
    %101 = tpu.concatenate %34, %56, %78, %100 in 1 : vector<16x32xf32>, vector<16x32xf32>, vector<16x32xf32>, vector<16x32xf32> -> vector<16x128xf32>
    %102 = arith.truncf %101 : vector<16x128xf32> to vector<16x128xbf16>
    %c0_28 = arith.constant 0 : index
    %c0_29 = arith.constant 0 : index
    %c0_30 = arith.constant 0 : index
    %103 = vector.load %arg4[%c0_28, %c0_29, %c0_30] : memref<1x128x128xbf16, #tpu.memory_space<vmem>>, vector<1x128x128xbf16>
    %104 = vector.shape_cast %103 : vector<1x128x128xbf16> to vector<128x128xbf16>
    %cst_31 = arith.constant dense<0.000000e+00> : vector<16x128xf32>
    %105 = tpu.matmul %102, %104, %cst_31 {dimension_numbers = #tpu.dot_dimension_numbers<[1], [0], [0], [1], [0, 0, 1, 1], [], []>} : vector<16x128xbf16>, vector<128x128xbf16>, vector<16x128xf32> -> vector<16x128xf32>
    %c0_32 = arith.constant 0 : index
    %c0_33 = arith.constant 0 : index
    %c0_34 = arith.constant 0 : index
    %106 = vector.load %arg5[%c0_32, %c0_33, %c0_34] : memref<1x1x128xf32, #tpu.memory_space<vmem>>, vector<1x1x128xf32>
    %107 = vector.shape_cast %106 : vector<1x1x128xf32> to vector<1x128xf32>
    %108 = vector.broadcast %107 : vector<1x128xf32> to vector<16x128xf32>
    %109 = arith.addf %105, %108 : vector<16x128xf32>
    %110 = arith.addf %3, %109 : vector<16x128xf32>
    %c0_35 = arith.constant 0 : index
    %c0_36 = arith.constant 0 : index
    %c0_37 = arith.constant 0 : index
    %111 = vector.load %arg6[%c0_35, %c0_36, %c0_37] : memref<1x1x128xf32, #tpu.memory_space<vmem>>, vector<1x1x128xf32>
    %112 = vector.shape_cast %111 : vector<1x1x128xf32> to vector<1x128xf32>
    %c0_38 = arith.constant 0 : index
    %c0_39 = arith.constant 0 : index
    %c0_40 = arith.constant 0 : index
    %113 = vector.load %arg7[%c0_38, %c0_39, %c0_40] : memref<1x1x128xf32, #tpu.memory_space<vmem>>, vector<1x1x128xf32>
    %114 = vector.shape_cast %113 : vector<1x1x128xf32> to vector<1x128xf32>
    %cst_41 = arith.constant dense<0.000000e+00> : vector<16xf32>
    %115 = vector.multi_reduction <add>, %110, %cst_41 [1] : vector<16x128xf32> to vector<16xf32>
    %116 = vector.shape_cast %115 : vector<16xf32> to vector<16x1xf32>
    %cst_42 = arith.constant 1.280000e+02 : f32
    %117 = vector.broadcast %cst_42 : f32 to vector<16x1xf32>
    %118 = arith.divf %116, %117 : vector<16x1xf32>
    %119 = vector.broadcast %118 : vector<16x1xf32> to vector<16x128xf32>
    %120 = arith.subf %110, %119 : vector<16x128xf32>
    %121 = arith.mulf %120, %120 : vector<16x128xf32>
    %cst_43 = arith.constant dense<0.000000e+00> : vector<16xf32>
    %122 = vector.multi_reduction <add>, %121, %cst_43 [1] : vector<16x128xf32> to vector<16xf32>
    %123 = vector.shape_cast %122 : vector<16xf32> to vector<16x1xf32>
    %cst_44 = arith.constant 1.280000e+02 : f32
    %124 = vector.broadcast %cst_44 : f32 to vector<16x1xf32>
    %125 = arith.divf %123, %124 : vector<16x1xf32>
    %cst_45 = arith.constant 9.99999974E-6 : f32
    %126 = vector.broadcast %cst_45 : f32 to vector<16x1xf32>
    %127 = arith.addf %125, %126 : vector<16x1xf32>
    %128 = math.rsqrt %127 : vector<16x1xf32>
    %129 = vector.broadcast %128 : vector<16x1xf32> to vector<16x128xf32>
    %130 = arith.mulf %120, %129 : vector<16x128xf32>
    %131 = vector.broadcast %112 : vector<1x128xf32> to vector<16x128xf32>
    %132 = arith.mulf %130, %131 : vector<16x128xf32>
    %133 = vector.broadcast %114 : vector<1x128xf32> to vector<16x128xf32>
    %134 = arith.addf %132, %133 : vector<16x128xf32>
    %135 = arith.truncf %134 : vector<16x128xf32> to vector<16x128xbf16>
    %c0_46 = arith.constant 0 : index
    %c0_47 = arith.constant 0 : index
    %c0_48 = arith.constant 0 : index
    %136 = vector.load %arg8[%c0_46, %c0_47, %c0_48] : memref<1x128x2048xbf16, #tpu.memory_space<vmem>>, vector<1x128x2048xbf16>
    %137 = vector.shape_cast %136 : vector<1x128x2048xbf16> to vector<128x2048xbf16>
    %cst_49 = arith.constant dense<0.000000e+00> : vector<16x2048xf32>
    %138 = tpu.matmul %135, %137, %cst_49 {dimension_numbers = #tpu.dot_dimension_numbers<[1], [0], [0], [1], [0, 0, 1, 1], [], []>} : vector<16x128xbf16>, vector<128x2048xbf16>, vector<16x2048xf32> -> vector<16x2048xf32>
    %c0_50 = arith.constant 0 : index
    %c0_51 = arith.constant 0 : index
    %c0_52 = arith.constant 0 : index
    %139 = vector.load %arg9[%c0_50, %c0_51, %c0_52] : memref<1x1x2048xf32, #tpu.memory_space<vmem>>, vector<1x1x2048xf32>
    %140 = vector.shape_cast %139 : vector<1x1x2048xf32> to vector<1x2048xf32>
    %141 = vector.broadcast %140 : vector<1x2048xf32> to vector<16x2048xf32>
    %142 = arith.addf %138, %141 : vector<16x2048xf32>
    %cst_53 = arith.constant 0.000000e+00 : f32
    %143 = vector.broadcast %cst_53 : f32 to vector<16x2048xf32>
    %144 = arith.maximumf %142, %143 : vector<16x2048xf32>
    %145 = arith.truncf %144 : vector<16x2048xf32> to vector<16x2048xbf16>
    %c0_54 = arith.constant 0 : index
    %c0_55 = arith.constant 0 : index
    %c0_56 = arith.constant 0 : index
    %146 = vector.load %arg10[%c0_54, %c0_55, %c0_56] : memref<1x2048x128xbf16, #tpu.memory_space<vmem>>, vector<1x2048x128xbf16>
    %147 = vector.shape_cast %146 : vector<1x2048x128xbf16> to vector<2048x128xbf16>
    %cst_57 = arith.constant dense<0.000000e+00> : vector<16x128xf32>
    %148 = tpu.matmul %145, %147, %cst_57 {dimension_numbers = #tpu.dot_dimension_numbers<[1], [0], [0], [1], [0, 0, 1, 1], [], []>} : vector<16x2048xbf16>, vector<2048x128xbf16>, vector<16x128xf32> -> vector<16x128xf32>
    %c0_58 = arith.constant 0 : index
    %c0_59 = arith.constant 0 : index
    %c0_60 = arith.constant 0 : index
    %149 = vector.load %arg11[%c0_58, %c0_59, %c0_60] : memref<1x1x128xf32, #tpu.memory_space<vmem>>, vector<1x1x128xf32>
    %150 = vector.shape_cast %149 : vector<1x1x128xf32> to vector<1x128xf32>
    %151 = vector.broadcast %150 : vector<1x128xf32> to vector<16x128xf32>
    %152 = arith.addf %148, %151 : vector<16x128xf32>
    %153 = arith.addf %134, %152 : vector<16x128xf32>
    %c0_61 = arith.constant 0 : index
    %c0_62 = arith.constant 0 : index
    %c0_63 = arith.constant 0 : index
    %154 = vector.load %arg12[%c0_61, %c0_62, %c0_63] : memref<1x1x128xf32, #tpu.memory_space<vmem>>, vector<1x1x128xf32>
    %155 = vector.shape_cast %154 : vector<1x1x128xf32> to vector<1x128xf32>
    %c0_64 = arith.constant 0 : index
    %c0_65 = arith.constant 0 : index
    %c0_66 = arith.constant 0 : index
    %156 = vector.load %arg13[%c0_64, %c0_65, %c0_66] : memref<1x1x128xf32, #tpu.memory_space<vmem>>, vector<1x1x128xf32>
    %157 = vector.shape_cast %156 : vector<1x1x128xf32> to vector<1x128xf32>
    %cst_67 = arith.constant dense<0.000000e+00> : vector<16xf32>
    %158 = vector.multi_reduction <add>, %153, %cst_67 [1] : vector<16x128xf32> to vector<16xf32>
    %159 = vector.shape_cast %158 : vector<16xf32> to vector<16x1xf32>
    %cst_68 = arith.constant 1.280000e+02 : f32
    %160 = vector.broadcast %cst_68 : f32 to vector<16x1xf32>
    %161 = arith.divf %159, %160 : vector<16x1xf32>
    %162 = vector.broadcast %161 : vector<16x1xf32> to vector<16x128xf32>
    %163 = arith.subf %153, %162 : vector<16x128xf32>
    %164 = arith.mulf %163, %163 : vector<16x128xf32>
    %cst_69 = arith.constant dense<0.000000e+00> : vector<16xf32>
    %165 = vector.multi_reduction <add>, %164, %cst_69 [1] : vector<16x128xf32> to vector<16xf32>
    %166 = vector.shape_cast %165 : vector<16xf32> to vector<16x1xf32>
    %cst_70 = arith.constant 1.280000e+02 : f32
    %167 = vector.broadcast %cst_70 : f32 to vector<16x1xf32>
    %168 = arith.divf %166, %167 : vector<16x1xf32>
    %cst_71 = arith.constant 9.99999974E-6 : f32
    %169 = vector.broadcast %cst_71 : f32 to vector<16x1xf32>
    %170 = arith.addf %168, %169 : vector<16x1xf32>
    %171 = math.rsqrt %170 : vector<16x1xf32>
    %172 = vector.broadcast %171 : vector<16x1xf32> to vector<16x128xf32>
    %173 = arith.mulf %163, %172 : vector<16x128xf32>
    %174 = vector.broadcast %155 : vector<1x128xf32> to vector<16x128xf32>
    %175 = arith.mulf %173, %174 : vector<16x128xf32>
    %176 = vector.broadcast %157 : vector<1x128xf32> to vector<16x128xf32>
    %177 = arith.addf %175, %176 : vector<16x128xf32>
    %c0_72 = arith.constant 0 : index
    %c0_73 = arith.constant 0 : index
    %178 = vector.load %arg17[%c0_72, %c0_73] : memref<16x128xf32, #tpu.memory_space<vmem>>, vector<16x128xf32>
    tpu.vector_store %arg17[%c0_72, %c0_73], %177 {strides = array<i32>} : memref<16x128xf32, #tpu.memory_space<vmem>>, vector<16x128xf32>,
    %c1_i32 = arith.constant 1 : i32
    %179 = arith.cmpi eq, %arg0, %c1_i32 : i32
    %180 = arith.extui %179 : i1 to i32
    %c0_i32_74 = arith.constant 0 : i32
    %181 = arith.cmpi ne, %180, %c0_i32_74 : i32
    scf.if %181 {
      %182 = arith.truncf %177 : vector<16x128xf32> to vector<16x128xbf16>
      %c0_75 = arith.constant 0 : index
      %c0_76 = arith.constant 0 : index
      %183 = vector.load %arg14[%c0_75, %c0_76] : memref<128x128xbf16, #tpu.memory_space<vmem>>, vector<128x128xbf16>
      %cst_77 = arith.constant dense<0.000000e+00> : vector<16x128xf32>
      %184 = tpu.matmul %182, %183, %cst_77 {dimension_numbers = #tpu.dot_dimension_numbers<[1], [0], [0], [1], [0, 0, 1, 1], [], []>} : vector<16x128xbf16>, vector<128x128xbf16>, vector<16x128xf32> -> vector<16x128xf32>
      %c0_78 = arith.constant 0 : index
      %c0_79 = arith.constant 0 : index
      %185 = vector.load %arg15[%c0_78, %c0_79] : memref<1x128xf32, #tpu.memory_space<vmem>>, vector<1x128xf32>
      %186 = vector.broadcast %185 : vector<1x128xf32> to vector<16x128xf32>
      %187 = arith.addf %184, %186 : vector<16x128xf32>
      %188 = vector.shape_cast %187 : vector<16x128xf32> to vector<2x8x128xf32>
      %c0_80 = arith.constant 0 : index
      %c0_81 = arith.constant 0 : index
      %c0_82 = arith.constant 0 : index
      %189 = vector.load %arg16[%c0_80, %c0_81, %c0_82] : memref<2x8x128xf32, #tpu.memory_space<vmem>>, vector<2x8x128xf32>
      tpu.vector_store %arg16[%c0_80, %c0_81, %c0_82], %188 {strides = array<i32>} : memref<2x8x128xf32, #tpu.memory_space<vmem>>, vector<2x8x128xf32>,
    } else {
    }
    return
  }
  func.func @transform_0(%arg0: i32) -> (i32, i32, i32) {
    %c0_i32 = arith.constant 0 : i32
    %c0_i32_0 = arith.constant 0 : i32
    %c0_i32_1 = arith.constant 0 : i32
    %c0_i32_2 = arith.constant 0 : i32
    return %c0_i32, %c0_i32_0, %c0_i32_1 : i32, i32, i32
  }
  func.func @transform_1(%arg0: i32) -> (i32, i32, i32) {
    %c0_i32 = arith.constant 0 : i32
    %c0_i32_0 = arith.constant 0 : i32
    %c0_i32_1 = arith.constant 0 : i32
    return %arg0, %c0_i32, %c0_i32_0 : i32, i32, i32
  }
  func.func @transform_2(%arg0: i32) -> (i32, i32, i32) {
    %c0_i32 = arith.constant 0 : i32
    %c0_i32_0 = arith.constant 0 : i32
    %c0_i32_1 = arith.constant 0 : i32
    return %arg0, %c0_i32, %c0_i32_0 : i32, i32, i32
  }
  func.func @transform_3(%arg0: i32) -> (i32, i32, i32) {
    %c0_i32 = arith.constant 0 : i32
    %c0_i32_0 = arith.constant 0 : i32
    %c0_i32_1 = arith.constant 0 : i32
    return %arg0, %c0_i32, %c0_i32_0 : i32, i32, i32
  }
  func.func @transform_4(%arg0: i32) -> (i32, i32, i32) {
    %c0_i32 = arith.constant 0 : i32
    %c0_i32_0 = arith.constant 0 : i32
    %c0_i32_1 = arith.constant 0 : i32
    return %arg0, %c0_i32, %c0_i32_0 : i32, i32, i32
  }
  func.func @transform_5(%arg0: i32) -> (i32, i32, i32) {
    %c0_i32 = arith.constant 0 : i32
    %c0_i32_0 = arith.constant 0 : i32
    %c0_i32_1 = arith.constant 0 : i32
    return %arg0, %c0_i32, %c0_i32_0 : i32, i32, i32
  }
  func.func @transform_6(%arg0: i32) -> (i32, i32, i32) {
    %c0_i32 = arith.constant 0 : i32
    %c0_i32_0 = arith.constant 0 : i32
    %c0_i32_1 = arith.constant 0 : i32
    return %arg0, %c0_i32, %c0_i32_0 : i32, i32, i32
  }
  func.func @transform_7(%arg0: i32) -> (i32, i32, i32) {
    %c0_i32 = arith.constant 0 : i32
    %c0_i32_0 = arith.constant 0 : i32
    %c0_i32_1 = arith.constant 0 : i32
    return %arg0, %c0_i32, %c0_i32_0 : i32, i32, i32
  }
  func.func @transform_8(%arg0: i32) -> (i32, i32, i32) {
    %c0_i32 = arith.constant 0 : i32
    %c0_i32_0 = arith.constant 0 : i32
    %c0_i32_1 = arith.constant 0 : i32
    return %arg0, %c0_i32, %c0_i32_0 : i32, i32, i32
  }
  func.func @transform_9(%arg0: i32) -> (i32, i32, i32) {
    %c0_i32 = arith.constant 0 : i32
    %c0_i32_0 = arith.constant 0 : i32
    %c0_i32_1 = arith.constant 0 : i32
    return %arg0, %c0_i32, %c0_i32_0 : i32, i32, i32
  }
  func.func @transform_10(%arg0: i32) -> (i32, i32, i32) {
    %c0_i32 = arith.constant 0 : i32
    %c0_i32_0 = arith.constant 0 : i32
    %c0_i32_1 = arith.constant 0 : i32
    return %arg0, %c0_i32, %c0_i32_0 : i32, i32, i32
  }
  func.func @transform_11(%arg0: i32) -> (i32, i32, i32) {
    %c0_i32 = arith.constant 0 : i32
    %c0_i32_0 = arith.constant 0 : i32
    %c0_i32_1 = arith.constant 0 : i32
    return %arg0, %c0_i32, %c0_i32_0 : i32, i32, i32
  }
  func.func @transform_12(%arg0: i32) -> (i32, i32, i32) {
    %c0_i32 = arith.constant 0 : i32
    %c0_i32_0 = arith.constant 0 : i32
    %c0_i32_1 = arith.constant 0 : i32
    return %arg0, %c0_i32, %c0_i32_0 : i32, i32, i32
  }
  func.func @transform_13(%arg0: i32) -> (i32, i32) {
    %c0_i32 = arith.constant 0 : i32
    %c0_i32_0 = arith.constant 0 : i32
    %c0_i32_1 = arith.constant 0 : i32
    return %c0_i32, %c0_i32_0 : i32, i32
  }
  func.func @transform_14(%arg0: i32) -> (i32, i32) {
    %c0_i32 = arith.constant 0 : i32
    %c0_i32_0 = arith.constant 0 : i32
    %c0_i32_1 = arith.constant 0 : i32
    return %c0_i32, %c0_i32_0 : i32, i32
  }
  func.func @transform_15(%arg0: i32) -> (i32, i32, i32) {
    %c0_i32 = arith.constant 0 : i32
    %c0_i32_0 = arith.constant 0 : i32
    %c0_i32_1 = arith.constant 0 : i32
    %c0_i32_2 = arith.constant 0 : i32
    return %c0_i32, %c0_i32_0, %c0_i32_1 : i32, i32, i32
  }
}

</mosaic_0001>

<bundles_post_ra>
// kernel: tpu_custom_call.1
= control target key start
LH: loop header
LB: loop body
LE: loop exit
PB: predicated region body
PF: predicated region fallthrough
CT: control target
= control target key end

     0   :  { %s7652_s0 = inlined_call_operand.hbm [shape: f32[2,8,128], index: 0, kind: input, shape index: {}]   ;;  %s7653_s1 = inlined_call_operand.hbm [shape: bf16[2,128,384], index: 1, kind: input, shape index: {}]   ;;  %s7654_s2 = inlined_call_operand.vmem [shape: f32[2,1,384], index: 2, kind: input, shape index: {}]   ;;  %s7655_s3 = inlined_call_operand.hbm [shape: bf16[2,128,128], index: 3, kind: input, shape index: {}]   ;;  %s7656_s4 = inlined_call_operand.vmem [shape: f32[2,1,128], index: 4, kind: input, shape index: {}]   ;;  %s7657_s5 = inlined_call_operand.vmem [shape: f32[2,1,128], index: 5, kind: input, shape index: {}]   ;;  %s7658_s6 = inlined_call_operand.vmem [shape: f32[2,1,128], index: 6, kind: input, shape index: {}]   ;;  %s7659_s7 = inlined_call_operand.hbm [shape: bf16[2,128,2048], index: 7, kind: input, shape index: {}]   ;;  %s7660_s8 = inlined_call_operand.hbm [shape: f32[2,1,2048], index: 8, kind: input, shape index: {}]   ;;  %s7661_s9 = inlined_call_operand.hbm [shape: bf16[2,2048,128], index: 9, kind: input, shape index: {}]   ;;  %s7662_s10 = inlined_call_operand.vmem [shape: f32[2,1,128], index: 10, kind: input, shape index: {}]   ;;  %s7663_s11 = inlined_call_operand.vmem [shape: f32[2,1,128], index: 11, kind: input, shape index: {}]   ;;  %s7664_s12 = inlined_call_operand.vmem [shape: f32[2,1,128], index: 12, kind: input, shape index: {}]   ;;  %s7665_s13 = inlined_call_operand.hbm [shape: bf16[128,128], index: 13, kind: input, shape index: {}]   ;;  %s7666_s14 = inlined_call_operand.vmem [shape: f32[1,128], index: 14, kind: input, shape index: {}]   ;;  %s7667_s15 = inlined_call_operand.hbm [shape: f32[2,8,128], index: 15, kind: output, shape index: {}]  }
   0x1   :  { %7689 = sst [smem:[#allocation26_spill]] %s7652_s0 }
   0x2   :  { %7690 = sst [smem:[#allocation27_spill]] %s7653_s1 }
   0x3   :  { %7691 = sst [smem:[#allocation28_spill]] %s7654_s2 }
   0x4   :  { %7692 = sst [smem:[#allocation29_spill]] %s7655_s3 }
   0x5   :  { %7693 = sst [smem:[#allocation30_spill]] %s7656_s4 }
   0x6   :  { %7694 = sst [smem:[#allocation31_spill]] %s7657_s5 }
   0x7   :  { %7695 = sst [smem:[#allocation32_spill]] %s7658_s6 }
   0x8   :  { %7696 = sst [smem:[#allocation33_spill]] %s7659_s7 }
   0x9   :  { %7697 = sst [smem:[#allocation34_spill]] %s7660_s8 }
   0xa   :  { %7698 = sst [smem:[#allocation35_spill]] %s7662_s10 }
   0xb   :  { %7699 = sst [smem:[#allocation36_spill]] %s7663_s11 }
   0xc   :  { %7700 = sst [smem:[#allocation37_spill]] %s7664_s12 }
   0xd   :  { %7701 = sst [smem:[#allocation38_spill]] %s7665_s13 }
   0xe   :  { %7702 = sst [smem:[#allocation39_spill]] %s7666_s14 }
   0xf   :  { %7703 = sst [smem:[#allocation40_spill]] %s7667_s15 }
  0x10   :  { %20 = vsyncpa [#allocation4], 0 }
  0x11   :  { %21 = vsyncpa [#allocation7], 0 }
  0x12   :  { %23 = vsyncpa [#allocation7 + $0x1], 0 }
  0x13   :  { %24 = vsyncpa [#allocation10], 0 }
  0x14   :  { %26 = vsyncpa [#allocation10 + $0x1], 0 }
  0x15   :  { %27 = vsyncpa [#allocation13], 0 }
  0x16   :  { %29 = vsyncpa [#allocation13 + $0x1], 0 }
  0x17   :  { %30 = vsyncpa [#allocation5], 0  ;;  %s6631_s18 = smov 0   ;;  %s6633_s19 = smov 0  }
  0x18   :  { %s6635_s20 = smov 0   ;;  %s6637_s21 = smov 0  }
  0x19 LB: > { %7704 = sst [smem:[#allocation22_spill]] %s6520_s20  ;;  %s6650_s22 = sadd.s32 4294967295, %s6524_s21   ;;  %s6524_s21 = sphi %s6637_s21, %s7756_s21   ;;  %s6520_s20 = sphi %s6635_s20, %s7758_s20   ;;  %s6516_s19 = sphi %s6633_s19, %s7760_s19   ;;  %s6512_s18 = sphi %s6631_s18, %s7759_s18  }
  0x1a   : > { %s6653_s23 = sadd.s32 1, %s6524_s21   ;;  %s64_s25 = sadd.s32 1, %s6520_s20 }
  0x1b   : > { %7705 = sst [smem:[#allocation23_spill]] %s6653_s23  ;;  %s61_s24 = ssub.s32 %s6524_s21, %s6653_s23 }
  0x1c   : > { %p62_p0 = scmp.eq.s32.totalorder %s61_s24, 0  ;;  %p71_p1 = scmp.ne.s32.totalorder %s6520_s20, %s6516_s19 }
  0x1d   : > { %p72_p2 = scmp.eq.s32.totalorder %s6524_s21, 0  ;;  %p77_p3 = scmp.ne.s32.totalorder %s6516_s19, %s6512_s18 }
  0x1e   : > { %s6663_s26 = scalar_select %p62_p0, %s6520_s20, %s64_s25  }
  0x1f   : > { %p6665_p4 = por %p72_p2, %p71_p1  ;;  %p7672_p5 = scmp.eq.s32.totalorder %s6650_s22, 0 }
  0x20   : > { %7706 = sst [smem:[#allocation24_spill]] %s6663_s26  ;;  %p5141_p6 = scmp.ge.s32.totalorder %s6524_s21, 1 }
  0x21   : > { %s7707_s27 = scalar_select %p6665_p4, 1, 0 }
  0x22   : > { %p437_p7 = scmp.lt.s32.totalorder %s6524_s21, 3  ;;  %p6674_p8 = por %p7672_p5, %p77_p3 }
  0x23   : > { %s6526_s30 = smov [#allocation14]   ;;  %s6693_s18 = sand.u32 1, %s6524_s21  }
  0x24   : > { %s7708_s28 = scalar_select %p6674_p8, 1, 0 }
  0x25   : > { %p6679_p10 = pnand %p5141_p6, %p437_p7  ;;  %s462_s16 = sshll.u32 %s6526_s30, 4  ;;  %s463_s16 = int_to_ptr.vmem [resolvable:$true] %s462_s16 }
  0x26   : > { %7709 = sst [smem:[#allocation25_spill]] %s7708_s28  ;;  %s6696_s24 = sand.u32 1, %s6520_s20  }
  0x27   : > { %s7710_s29 = scalar_select %p6679_p10, 1, 0 }
  0x28   : > { %p5923_p11 = pneg %p6679_p10  ;;  %s7712_s13 = sld [smem:[#allocation38_spill]] }
  0x2a   : > { %p6687_p12 = pnand %p5923_p11, %p7672_p5 }
  0x2c   : > { %s7711_s17 = scalar_select %p6687_p12, 1, 0 }
  0x2d   : > { %p7679_p1 = pneg %p6687_p12 }
  0x2e   : > { %s6238_s23 = scalar_lea.hbm %s7712_s13, 1024 }
  0x2f   : > { %p6239_p0 = scmp.ne.s32.totalorder %s7712_s13, %s6238_s23  ;;  %p6245_p6 = scmp.lt.u32.totalorder %s6238_s23, %s7712_s13 }
  0x31   : > { %p6241_p2 = pnand %p7679_p1, %p6239_p0 }
  0x33   : > { %p6242_p3 = pneg %p6241_p2 }
  0x35   : > { %p6247_p7 = pnand %p6245_p6, %p6242_p3 }
  0x37   : > { %6250 = shalt.err (!%p6247_p7)
}
  0x38   : > { %s6251_s20 = scalar_lea.vmem %s463_s16, 1024  ;;  %p6259_p13 = scmp.lt.s32.totalorder %s463_s16, %s463_s16 }
  0x39   : > { %p6252_p11 = scmp.ne.s32.totalorder %s463_s16, %s6251_s20  ;;  %p6260_p8 = scmp.lt.s32.totalorder %s6251_s20, %s6251_s20 }
  0x3b   : > { %p6254_p9 = pnand %p6252_p11, %p7679_p1  ;;  %p6261_p10 = por %p6260_p8, %p6259_p13 }
  0x3d   : > { %p6255_p5 = pneg %p6254_p9 }
  0x3f   : > { %p6262_p4 = pnand %p6261_p10, %p6255_p5 }
  0x41   : > { %6265 = shalt.err (!%p6262_p4)
}
  0x42   : > { %s7677_s15 = smov 64   ;;  %s7675_s12 = smov 4  }
  0x43   : > { %5929 = dma.hbm_to_vmem [thread:$0]  (!%p6687_p12), %s7712_s13, 1024, %s463_s16, [#allocation13], %s7677_s15, %s7677_s15, %s7675_s12  }
  0x44   : > { %s5897_s20 = smul.u32 192, %s6696_s24  ;;  %p7713_p8 = scmp.ne.s32.totalorder %s7707_s27, 0 }
  0x45   : > { %p7714_p5 = scmp.lt.s32.totalorder %s6524_s21, 2  ;;  %s5898_s25 = smul.u32 3072, %s6524_s21 }
  0x46   : > { %s7716_s1 = sld [smem:[#allocation27_spill]]  ;;  %s483_s14 = scalar_lea.vmem [#allocation6], %s5897_s20 }
  0x47   : > { %p6728_p4 = pnand %p7714_p5, %p7713_p8  ;;  %s490_s16 = sshll.u32 %s483_s14, 4  ;;  %s6738_s16 = int_to_ptr.vmem [resolvable:$true] %s490_s16 }
  0x48   : > { %s7682_s27 = scalar_lea.sflag [#allocation7], %s6693_s18 }
  0x49   : > { %s7715_s26 = scalar_select %p6728_p4, 1, 0 }
  0x4a   : > { %p6745_p10 = pneg %p6728_p4 }
  0x4c   : > { %s6736_s10 = scalar_lea.hbm %s7716_s1, %s5898_s25  ;;  %s6271_s30 = scalar_lea.hbm %s7716_s1, 6144 }
  0x4d   : > { %s6266_s23 = scalar_lea.hbm %s6736_s10, 3072  ;;  %p6272_p2 = scmp.lt.u32.totalorder %s6736_s10, %s7716_s1 }
  0x4e   : > { %p6267_p9 = scmp.ne.s32.totalorder %s6736_s10, %s6266_s23  ;;  %p6273_p3 = scmp.lt.u32.totalorder %s6271_s30, %s6266_s23 }
  0x4f   : > { %s7717_s12 = scalar_select %p6745_p10, 1, 0 }
  0x50   : > { %p6269_p13 = pnand %p6745_p10, %p6267_p9  ;;  %p6274_p6 = por %p6273_p3, %p6272_p2 }
  0x51   : > { %p6275_p7 = scmp.lt.u32.totalorder %s6266_s23, %s6736_s10 }
  0x52   : > { %p6270_p0 = pneg %p6269_p13 }
  0x53   : > { %p6276_p11 = por %p6275_p7, %p6274_p6 }
  0x55   : > { %p6277_p8 = pnand %p6276_p11, %p6270_p0 }
  0x57   : > { %6280 = shalt.err (!%p6277_p8)
}
  0x58   : > { %s6281_s15 = scalar_lea.vmem %s6738_s16, 3072  ;;  %s6529_s11 = smov [#allocation6]  }
  0x59   : > { %p6282_p5 = scmp.ne.s32.totalorder %s6738_s16, %s6281_s15  ;;  %s6286_s25 = sshll.u32 %s6529_s11, 4  ;;  %s6287_s25 = int_to_ptr.vmem [resolvable:$false] %s6286_s25 }
  0x5a   : > { %s6288_s20 = scalar_lea.vmem %s6287_s25, 6144  ;;  %p6289_p1 = scmp.lt.s32.totalorder %s6738_s16, %s6287_s25 }
  0x5b   : > { %p6284_p9 = pnand %p6282_p5, %p6745_p10  ;;  %p6290_p12 = scmp.lt.s32.totalorder %s6288_s20, %s6281_s15 }
  0x5d   : > { %p6285_p13 = pneg %p6284_p9  ;;  %p6291_p2 = por %p6290_p12, %p6289_p1 }
  0x5f   : > { %p6292_p3 = pnand %p6291_p2, %p6285_p13 }
  0x61   : > { %6295 = shalt.err (!%p6292_p3)
}
  0x62   : > { %s6530_s23 = smov 192   ;;  %s6531_s30 = smov 12  }
  0x63   : > { %5933 = dma.hbm_to_vmem [thread:$0]  (!%p6728_p4), %s6736_s10, 3072, %s6738_s16, %s7682_s27, %s6530_s23, %s6530_s23, %s6531_s30  }
  0x64   : > { %s5149_s14 = sshll.u32 %s6696_s24, 10  ;;  %s5497_s15 = sshll.u32 %s6524_s21, 14 }
  0x65   : > { %s7718_s7 = sld [smem:[#allocation33_spill]]  ;;  %s550_s1 = scalar_lea.vmem [#allocation9], %s5149_s14 }
  0x66   : > { %s557_s13 = sshll.u32 %s550_s1, 4  ;;  %s547_s2 = scalar_lea.sflag [#allocation10], %s6693_s18  ;;  %s6781_s13 = int_to_ptr.vmem [resolvable:$true] %s557_s13 }
  0x6b   : > { %s6777_s20 = scalar_lea.hbm %s7718_s7, %s5497_s15  ;;  %s6301_s23 = scalar_lea.hbm %s7718_s7, 32768 }
  0x6c   : > { %s6296_s6 = scalar_lea.hbm %s6777_s20, 16384  ;;  %p6302_p6 = scmp.lt.u32.totalorder %s6777_s20, %s7718_s7 }
  0x6d   : > { %p6297_p12 = scmp.ne.s32.totalorder %s6777_s20, %s6296_s6  ;;  %p6303_p7 = scmp.lt.u32.totalorder %s6301_s23, %s6296_s6 }
  0x6e   : > { %p6305_p8 = scmp.lt.u32.totalorder %s6296_s6, %s6777_s20 }
  0x6f   : > { %p6299_p1 = pnand %p6297_p12, %p6745_p10  ;;  %p6304_p11 = por %p6303_p7, %p6302_p6 }
  0x71   : > { %p6300_p0 = pneg %p6299_p1  ;;  %p6306_p5 = por %p6305_p8, %p6304_p11 }
  0x73   : > { %p6307_p9 = pnand %p6306_p5, %p6300_p0 }
  0x75   : > { %6310 = shalt.err (!%p6307_p9)
}
  0x76   : > { %s6311_s1 = scalar_lea.vmem %s6781_s13, 16384  ;;  %s6532_s25 = smov [#allocation9]  }
  0x77   : > { %p6312_p13 = scmp.ne.s32.totalorder %s6781_s13, %s6311_s1  ;;  %s6316_s10 = sshll.u32 %s6532_s25, 4  ;;  %s6317_s10 = int_to_ptr.vmem [resolvable:$false] %s6316_s10 }
  0x78   : > { %s6318_s16 = scalar_lea.vmem %s6317_s10, 32768  ;;  %p6319_p12 = scmp.lt.s32.totalorder %s6781_s13, %s6317_s10 }
  0x79   : > { %p6314_p2 = pnand %p6312_p13, %p6745_p10  ;;  %p6320_p1 = scmp.lt.s32.totalorder %s6318_s16, %s6311_s1 }
  0x7b   : > { %p6315_p3 = pneg %p6314_p2  ;;  %p6321_p6 = por %p6320_p1, %p6319_p12 }
  0x7d   : > { %p6322_p7 = pnand %p6321_p6, %p6315_p3 }
  0x7f   : > { %6325 = shalt.err (!%p6322_p7)
}
  0x80   : > { %s6533_s6 = smov 1024   ;;  %s7719_s23 = smov 64  }
  0x81   : > { %5939 = dma.hbm_to_vmem [thread:$0]  (!%p6728_p4), %s6777_s20, 16384, %s6781_s13, %s547_s2, %s6533_s6, %s6533_s6, %s7719_s23  }
  0x82   : > { %s6813_s1 = scalar_lea.hbm %s7661_s9, %s5497_s15  ;;  %s590_s25 = scalar_lea.vmem [#allocation12], %s5149_s14 }
  0x83   : > { %s597_s10 = sshll.u32 %s590_s25, 4  ;;  %s6534_s16 = smov [#allocation3]   ;;  %s6817_s10 = int_to_ptr.vmem [resolvable:$true] %s597_s10 }
  0x84   : > { %s449_s27 = sshll.u32 %s6534_s16, 4  ;;  %s5146_s7 = sshll.u32 %s6696_s24, 6  ;;  %s450_s27 = int_to_ptr.vmem [resolvable:$true] %s449_s27 }
  0x85   : > { %s7720_s0 = sld [smem:[#allocation26_spill]]  ;;  %p7721_p11 = scmp.ne.s32.totalorder %s7711_s17, 0 }
  0x87   : > { %p7722_p8 = pneg %p7721_p11 }
  0x8b   : > { %s6326_s28 = scalar_lea.hbm %s7720_s0, 256 }
  0x8c   : > { %p6327_p0 = scmp.ne.s32.totalorder %s7720_s0, %s6326_s28  ;;  %p6333_p13 = scmp.lt.u32.totalorder %s6326_s28, %s7720_s0 }
  0x8e   : > { %p6329_p5 = pnand %p6327_p0, %p7722_p8 }
  0x90   : > { %p6330_p9 = pneg %p6329_p5 }
  0x92   : > { %p6335_p2 = pnand %p6333_p13, %p6330_p9 }
  0x94   : > { %6338 = shalt.err (!%p6335_p2)
}
  0x95   : > { %s6339_s6 = scalar_lea.vmem %s450_s27, 256  ;;  %p7723_p12 = pmov %p7722_p8 }
  0x96   : > { %p6340_p3 = scmp.ne.s32.totalorder %s450_s27, %s6339_s6  ;;  %p6347_p7 = scmp.lt.s32.totalorder %s450_s27, %s450_s27 }
  0x97   : > { %p6348_p4 = scmp.lt.s32.totalorder %s6339_s6, %s6339_s6 }
  0x98   : > { %p6342_p1 = pnand %p6340_p3, %p7723_p12 }
  0x99   : > { %p6349_p10 = por %p6348_p4, %p6347_p7 }
  0x9a   : > { %p6343_p6 = pneg %p6342_p1 }
  0x9c   : > { %p6350_p0 = pnand %p6349_p10, %p6343_p6 }
  0x9e   : > { %6353 = shalt.err (!%p6350_p0)
}
  0x9f   : > { %s6535_s4 = smov 128   ;;  %s6536_s5 = smov 8  }
  0xa0   : > { %5926 = dma.hbm_to_vmem [thread:$0]  (!%p7721_p11), %s7720_s0, 256, %s450_s27, [#allocation4], %s6535_s4, %s6535_s4, %s6536_s5  }
  0xa1   : > { %s5496_s11 = sshll.u32 %s6524_s21, 10  ;;  %s7724_s3 = sld [smem:[#allocation29_spill]] }
  0xa2   : > { %s511_s20 = scalar_lea.vmem [#allocation8], %s5146_s7  ;;  %s5152_s15 = sshll.u32 %s6696_s24, 4 }
  0xa3   : > { %s518_s14 = sshll.u32 %s511_s20, 4  ;;  %p7725_p10 = scmp.ne.s32.totalorder %s7717_s12, 0  ;;  %s6846_s14 = int_to_ptr.vmem [resolvable:$true] %s518_s14 }
  0xa7   : > { %s6844_s13 = scalar_lea.hbm %s7724_s3, %s5496_s11  ;;  %s6359_s4 = scalar_lea.hbm %s7724_s3, 2048 }
  0xa8   : > { %s6354_s17 = scalar_lea.hbm %s6844_s13, 1024  ;;  %p6360_p5 = scmp.lt.u32.totalorder %s6844_s13, %s7724_s3 }
  0xa9   : > { %p6355_p4 = scmp.ne.s32.totalorder %s6844_s13, %s6354_s17  ;;  %p6361_p9 = scmp.lt.u32.totalorder %s6359_s4, %s6354_s17 }
  0xaa   : > { %p6363_p2 = scmp.lt.u32.totalorder %s6354_s17, %s6844_s13 }
  0xab   : > { %p6357_p8 = pnand %p6355_p4, %p7725_p10  ;;  %p6362_p13 = por %p6361_p9, %p6360_p5 }
  0xad   : > { %p6358_p11 = pneg %p6357_p8  ;;  %p6364_p3 = por %p6363_p2, %p6362_p13 }
  0xaf   : > { %p6365_p12 = pnand %p6364_p3, %p6358_p11 }
  0xb1   : > { %6368 = shalt.err (!%p6365_p12)
}
  0xb2   : > { %s6369_s7 = scalar_lea.vmem %s6846_s14, 1024  ;;  %s6537_s30 = smov [#allocation8]  }
  0xb3   : > { %p6370_p1 = scmp.ne.s32.totalorder %s6846_s14, %s6369_s7  ;;  %s6374_s11 = sshll.u32 %s6537_s30, 4  ;;  %s6375_s11 = int_to_ptr.vmem [resolvable:$false] %s6374_s11 }
  0xb4   : > { %s6376_s25 = scalar_lea.vmem %s6375_s11, 2048  ;;  %p6377_p0 = scmp.lt.s32.totalorder %s6846_s14, %s6375_s11 }
  0xb5   : > { %p6372_p6 = pnand %p6370_p1, %p7725_p10  ;;  %p6378_p4 = scmp.lt.s32.totalorder %s6376_s25, %s6369_s7 }
  0xb7   : > { %p6373_p7 = pneg %p6372_p6  ;;  %p6379_p8 = por %p6378_p4, %p6377_p0 }
  0xb9   : > { %p6380_p5 = pnand %p6379_p8, %p6373_p7 }
  0xbb   : > { %6383 = shalt.err (!%p6380_p5)
}
  0xbc   : > { %p7726_p11 = scmp.ne.s32.totalorder %s7715_s26, 0  ;;  %s7727_s16 = smov 4  }
  0xbd   : > { %s7728_s20 = scalar_lea.sflag [#allocation7], %s6693_s18  ;;  %s5498_s17 = sshll.u32 %s6524_s21, 8 }
  0xbe   : > { %5936 = dma.hbm_to_vmem [thread:$0]  (!%p7726_p11), %s6844_s13, 1024, %s6846_s14, %s7728_s20, %s7719_s23, %s7719_s23, %s7727_s16  }
  0xbf   : > { %s7729_s8 = sld [smem:[#allocation34_spill]]  ;;  %s571_s5 = scalar_lea.vmem [#allocation11], %s5152_s15 }
  0xc0   : > { %s579_s28 = sshll.u32 %s571_s5, 4  ;;  %s580_s28 = int_to_ptr.vmem [resolvable:$true] %s579_s28 }
  0xc5   : > { %s6879_s4 = scalar_lea.hbm %s7729_s8, %s5498_s17  ;;  %s6389_s14 = scalar_lea.hbm %s7729_s8, 512 }
  0xc6   : > { %s6384_s7 = scalar_lea.hbm %s6879_s4, 256  ;;  %p6390_p3 = scmp.lt.u32.totalorder %s6879_s4, %s7729_s8 }
  0xc7   : > { %p6385_p9 = scmp.ne.s32.totalorder %s6879_s4, %s6384_s7  ;;  %p6391_p12 = scmp.lt.u32.totalorder %s6389_s14, %s6384_s7 }
  0xc8   : > { %p6393_p6 = scmp.lt.u32.totalorder %s6384_s7, %s6879_s4 }
  0xc9   : > { %p6387_p13 = pnand %p6385_p9, %p7725_p10  ;;  %p6392_p1 = por %p6391_p12, %p6390_p3 }
  0xcb   : > { %p6388_p2 = pneg %p6387_p13  ;;  %p6394_p7 = por %p6393_p6, %p6392_p1 }
  0xcd   : > { %p6395_p0 = pnand %p6394_p7, %p6388_p2 }
  0xcf   : > { %6398 = shalt.err (!%p6395_p0)
}
  0xd0   : > { %s6399_s24 = scalar_lea.vmem %s580_s28, 256  ;;  %s6538_s15 = smov [#allocation11]  }
  0xd1   : > { %p6400_p4 = scmp.ne.s32.totalorder %s580_s28, %s6399_s24  ;;  %s6404_s25 = sshll.u32 %s6538_s15, 4  ;;  %s6405_s25 = int_to_ptr.vmem [resolvable:$false] %s6404_s25 }
  0xd2   : > { %s6406_s20 = scalar_lea.vmem %s6405_s25, 512  ;;  %p6407_p9 = scmp.lt.s32.totalorder %s580_s28, %s6405_s25 }
  0xd3   : > { %p6402_p8 = pnand %p6400_p4, %p7725_p10  ;;  %p6408_p13 = scmp.lt.s32.totalorder %s6406_s20, %s6399_s24 }
  0xd5   : > { %p6403_p5 = pneg %p6402_p8  ;;  %p6409_p11 = por %p6408_p13, %p6407_p9 }
  0xd7   : > { %p6410_p3 = pnand %p6409_p11, %p6403_p5 }
  0xd9   : > { %6413 = shalt.err (!%p6410_p3)
}
  0xda   : > { %p7730_p12 = scmp.ne.s32.totalorder %s7715_s26, 0  ;;  %s587_s17 = scalar_lea.sflag [#allocation13], %s6693_s18 }
  0xdb   : > { %s6414_s27 = scalar_lea.hbm %s6813_s1, 16384  ;;  %s6419_s7 = scalar_lea.hbm %s7661_s9, 32768 }
  0xdc   : > { %5942 = dma.hbm_to_vmem [thread:$0]  (!%p7730_p12), %s6879_s4, 256, %s580_s28, %s547_s2  }
  0xdd   : > { %p6415_p2 = scmp.ne.s32.totalorder %s6813_s1, %s6414_s27  ;;  %p6420_p11 = scmp.lt.u32.totalorder %s6813_s1, %s7661_s9 }
  0xde   : > { %p6421_p7 = scmp.lt.u32.totalorder %s6419_s7, %s6414_s27  ;;  %p6423_p4 = scmp.lt.u32.totalorder %s6414_s27, %s6813_s1 }
  0xdf   : > { %p6417_p1 = pnand %p6415_p2, %p7725_p10 }
  0xe0   : > { %p6422_p0 = por %p6421_p7, %p6420_p11 }
  0xe1   : > { %p6418_p6 = pneg %p6417_p1 }
  0xe2   : > { %p6424_p8 = por %p6423_p4, %p6422_p0 }
  0xe4   : > { %p6425_p5 = pnand %p6424_p8, %p6418_p6 }
  0xe6   : > { %6428 = shalt.err (!%p6425_p5)
}
  0xe7   : > { %s6429_s2 = scalar_lea.vmem %s6817_s10, 16384  ;;  %s6539_s4 = smov [#allocation12]  }
  0xe8   : > { %p6430_p9 = scmp.ne.s32.totalorder %s6817_s10, %s6429_s2  ;;  %s6434_s28 = sshll.u32 %s6539_s4, 4  ;;  %s6435_s28 = int_to_ptr.vmem [resolvable:$false] %s6434_s28 }
  0xe9   : > { %s6436_s14 = scalar_lea.vmem %s6435_s28, 32768  ;;  %p6437_p2 = scmp.lt.s32.totalorder %s6817_s10, %s6435_s28 }
  0xea   : > { %p6432_p13 = pnand %p6430_p9, %p7725_p10  ;;  %p6438_p1 = scmp.lt.s32.totalorder %s6436_s14, %s6429_s2 }
  0xec   : > { %p6433_p3 = pneg %p6432_p13  ;;  %p6439_p11 = por %p6438_p1, %p6437_p2 }
  0xee   : > { %p6440_p7 = pnand %p6439_p11, %p6433_p3 }
  0xf0   : > { %6443 = shalt.err (!%p6440_p7)
}
  0xf1   : > { %5945 = dma.hbm_to_vmem [thread:$0]  (!%p7730_p12), %s6813_s1, 16384, %s6817_s10, %s587_s17, %s7719_s23, %s7719_s23, %s7727_s16  }
  0xf2   : > { %p7731_p10 = scmp.ne.s32.totalorder %s7710_s29, 0 }
  0xf3   : > { %p7732_p6 = scmp.eq.s32.totalorder (!%p7731_p10), %s6650_s22, 0 }
  0xf4   : > { %627 = sbr.rel (%p7731_p10) target bundleno = 4716 (0x126c), region = 80 }
  0xfb   : > { %6487 = dma.done.wait (%p7732_p6), [#allocation4], 256   ;;  %p7733_p0 = pmov %p7732_p6 }
  0xfc   : > { %s7734_s12 = sld [smem:[#allocation25_spill]]  ;;  %s633_s26 = sand.u32 1, %s6650_s22  }
  0xfd   : > { %6489 = vsyncadd (%p7733_p0), [#allocation4], 4294967040  ;;  %s635_s30 = sand.u32 1, %s6516_s19   ;;  %s634_s24 = scalar_lea.sflag [#allocation7], %s633_s26 }
  0xfe   : > { %s5899_s11 = smul.u32 192, %s635_s30 }
 0x100   : > { %s6937_s18 = scalar_lea.vmem [#allocation6], %s5899_s11 }
 0x102   : > { %p7735_p4 = scmp.ne.s32.totalorder %s7734_s12, 0 }
 0x104   : > { %6491 = dma.done.wait (%p7735_p4), %s634_s24, 4096  }
 0x105   : > { %6493 = vsyncadd (%p7735_p4), %s634_s24, 4294963200  ;;  %s5160_s29 = sshll.u32 %s635_s30, 6  ;;  %s5161_s23 = sshll.u32 %s635_s30, 10 }
 0x106   : > { %s6943_s1 = scalar_lea.vmem [#allocation8], %s5160_s29  ;;  %s652_s10 = scalar_lea.sflag [#allocation10], %s633_s26 }
 0x107   : > { %s6945_s16 = scalar_lea.vmem [#allocation9], %s5161_s23 }
 0x108   : > { %6495 = dma.done.wait (%p7735_p4), %s652_s10, 16640  }
 0x109   : > { %6497 = vsyncadd (%p7735_p4), %s652_s10, 4294950656  ;;  %s5162_s15 = sshll.u32 %s635_s30, 4  ;;  %s670_s20 = scalar_lea.sflag [#allocation13], %s633_s26 }
 0x10a   : > { %s6951_s25 = scalar_lea.vmem [#allocation11], %s5162_s15  ;;  %s6953_s17 = scalar_lea.vmem [#allocation12], %s5161_s23 }
 0x10b   : > { %6499 = dma.done.wait (%p7735_p4), %s670_s20, 16384  }
 0x10c   : > { %6501 = vsyncadd (%p7735_p4), %s670_s20, 4294950912  ;;  %p7736_p12 = pmov %p7733_p0 }
 0x10d   : > { %p7737_p8 = pmov %p7733_p0 }
 0x10e   : > { %6503 = dma.done.wait (%p7736_p12), [#allocation13], 1024  }
 0x10f   : > { %6505 = vsyncadd (%p7737_p8), [#allocation13], 4294966272  ;;  %p761_p5 = scmp.lt.s32.totalorder %s6650_s22, 1  ;;  %s7739_s28 = sld [smem:[#allocation31_spill]] }
 0x110   : > { %s7740_s30 = sld [smem:[#allocation32_spill]]  ;;  %s7741_s23 = sld [smem:[#allocation28_spill]] }
 0x111   : > { %s6965_s27 = scalar_select %p761_p5, %s6650_s22, 1 }
 0x112   : > { %s7742_s0 = sld [smem:[#allocation35_spill]]  ;;  %s7743_s7 = sld [smem:[#allocation36_spill]] }
 0x113   : > { %s5900_s6 = smul.u32 3, %s6965_s27  ;;  %s7744_s4 = sld [smem:[#allocation37_spill]] }
 0x114   : > { %p7745_p9 = scmp.ne.s32.totalorder %s6650_s22, 0 }
 0x115   : > { %s770_s14 = scalar_lea.vmem %s7739_s28, %s6965_s27  ;;  %v788_v0 = vld [vmem:[#allocation3] sm:$0xff] (!%p7745_p9)  ;;  %v789_v1 = vld [vmem:[#allocation3 + $0x8] sm:$0xff] (!%p7745_p9) }
 0x116   : > { %s773_s11 = scalar_lea.vmem %s7740_s30, %s6965_s27  ;;  %s6983_s10 = scalar_lea.vmem %s7741_s23, %s5900_s6  ;;  %790 = vst [vmem:[#allocation2] sm:$0xff] (!%p7745_p9), %v788_v0  ;;  %791 = vst [vmem:[#allocation2 + $0x8] sm:$0xff] (!%p7745_p9), %v789_v1 }
 0x117   : > { %787 = sbr.rel (%p7745_p9) target bundleno = 286 (0x11e), region = 112 }
 0x118   : > { %s776_s3 = scalar_lea.vmem %s7742_s0, %s6965_s27  ;;  %s779_s13 = scalar_lea.vmem %s7743_s7, %s6965_s27 }
 0x119   : > { %s782_s28 = scalar_lea.vmem %s7744_s4, %s6965_s27 }
 0x11e PF: > { %v6020_v2 = vld [vmem:[%s6937_s18 + $0x4] ss:$12 sps:$4 sm:$0xff]   ;;  %v6022_v3 = vld [vmem:[%s6937_s18] ss:$12 sps:$4 sm:$0xff]   ;;  %v6540_v4 = vmov 0   ;;  %v6541_v5 = vmov 0.0   ;;  %v829_v31 = vlaneseq }
 0x11f   : > { %1004 = vmatprep.mubr.bf16.mxu0 %v6540_v4  ;;  %5741 = vmatprep.subr.bf16.mxu1 %v6541_v5  ;;  %v6023_v6 = vld [vmem:[%s6937_s18 + $0x1c] ss:$12 sps:$4 sm:$0xff]   ;;  %v6025_v7 = vld [vmem:[%s6937_s18 + $0x18] ss:$12 sps:$4 sm:$0xff]   ;;  %v6026_v8 = vld [vmem:[%s6937_s18 + $0x34] ss:$12 sps:$4 sm:$0xff]  }
 0x120   : > { %972 = vmatprep.subr.bf16.mxu0 %v6020_v2  ;;  %v6028_v9 = vld [vmem:[%s6937_s18 + $0x30] ss:$12 sps:$4 sm:$0xff]   ;;  %v6029_v10 = vld [vmem:[%s6937_s18 + $0x4c] ss:$12 sps:$4 sm:$0xff]   ;;  %v6031_v11 = vld [vmem:[%s6937_s18 + $0x48] ss:$12 sps:$4 sm:$0xff]  }
 0x121   : > { %973 = vmatpush1.bf16.msra.mxu0 %v6022_v3  ;;  %v6032_v12 = vld [vmem:[%s6937_s18 + $0x64] ss:$12 sps:$4 sm:$0xff]   ;;  %v6044_v13 = vld [vmem:[%s6937_s18 + $0x8] ss:$12 sps:$4 sm:$0xff]   ;;  %v6045_v14 = vld [vmem:[%s6937_s18 + $0x20] ss:$12 sps:$4 sm:$0xff]  }
 0x122   : > { %974 = vmatprep.subr.bf16.mxu0 %v6023_v6  ;;  %5742 = vmatpush3.bf16.msra.mxu1 %v6044_v13  ;;  %v6034_v15 = vld [vmem:[%s6937_s18 + $0x60] ss:$12 sps:$4 sm:$0xff]   ;;  %v6035_v16 = vld [vmem:[%s6937_s18 + $0x7c] ss:$12 sps:$4 sm:$0xff]   ;;  %v6046_v17 = vld [vmem:[%s6937_s18 + $0x38] ss:$12 sps:$4 sm:$0xff]  }
 0x123   : > { %5743 = vmatprep.subr.bf16.mxu1 %v6541_v5  ;;  %v6037_v18 = vld [vmem:[%s6937_s18 + $0x78] ss:$12 sps:$4 sm:$0xff]   ;;  %v6038_v19 = vld [vmem:[%s6937_s18 + $0x94] ss:$12 sps:$4 sm:$0xff]   ;;  %v6047_v20 = vld [vmem:[%s6937_s18 + $0x50] ss:$12 sps:$4 sm:$0xff]  }
 0x124   : > { %v6040_v21 = vld [vmem:[%s6937_s18 + $0x90] ss:$12 sps:$4 sm:$0xff]   ;;  %v6041_v22 = vld [vmem:[%s6937_s18 + $0xac] ss:$12 sps:$4 sm:$0xff]   ;;  %v6048_v23 = vld [vmem:[%s6937_s18 + $0x68] ss:$12 sps:$4 sm:$0xff]  }
 0x125   : > { %975 = vmatpush1.bf16.msra.mxu0 %v6025_v7  ;;  %v6043_v24 = vld [vmem:[%s6937_s18 + $0xa8] ss:$12 sps:$4 sm:$0xff]   ;;  %v792_v25 = vld [vmem:[#allocation2] sm:$0xff]  ;;  %v6051_v30 = vld [vmem:[%s6937_s18 + $0xb0] ss:$12 sps:$4 sm:$0xff]   ;;  %vm6542_vm0 = vmmov 0  }
 0x126   : > { %976 = vmatprep.subr.bf16.mxu0 %v6026_v8  ;;  %5744 = vmatpush3.bf16.msra.mxu1 %v6045_v14  ;;  %v793_v26 = vld [vmem:[#allocation2 + $0x8] sm:$0xff]  ;;  %v6050_v29 = vld [vmem:[%s6937_s18 + $0x98] ss:$12 sps:$4 sm:$0xff]   ;;  %v7040_v32 = vshrl.u32 %v829_v31, 7  ;;  %v827_v34 = vld [vmem:[%s6983_s10] sm:$0x7] }
 0x127   : > { %5745 = vmatprep.subr.bf16.mxu1 %v6541_v5  ;;  %v6049_v27 = vld [vmem:[%s6937_s18 + $0x80] ss:$12 sps:$4 sm:$0xff]   ;;  %v794_v28 = vpack.c.bf16 %v793_v26, %v792_v25  ;;  %5757 = vmatprep.mubr.msk.bf16.mxu1 %vm6542_vm0, %v6541_v5  ;;  %vm1074_vm1 = vcmask 261120   ;;  %vm1197_vm2 = vcmask 1043456   ;;  %vm1169_vm3 = vcmask 64512   ;;  %s6543_s0 = smov 96  }
 0x128   : > { %v7043_v33 = vsub.s32 1, %v7040_v32  ;;  %v7048_v36 = vsub.s32 0, %v7040_v32  ;;  %v7074_v52 = vsub.s32 2, %v7040_v32  ;;  %s6544_s8 = smov 64   ;;  %s6545_s18 = smov 32   ;;  %vm1979_vm4 = vcmask 523264  }
 0x129   : > { %977 = vmatpush1.bf16.msra.mxu0 %v6028_v9  ;;  %vm1982_vm5 = vcmask 785408   ;;  %s7746_s21 = sld [smem:[#allocation30_spill]]  ;;  %p5482_p13 = scmp.ne.s32.totalorder %s6650_s22, 1 }
 0x12a   : > { %978 = vmatprep.subr.bf16.mxu0 %v6029_v10  ;;  %5746 = vmatpush3.bf16.msra.mxu1 %v6046_v17  ;;  %v836_v35 = vrot.slane %v827_v34, %v7043_v33  ;;  %v832_v42 = vrot.slane %v827_v34, %v7048_v36  ;;  %v840_v53 = vrot.slane %v827_v34, %v7074_v52  ;;  %vm6547_vm6 = vmmov (!%p5482_p13), 0  }
 0x12b   : > { %5747 = vmatprep.subr.bf16.mxu1 %v6541_v5 }
 0x12d   : > { %979 = vmatpush1.bf16.msra.mxu0 %v6031_v11 }
 0x12e   : > { %980 = vmatprep.subr.bf16.mxu0 %v6032_v12  ;;  %5748 = vmatpush3.bf16.msra.mxu1 %v6047_v20 }
 0x12f   : > { %5749 = vmatprep.subr.bf16.mxu1 %v6541_v5  ;;  %s7747_s12 = scalar_lea.vmem %s7746_s21, %s6965_s27 }
 0x131   : > { %981 = vmatpush1.bf16.msra.mxu0 %v6034_v15 }
 0x132   : > { %982 = vmatprep.subr.bf16.mxu0 %v6035_v16  ;;  %5750 = vmatpush3.bf16.msra.mxu1 %v6048_v23 }
 0x133   : > { %5751 = vmatprep.subr.bf16.mxu1 %v6541_v5 }
 0x135   : > { %983 = vmatpush1.bf16.msra.mxu0 %v6037_v18 }
 0x136   : > { %984 = vmatprep.subr.bf16.mxu0 %v6038_v19  ;;  %5752 = vmatpush3.bf16.msra.mxu1 %v6049_v27 }
 0x137   : > { %5753 = vmatprep.subr.bf16.mxu1 %v6541_v5 }
 0x139   : > { %985 = vmatpush1.bf16.msra.mxu0 %v6040_v21 }
 0x13a   : > { %986 = vmatprep.subr.bf16.mxu0 %v6041_v22  ;;  %5754 = vmatpush3.bf16.msra.mxu1 %v6050_v29 }
 0x13b   : > { %5755 = vmatprep.subr.bf16.mxu1 %v6541_v5 }
 0x13d   : > { %987 = vmatpush1.bf16.msra.mxu0 %v6043_v24 }
 0x13e   : > { %5785 = vmatprep.subr.bf16.mxu0 %v6541_v5  ;;  %5756 = vmatpush3.bf16.msra.mxu1 %v6051_v30 }
 0x13f   : > { %5761 = vmatprep.subr.bf16.mxu1 %v6541_v5 }
 0x140   : > { %1005 = vmatmul.mubr.bf16.vlgmr.msra.gmra.mrb[0].mxu0 %v794_v28 }
 0x141   : > { %5787 = vmatprep.mubr.msk.bf16.mxu0 %vm6542_vm0, %v6541_v5  ;;  %5758 = vmatmul.mubr.bf16.vlgmr.msra.gmra.mrb[0].mxu1 %v794_v28 }
 0x142   : > { %5763 = vmatprep.mubr.msk.bf16.mxu1 %vm6542_vm0, %v6541_v5 }
 0x213   : > { %v1006_v37 = vpop.f32.mrb[0].mxu0 }
 0x214   : > { %v1008_v38 = vpop.f32.mrb[1].mxu0  ;;  %v1007_v46 = vadd.f32 %v1006_v37, %v832_v42  ;;  %v1049_v54 = vpop.f32.mrb[0].mxu1 }
 0x215   : > { %v1009_v39 = vadd.f32 %v1008_v38, %v836_v35  ;;  %v1010_v40 = vpop.f32.mrb[2].mxu0  ;;  %v1050_v55 = vadd.f32 %v1049_v54, %v840_v53  ;;  %v5759_v56 = vpop.f32.mrb[1].mxu1 }
 0x216   : > { %v1012_v41 = vpop.f32.mrb[3].mxu0  ;;  %v7058_v48 = vpack.c.bf16 %v1007_v46, %v1007_v46  ;;  %v1011_v50 = vadd.f32 %v1010_v40, %v832_v42  ;;  %v1052_v57 = vpop.f32.mrb[2].mxu1 }
 0x217   : > { %v7051_v43 = vpack.c.bf16 %v1009_v39, %v1009_v39  ;;  %v1013_v44 = vadd.f32 %v1012_v41, %v836_v35  ;;  %v7077_v58 = vpack.c.bf16 %v1050_v55, %v1050_v55  ;;  %v1053_v59 = vadd.f32 %v1052_v57, %v840_v53  ;;  %v5760_v60 = vpop.f32.mrb[3].mxu1 }
 0x218   : > { %v7067_v51 = vpack.c.bf16 %v1011_v50, %v1011_v50 }
 0x219   : > { %v1079_v45 = vsel %vm1074_vm1, %v7051_v43, 0  ;;  %v7056_v47 = vpack.c.bf16 %v1013_v44, %v1013_v44  ;;  %v1199_v61 = vsel %vm1197_vm2, %v7077_v58, 0  ;;  %v7096_v26 = vpack.c.bf16 %v1053_v59, %v1053_v59 }
 0x21a   : > { %5762 = vmatpush3.bf16.xpose.msra.mxu1 %v1079_v45 }
 0x21b   : > { %5767 = vmatprep.subr.bf16.mxu1 %v6541_v5  ;;  %v1125_v49 = vsel %vm1074_vm1, %v7056_v47, 0  ;;  %v1245_v29 = vsel %vm1197_vm2, %v7096_v26, 0 }
 0x221   : > { %5764 = vmatmul.mubr.msk.bf16.vlgmr.msra.gmra.mrb[4].mxu1 %vm1074_vm1, %v7058_v48 }
 0x222   : > { %5768 = vmatpush3.bf16.xpose.msra.mxu1 %v1125_v49  ;;  %5769 = vmatprep.mubr.msk.bf16.mxu1 %vm6542_vm0, %v6541_v5 }
 0x223   : > { %5773 = vmatprep.subr.bf16.mxu1 %v6541_v5 }
 0x229   : > { %5770 = vmatmul.mubr.msk.bf16.vlgmr.msra.gmra.mrb[8].mxu1 %vm1074_vm1, %v7067_v51 }
 0x22a   : > { %5775 = vmatprep.mubr.msk.bf16.mxu1 %vm6542_vm0, %v6541_v5  ;;  %5774 = vmatpush3.bf16.msra.mxu1 %v1199_v61 }
 0x22b   : > { %5779 = vmatprep.subr.bf16.mxu1 %v6541_v5 }
 0x2f4   : > { %v1115_v62 = vpop.f32.mrb[4].mxu1 }
 0x2f5   : > { %v1167_v63 = vmul.f32 0.17677669, %v1115_v62  ;;  %v5765_v0 = vpop.f32.mrb[5].mxu1 }
 0x2f6   : > { %v1118_v1 = vpop.f32.mrb[6].mxu1 }
 0x2f7   : > { %v5766_v2 = vpop.f32.mrb[7].mxu1  ;;  %v1170_v3 = vsel %vm1169_vm3, %v1167_v63, -inf }
 0x2f8   : > { %1171 = vmax.xlane.f32.xlu0 %v1170_v3 }
 0x2fc   : > { %v1161_v6 = vpop.f32.mrb[8].mxu1 }
 0x2fd   : > { %v1168_v7 = vmul.f32 0.17677669, %v1161_v6  ;;  %v5771_v8 = vpop.f32.mrb[9].mxu1 }
 0x2fe   : > { %v1164_v9 = vpop.f32.mrb[10].mxu1 }
 0x2ff   : > { %v5772_v10 = vpop.f32.mrb[11].mxu1  ;;  %v1173_v11 = vsel %vm1169_vm3, %v1168_v7, -inf }
 0x300   : > { %1174 = vmax.xlane.f32.xlu0 %v1173_v11 }
 0x316   : > { %1289 = vrot.lane.b32.xlu0 %v7051_v43, %s6543_s0 }
 0x385   : > { %v1172_v12 = vpop.xlane.xlu0 %1171 }
 0x386   : > { %v1176_v13 = vsub.f32 %v1167_v63, %v1172_v12 }
 0x388   : > { %v1178_v14 = vmul.f32 1.442695, %v1176_v13 }
 0x38a   : > { %6188 = vpow2.f32 %v1178_v14 }
 0x38d   : > { %v1175_v15 = vpop.xlane.xlu0 %1174 }
 0x38e   : > { %v1177_v20 = vsub.f32 %v1168_v7, %v1175_v15 }
 0x390   : > { %v1180_v21 = vmul.f32 1.442695, %v1177_v20 }
 0x391   : > { %v1290_v16 = vpop.permute.xlu0 %1289 }
 0x392   : > { %v1295_v17 = vsel %vm1074_vm1, %v1290_v16, 0  ;;  %6190 = vpow2.f32 %v1180_v21 }
 0x393   : > { %5786 = vmatpush3.bf16.xpose.msra.mxu0 %v1295_v17 }
 0x394   : > { %v6189_v18 = vpop.eup %6188  ;;  %5797 = vmatprep.subr.bf16.mxu0 %v6541_v5 }
 0x395   : > { %v1182_v19 = vsel %vm1169_vm3, %v6189_v18, 0.0 }
 0x396   : > { %1183 = vadd.xlane.f32.xlu1 %v1182_v19 }
 0x39c   : > { %v6191_v22 = vpop.eup %6190 }
 0x39d   : > { %v1185_v23 = vsel %vm1169_vm3, %v6191_v22, 0.0 }
 0x3a7   : > { %1339 = vrot.lane.b32.xlu1 %v7056_v47, %s6543_s0 }
 0x3cb   : > { %1186 = vadd.xlane.f32.xlu1 %v1185_v23 }
 0x3dc   : > { %1287 = vrot.lane.b32.xlu1 %v7058_v48, %s6543_s0 }
 0x3e0   : > { %1337 = vrot.lane.b32.xlu1 %v7067_v51, %s6543_s0 }
 0x423   : > { %v1184_v24 = vpop.xlane.xlu1 %1183 }
 0x424   : > { %6192 = vrcp.f32 %v1184_v24 }
 0x427   : > { %v1340_v30 = vpop.permute.xlu1 %1339 }
 0x428   : > { %v1345_v39 = vsel %vm1074_vm1, %v1340_v30, 0 }
 0x42e   : > { %v6193_v25 = vpop.eup %6192 }
 0x42f   : > { %v1190_v27 = vmul.f32 %v6193_v25, %v6189_v18 }
 0x431   : > { %v1192_v28 = vpack.c.bf16 %v1190_v27, %v1190_v27 }
 0x433   : > { %5776 = vmatmul.mubr.msk.bf16.vlgmr.msra.gmra.mrb[12].mxu1 %vm1169_vm3, %v1192_v28 }
 0x434   : > { %5780 = vmatpush3.bf16.msra.mxu1 %v1245_v29  ;;  %5781 = vmatprep.mubr.msk.bf16.mxu1 %vm6542_vm0, %v6541_v5 }
 0x435   : > { %5791 = vmatprep.subr.bf16.mxu1 %v6541_v5 }
 0x458   : > { %v1187_v31 = vpop.xlane.xlu1 %1186 }
 0x459   : > { %6194 = vrcp.f32 %v1187_v31 }
 0x45c   : > { %v1288_v34 = vpop.permute.xlu1 %1287 }
 0x45d   : > { %5788 = vmatmul.mubr.msk.bf16.vlgmr.msra.gmra.mrb[4].mxu0 %vm1074_vm1, %v1288_v34 }
 0x45e   : > { %5799 = vmatprep.mubr.msk.bf16.mxu0 %vm6542_vm0, %v6541_v5 }
 0x460   : > { %v1338_v40 = vpop.permute.xlu1 %1337 }
 0x463   : > { %v6195_v35 = vpop.eup %6194 }
 0x464   : > { %v1191_v37 = vmul.f32 %v6195_v35, %v6191_v22 }
 0x466   : > { %v1193_v38 = vpack.c.bf16 %v1191_v37, %v1191_v37 }
 0x468   : > { %5782 = vmatmul.mubr.msk.bf16.vlgmr.msra.gmra.mrb[16].mxu1 %vm1169_vm3, %v1193_v38 }
 0x469   : > { %5792 = vmatpush3.bf16.xpose.msra.mxu1 %v1345_v39  ;;  %5793 = vmatprep.mubr.msk.bf16.mxu1 %vm6542_vm0, %v6541_v5 }
 0x46a   : > { %5803 = vmatprep.subr.bf16.mxu1 %v6541_v5 }
 0x470   : > { %5794 = vmatmul.mubr.msk.bf16.vlgmr.msra.gmra.mrb[20].mxu1 %vm1074_vm1, %v1338_v40 }
 0x471   : > { %5805 = vmatprep.mubr.msk.bf16.mxu1 %vm6542_vm0, %v6541_v5 }
 0x506   : > { %v7115_v41 = vpop.f32.mrb[12].mxu1 }
 0x507   : > { %v5777_v42 = vpop.f32.mrb[13].mxu1 }
 0x508   : > { %v1238_v44 = vpop.f32.mrb[14].mxu1 }
 0x509   : > { %v5778_v45 = vpop.f32.mrb[15].mxu1 }
 0x530   : > { %v1331_v46 = vpop.f32.mrb[4].mxu0 }
 0x531   : > { %v1387_v49 = vmul.f32 0.17677669, %v1331_v46  ;;  %v5789_v50 = vpop.f32.mrb[5].mxu0 }
 0x532   : > { %v1334_v53 = vpop.f32.mrb[6].mxu0 }
 0x533   : > { %v5790_v54 = vpop.f32.mrb[7].mxu0  ;;  %v1389_v55 = vsel %vm1169_vm3, %v1387_v49, -inf }
 0x534   : > { %1390 = vmax.xlane.f32.xlu0 %v1389_v55 }
 0x53b   : > { %v7118_v56 = vpop.f32.mrb[16].mxu1 }
 0x53c   : > { %v5783_v57 = vpop.f32.mrb[17].mxu1 }
 0x53d   : > { %v1284_v59 = vpop.f32.mrb[18].mxu1 }
 0x53e   : > { %v5784_v60 = vpop.f32.mrb[19].mxu1 }
 0x543   : > { %v1381_v61 = vpop.f32.mrb[20].mxu1 }
 0x544   : > { %v1388_v62 = vmul.f32 0.17677669, %v1381_v61  ;;  %v5795_v63 = vpop.f32.mrb[21].mxu1 }
 0x545   : > { %v1384_v0 = vpop.f32.mrb[22].mxu1 }
 0x546   : > { %v5796_v1 = vpop.f32.mrb[23].mxu1  ;;  %v1392_v2 = vsel %vm1169_vm3, %v1388_v62, -inf }
 0x547   : > { %1393 = vmax.xlane.f32.xlu1 %v1392_v2 }
 0x558   : > { %1461 = vrot.lane.b32.xlu1 %v7096_v26, %s6543_s0 }
 0x55c   : > { %1511 = vrot.lane.b32.xlu1 %v7051_v43, %s6544_s8 }
 0x560   : > { %1561 = vrot.lane.b32.xlu1 %v7056_v47, %s6544_s8 }
 0x564   : > { %1559 = vrot.lane.b32.xlu1 %v7067_v51, %s6544_s8 }
 0x5c1   : > { %v1391_v3 = vpop.xlane.xlu0 %1390 }
 0x5c2   : > { %v1395_v6 = vsub.f32 %v1387_v49, %v1391_v3 }
 0x5c4   : > { %v1397_v7 = vmul.f32 1.442695, %v1395_v6 }
 0x5c6   : > { %6196 = vpow2.f32 %v1397_v7 }
 0x5d0   : > { %v6197_v8 = vpop.eup %6196 }
 0x5d1   : > { %v1401_v9 = vsel %vm1169_vm3, %v6197_v8, 0.0 }
 0x5d2   : > { %1402 = vadd.xlane.f32.xlu0 %v1401_v9 }
 0x5d4   : > { %v1394_v10 = vpop.xlane.xlu1 %1393 }
 0x5d5   : > { %v1396_v11 = vsub.f32 %v1388_v62, %v1394_v10 }
 0x5d7   : > { %v1399_v12 = vmul.f32 1.442695, %v1396_v11 }
 0x5d8   : > { %v1462_v13 = vpop.permute.xlu1 %1461 }
 0x5d9   : > { %6198 = vpow2.f32 %v1399_v12  ;;  %v1467_v14 = vsel %vm1197_vm2, %v1462_v13, 0 }
 0x5da   : > { %5804 = vmatpush3.bf16.msra.mxu1 %v1467_v14 }
 0x5db   : > { %5815 = vmatprep.subr.bf16.mxu1 %v6541_v5 }
 0x5dc   : > { %v1512_v23 = vpop.permute.xlu1 %1511 }
 0x5dd   : > { %v1517_v29 = vsel %vm1074_vm1, %v1512_v23, 0 }
 0x5e0   : > { %v1562_v28 = vpop.permute.xlu1 %1561 }
 0x5e1   : > { %v1567_v31 = vsel %vm1074_vm1, %v1562_v28, 0 }
 0x5e3   : > { %v6199_v15 = vpop.eup %6198 }
 0x5e4   : > { %v1404_v16 = vsel %vm1169_vm3, %v6199_v15, 0.0  ;;  %v1560_v35 = vpop.permute.xlu1 %1559 }
 0x5e5   : > { %1405 = vadd.xlane.f32.xlu0 %v1404_v16 }
 0x5fb   : > { %1413 = vrot.lane.b32.xlu0 %v7077_v58, %s6543_s0 }
 0x5ff   : > { %1509 = vrot.lane.b32.xlu0 %v7058_v48, %s6544_s8 }
 0x65f   : > { %v1403_v17 = vpop.xlane.xlu0 %1402 }
 0x660   : > { %6200 = vrcp.f32 %v1403_v17 }
 0x66a   : > { %v6201_v18 = vpop.eup %6200 }
 0x66b   : > { %v1409_v20 = vmul.f32 %v6201_v18, %v6197_v8 }
 0x66d   : > { %v1411_v24 = vpack.c.bf16 %v1409_v20, %v1409_v20 }
 0x672   : > { %v1406_v19 = vpop.xlane.xlu0 %1405 }
 0x673   : > { %6202 = vrcp.f32 %v1406_v19 }
 0x676   : > { %v1414_v21 = vpop.permute.xlu0 %1413 }
 0x677   : > { %v1419_v22 = vsel %vm1197_vm2, %v1414_v21, 0 }
 0x678   : > { %5798 = vmatpush3.bf16.msra.mxu0 %v1419_v22 }
 0x679   : > { %5809 = vmatprep.subr.bf16.mxu0 %v6541_v5 }
 0x67a   : > { %v1510_v34 = vpop.permute.xlu0 %1509 }
 0x67b   : > { %5800 = vmatmul.mubr.msk.bf16.vlgmr.msra.gmra.mrb[8].mxu0 %vm1169_vm3, %v1411_v24 }
 0x67c   : > { %5811 = vmatprep.mubr.msk.bf16.mxu0 %vm6542_vm0, %v6541_v5 }
 0x67d   : > { %v6203_v25 = vpop.eup %6202 }
 0x67e   : > { %v1410_v27 = vmul.f32 %v6203_v25, %v6199_v15 }
 0x680   : > { %v1412_v30 = vpack.c.bf16 %v1410_v27, %v1410_v27 }
 0x681   : > { %5810 = vmatpush3.bf16.xpose.msra.mxu0 %v1517_v29 }
 0x682   : > { %5806 = vmatmul.mubr.msk.bf16.vlgmr.msra.gmra.mrb[24].mxu1 %vm1169_vm3, %v1412_v30  ;;  %5821 = vmatprep.subr.bf16.mxu0 %v6541_v5 }
 0x683   : > { %5816 = vmatpush3.bf16.xpose.msra.mxu1 %v1567_v31  ;;  %5817 = vmatprep.mubr.msk.bf16.mxu1 %vm6542_vm0, %v6541_v5 }
 0x684   : > { %5827 = vmatprep.subr.bf16.mxu1 %v6541_v5 }
 0x688   : > { %5812 = vmatmul.mubr.msk.bf16.vlgmr.msra.gmra.mrb[12].mxu0 %vm1074_vm1, %v1510_v34 }
 0x689   : > { %5823 = vmatprep.mubr.msk.bf16.mxu0 %vm6542_vm0, %v6541_v5 }
 0x68a   : > { %5818 = vmatmul.mubr.msk.bf16.vlgmr.msra.gmra.mrb[28].mxu1 %vm1074_vm1, %v1560_v35 }
 0x68b   : > { %5829 = vmatprep.mubr.msk.bf16.mxu1 %vm6542_vm0, %v6541_v5 }
 0x74e   : > { %v7155_v37 = vpop.f32.mrb[8].mxu0 }
 0x74f   : > { %v5801_v38 = vpop.f32.mrb[9].mxu0 }
 0x750   : > { %v1458_v39 = vpop.f32.mrb[10].mxu0 }
 0x751   : > { %v5802_v40 = vpop.f32.mrb[11].mxu0 }
 0x755   : > { %v7157_v42 = vpop.f32.mrb[24].mxu1 }
 0x756   : > { %v6005_v44 = vpack.i.bf16 %v7157_v42, %v7155_v37  ;;  %v5807_v45 = vpop.f32.mrb[25].mxu1 }
 0x757   : > { %v1506_v46 = vpop.f32.mrb[26].mxu1 }
 0x758   : > { %v5808_v49 = vpop.f32.mrb[27].mxu1 }
 0x75b   : > { %v1553_v50 = vpop.f32.mrb[12].mxu0 }
 0x75c   : > { %v1609_v53 = vmul.f32 0.17677669, %v1553_v50  ;;  %v5813_v54 = vpop.f32.mrb[13].mxu0 }
 0x75d   : > { %v1556_v55 = vpop.f32.mrb[14].mxu0  ;;  %v1603_v57 = vpop.f32.mrb[28].mxu1 }
 0x75e   : > { %v1610_v59 = vmul.f32 0.17677669, %v1603_v57  ;;  %v5814_v60 = vpop.f32.mrb[15].mxu0  ;;  %v5819_v61 = vpop.f32.mrb[29].mxu1  ;;  %v1611_v62 = vsel %vm1169_vm3, %v1609_v53, -inf }
 0x75f   : > { %1612 = vmax.xlane.f32.xlu0 %v1611_v62  ;;  %v1606_v63 = vpop.f32.mrb[30].mxu1 }
 0x760   : > { %v5820_v0 = vpop.f32.mrb[31].mxu1  ;;  %v1614_v1 = vsel %vm1169_vm3, %v1610_v59, -inf }
 0x761   : > { %1615 = vmax.xlane.f32.xlu1 %v1614_v1 }
 0x772   : > { %1683 = vrot.lane.b32.xlu1 %v7096_v26, %s6544_s8 }
 0x776   : > { %1733 = vrot.lane.b32.xlu1 %v7051_v43, %s6545_s18 }
 0x77a   : > { %1783 = vrot.lane.b32.xlu1 %v7056_v47, %s6545_s18 }
 0x77e   : > { %1781 = vrot.lane.b32.xlu1 %v7067_v51, %s6545_s18 }
 0x7ec   : > { %v1613_v2 = vpop.xlane.xlu0 %1612 }
 0x7ed   : > { %v1617_v3 = vsub.f32 %v1609_v53, %v1613_v2 }
 0x7ee   : > { %v1616_v6 = vpop.xlane.xlu1 %1615 }
 0x7ef   : > { %v1619_v7 = vmul.f32 1.442695, %v1617_v3  ;;  %v1618_v8 = vsub.f32 %v1610_v59, %v1616_v6 }
 0x7f1   : > { %6204 = vpow2.f32 %v1619_v7  ;;  %v1621_v9 = vmul.f32 1.442695, %v1618_v8 }
 0x7f2   : > { %v1684_v10 = vpop.permute.xlu1 %1683 }
 0x7f3   : > { %6206 = vpow2.f32 %v1621_v9  ;;  %v1689_v11 = vsel %vm1197_vm2, %v1684_v10, 0 }
 0x7f4   : > { %5828 = vmatpush3.bf16.msra.mxu1 %v1689_v11 }
 0x7f5   : > { %5839 = vmatprep.subr.bf16.mxu1 %v6541_v5 }
 0x7f6   : > { %v1734_v18 = vpop.permute.xlu1 %1733 }
 0x7fa   : > { %v1784_v23 = vpop.permute.xlu1 %1783 }
 0x7fb   : > { %v6205_v43 = vpop.eup %6204  ;;  %v1789_v25 = vsel %vm1074_vm1, %v1784_v23, 0  ;;  %v6059_v23 = vld [vmem:[%s6943_s1 + $0x38] sm:$0xff]  }
 0x7fc   : > { %v1623_v47 = vsel %vm1169_vm3, %v6205_v43, 0.0 }
 0x7fd   : > { %v6207_v12 = vpop.eup %6206  ;;  %1624 = vadd.xlane.f32.xlu0 %v1623_v47 }
 0x7fe   : > { %v1626_v51 = vsel %vm1169_vm3, %v6207_v12, 0.0  ;;  %v1782_v28 = vpop.permute.xlu1 %1781 }
 0x801   : > { %1627 = vadd.xlane.f32.xlu0 %v1626_v51 }
 0x817   : > { %1635 = vrot.lane.b32.xlu0 %v7077_v58, %s6544_s8 }
 0x81b   : > { %1731 = vrot.lane.b32.xlu0 %v7058_v48, %s6545_s18  ;;  %v1739_v48 = vsel %vm1074_vm1, %v1734_v18, 0  ;;  %v6054_v18 = vld [vmem:[%s6943_s1 + $0x10] sm:$0xff]  }
 0x88a   : > { %v1625_v13 = vpop.xlane.xlu0 %1624 }
 0x88b   : > { %6208 = vrcp.f32 %v1625_v13 }
 0x88e   : > { %v1628_v14 = vpop.xlane.xlu0 %1627 }
 0x88f   : > { %6210 = vrcp.f32 %v1628_v14 }
 0x892   : > { %v1636_v15 = vpop.permute.xlu0 %1635 }
 0x893   : > { %v1641_v16 = vsel %vm1197_vm2, %v1636_v15, 0 }
 0x894   : > { %5822 = vmatpush3.bf16.msra.mxu0 %v1641_v16  ;;  %v6052_v16 = vld [vmem:[%s6943_s1] sm:$0xff]  }
 0x895   : > { %v6209_v17 = vpop.eup %6208  ;;  %5833 = vmatprep.subr.bf16.mxu0 %v6541_v5 }
 0x896   : > { %v1631_v19 = vmul.f32 %v6209_v17, %v6205_v43  ;;  %v1732_v27 = vpop.permute.xlu0 %1731  ;;  %v6053_v17 = vld [vmem:[%s6943_s1 + $0x8] sm:$0xff]  }
 0x898   : > { %v1633_v20 = vpack.c.bf16 %v1631_v19, %v1631_v19  ;;  %v6055_v19 = vld [vmem:[%s6943_s1 + $0x18] sm:$0xff]  }
 0x899   : > { %v6211_v21 = vpop.eup %6210 }
 0x89a   : > { %v1632_v22 = vmul.f32 %v6211_v21, %v6207_v12  ;;  %5824 = vmatmul.mubr.msk.bf16.vlgmr.msra.gmra.mrb[16].mxu0 %vm1169_vm3, %v1633_v20  ;;  %v6056_v20 = vld [vmem:[%s6943_s1 + $0x20] sm:$0xff]   ;;  %v6057_v21 = vld [vmem:[%s6943_s1 + $0x28] sm:$0xff]  }
 0x89b   : > { %5835 = vmatprep.mubr.msk.bf16.mxu0 %vm6542_vm0, %v6541_v5 }
 0x89c   : > { %v1634_v24 = vpack.c.bf16 %v1632_v22, %v1632_v22  ;;  %v6058_v22 = vld [vmem:[%s6943_s1 + $0x30] sm:$0xff]  }
 0x89d   : > { %5834 = vmatpush3.bf16.xpose.msra.mxu0 %v1739_v48 }
 0x89e   : > { %5830 = vmatmul.mubr.msk.bf16.vlgmr.msra.gmra.mrb[32].mxu1 %vm1169_vm3, %v1634_v24  ;;  %5845 = vmatprep.subr.bf16.mxu0 %v6541_v5 }
 0x89f   : > { %5840 = vmatpush3.bf16.xpose.msra.mxu1 %v1789_v25  ;;  %5841 = vmatprep.mubr.msk.bf16.mxu1 %vm6542_vm0, %v6541_v5 }
 0x8a0   : > { %5851 = vmatprep.subr.bf16.mxu1 %v6541_v5 }
 0x8a4   : > { %5836 = vmatmul.mubr.msk.bf16.vlgmr.msra.gmra.mrb[20].mxu0 %vm1074_vm1, %v1732_v27 }
 0x8a5   : > { %5847 = vmatprep.mubr.msk.bf16.mxu0 %vm6542_vm0, %v6541_v5 }
 0x8a6   : > { %5842 = vmatmul.mubr.msk.bf16.vlgmr.msra.gmra.mrb[36].mxu1 %vm1074_vm1, %v1782_v28 }
 0x8a7   : > { %5853 = vmatprep.mubr.msk.bf16.mxu1 %vm6542_vm0, %v6541_v5 }
 0x96d   : > { %v1677_v29 = vpop.f32.mrb[16].mxu0 }
 0x96e   : > { %v5825_v30 = vpop.f32.mrb[17].mxu0 }
 0x96f   : > { %v1680_v31 = vpop.f32.mrb[18].mxu0 }
 0x970   : > { %v5826_v34 = vpop.f32.mrb[19].mxu0 }
 0x971   : > { %v1725_v35 = vpop.f32.mrb[32].mxu1 }
 0x972   : > { %v6010_v38 = vpack.i.bf16 %v1725_v35, %v1677_v29  ;;  %v5831_v39 = vpop.f32.mrb[33].mxu1 }
 0x973   : > { %v1728_v40 = vpop.f32.mrb[34].mxu1 }
 0x974   : > { %v5832_v45 = vpop.f32.mrb[35].mxu1 }
 0x977   : > { %v1775_v46 = vpop.f32.mrb[20].mxu0 }
 0x978   : > { %v1831_v49 = vmul.f32 0.17677669, %v1775_v46  ;;  %v5837_v50 = vpop.f32.mrb[21].mxu0 }
 0x979   : > { %v1778_v53 = vpop.f32.mrb[22].mxu0  ;;  %v1825_v54 = vpop.f32.mrb[36].mxu1 }
 0x97a   : > { %v1832_v55 = vmul.f32 0.17677669, %v1825_v54  ;;  %v5838_v57 = vpop.f32.mrb[23].mxu0  ;;  %v5843_v59 = vpop.f32.mrb[37].mxu1  ;;  %v1833_v60 = vsel %vm1169_vm3, %v1831_v49, -inf }
 0x97b   : > { %1834 = vmax.xlane.f32.xlu0 %v1833_v60  ;;  %v1828_v61 = vpop.f32.mrb[38].mxu1 }
 0x97c   : > { %v5844_v62 = vpop.f32.mrb[39].mxu1  ;;  %v1836_v63 = vsel %vm1169_vm3, %v1832_v55, -inf }
 0x97d   : > { %1837 = vmax.xlane.f32.xlu1 %v1836_v63 }
 0x98e   : > { %1905 = vrot.lane.b32.xlu1 %v7096_v26, %s6545_s18 }
 0x992   : > { %6006 = vrot.lane.b32.xlu1 %v6005_v44, %s6545_s18 }
 0x996   : > { %6011 = vrot.lane.b32.xlu1 %v6010_v38, %s6544_s8 }
 0xa08   : > { %v1835_v0 = vpop.xlane.xlu0 %1834 }
 0xa09   : > { %v1839_v1 = vsub.f32 %v1831_v49, %v1835_v0 }
 0xa0a   : > { %v1838_v2 = vpop.xlane.xlu1 %1837 }
 0xa0b   : > { %v1841_v3 = vmul.f32 1.442695, %v1839_v1  ;;  %v1840_v6 = vsub.f32 %v1832_v55, %v1838_v2 }
 0xa0d   : > { %6212 = vpow2.f32 %v1841_v3  ;;  %v1843_v7 = vmul.f32 1.442695, %v1840_v6  ;;  %v6228_v3 = vld [vmem:[#allocation2] sm:$0xff] }
 0xa0e   : > { %v1906_v8 = vpop.permute.xlu1 %1905 }
 0xa0f   : > { %6214 = vpow2.f32 %v1843_v7  ;;  %v1911_v9 = vsel %vm1197_vm2, %v1906_v8, 0  ;;  %v6229_v7 = vld [vmem:[#allocation2 + $0x8] sm:$0xff] }
 0xa10   : > { %5852 = vmatpush3.bf16.msra.mxu1 %v1911_v9  ;;  %v2142_v9 = vld [vmem:[%s6945_s16] sm:$0xff] }
 0xa12   : > { %v6007_v35 = vpop.permute.xlu1 %6006 }
 0xa13   : > { %v6009_v39 = vunpack.i.h.bf16 %v6007_v35  ;;  %v6008_v40 = vunpack.i.l.bf16 %v6007_v35  ;;  %v2190_v35 = vld [vmem:[%s6945_s16 + $0x180] sm:$0xff] }
 0xa15   : > { %v1978_v49 = vsel %vm1074_vm1, %v7118_v56, %v6009_v39  ;;  %v1977_v50 = vsel %vm1074_vm1, %v7115_v41, %v6008_v40  ;;  %v5212_v56 = vld [vmem:[%s7747_s12] ss:$0 sm:$0xff]  ;;  %v2191_v39 = vld [vmem:[%s6945_s16 + $0x188] sm:$0xff] }
 0xa16   : > { %v6012_v38 = vpop.permute.xlu1 %6011 }
 0xa17   : > { %v6213_v26 = vpop.eup %6212  ;;  %v6014_v45 = vunpack.i.h.bf16 %v6012_v38 }
 0xa18   : > { %v1845_v10 = vsel %vm1169_vm3, %v6213_v26, 0.0 }
 0xa19   : > { %v6215_v11 = vpop.eup %6214  ;;  %1846 = vadd.xlane.f32.xlu0 %v1845_v10  ;;  %v1981_v57 = vsel %vm1979_vm4, %v1978_v49, %v6014_v45  ;;  %v2143_v10 = vld [vmem:[%s6945_s16 + $0x8] sm:$0xff] }
 0xa1a   : > { %v1848_v37 = vsel %vm1169_vm3, %v6215_v11, 0.0  ;;  %v2199_v45 = vld [vmem:[%s6945_s16 + $0x1c8] sm:$0xff] }
 0xa1b   : > { %v5274_v49 = vcombine.high %v2191_v39, %v2199_v45 }
 0xa1d   : > { %1849 = vadd.xlane.f32.xlu0 %v1848_v37 }
 0xa33   : > { %1857 = vrot.lane.b32.xlu0 %v7077_v58, %s6545_s18 }
 0xaa6   : > { %v1847_v42 = vpop.xlane.xlu0 %1846 }
 0xaa7   : > { %6216 = vrcp.f32 %v1847_v42  ;;  %v2151_v42 = vld [vmem:[%s6945_s16 + $0x48] sm:$0xff] }
 0xaaa   : > { %v1850_v44 = vpop.xlane.xlu0 %1849 }
 0xaab   : > { %6218 = vrcp.f32 %v1850_v44  ;;  %v2158_v44 = vld [vmem:[%s6945_s16 + $0x80] sm:$0xff] }
 0xaae   : > { %v1858_v43 = vpop.permute.xlu0 %1857 }
 0xaaf   : > { %v1863_v47 = vsel %vm1197_vm2, %v1858_v43, 0  ;;  %v2166_v43 = vld [vmem:[%s6945_s16 + $0xc0] sm:$0xff] }
 0xab0   : > { %5846 = vmatpush3.bf16.msra.mxu0 %v1863_v47  ;;  %v5225_v47 = vcombine.low %v2143_v10, %v2151_v42 }
 0xab1   : > { %v6217_v12 = vpop.eup %6216  ;;  %5857 = vmatprep.subr.bf16.mxu0 %v6541_v5 }
 0xab2   : > { %v1853_v51 = vmul.f32 %v6217_v12, %v6213_v26  ;;  %v2150_v26 = vld [vmem:[%s6945_s16 + $0x40] sm:$0xff]  ;;  %v5226_v12 = vcombine.high %v2143_v10, %v2151_v42 }
 0xab3   : > { %v5224_v37 = vcombine.high %v2142_v9, %v2150_v26  ;;  %v2254_v42 = vld [vmem:[%s6945_s16 + $0x380] sm:$0xff] }
 0xab4   : > { %v1855_v13 = vpack.c.bf16 %v1853_v51, %v1853_v51  ;;  %v5240_v51 = vcombine.high %v2158_v44, %v2166_v43 }
 0xab5   : > { %v6219_v14 = vpop.eup %6218  ;;  %2994 = vmatprep.subr.bf16.mxu1 %v5224_v37 }
 0xab6   : > { %v1854_v15 = vmul.f32 %v6219_v14, %v6215_v11  ;;  %5848 = vmatmul.mubr.msk.bf16.vlgmr.msra.gmra.mrb[24].mxu0 %vm1169_vm3, %v1855_v13  ;;  %v5223_v11 = vcombine.low %v2142_v9, %v2150_v26  ;;  %v2159_v13 = vld [vmem:[%s6945_s16 + $0x88] sm:$0xff] }
 0xab7   : > { %5873 = vmatprep.mubr.msk.bf16.mxu0 %vm6542_vm0, %v6541_v5  ;;  %5858 = vmatpush3.bf16.msra.mxu0 %v6052_v16  ;;  %v2167_v14 = vld [vmem:[%s6945_s16 + $0xc8] sm:$0xff] }
 0xab8   : > { %v1856_v58 = vpack.c.bf16 %v1854_v15, %v1854_v15  ;;  %5859 = vmatprep.subr.bf16.mxu0 %v6541_v5  ;;  %v5242_v15 = vcombine.high %v2159_v13, %v2167_v14  ;;  %v5241_v16 = vcombine.low %v2159_v13, %v2167_v14  ;;  %v2247_v26 = vld [vmem:[%s6945_s16 + $0x348] sm:$0xff] }
 0xaba   : > { %5854 = vmatmul.mubr.msk.bf16.vlgmr.msra.gmra.mrb[40].mxu1 %vm1169_vm3, %v1856_v58  ;;  %v5239_v58 = vcombine.low %v2158_v44, %v2166_v43  ;;  %v2262_v44 = vld [vmem:[%s6945_s16 + $0x3c0] sm:$0xff]  ;;  %v2255_v43 = vld [vmem:[%s6945_s16 + $0x388] sm:$0xff] }
 0xabb   : > { %3026 = vmatprep.mubr.bf16.mxu1 %v6540_v4  ;;  %5860 = vmatpush3.bf16.msra.mxu0 %v6053_v17 }
 0xabc   : > { %5861 = vmatprep.subr.bf16.mxu0 %v6541_v5  ;;  %2995 = vmatpush1.bf16.msra.mxu1 %v5223_v11 }
 0xabd   : > { %2996 = vmatprep.subr.bf16.mxu1 %v5240_v51  ;;  %v5335_v51 = vcombine.low %v2254_v42, %v2262_v44 }
 0xabf   : > { %5862 = vmatpush3.bf16.msra.mxu0 %v6054_v18 }
 0xac0   : > { %5863 = vmatprep.subr.bf16.mxu0 %v6541_v5  ;;  %2997 = vmatpush1.bf16.msra.mxu1 %v5239_v58  ;;  %v2152_v58 = vld [vmem:[%s6945_s16 + $0x50] sm:$0xff] }
 0xac3   : > { %5864 = vmatpush3.bf16.msra.mxu0 %v6055_v19 }
 0xac4   : > { %5865 = vmatprep.subr.bf16.mxu0 %v6541_v5 }
 0xac7   : > { %5866 = vmatpush3.bf16.msra.mxu0 %v6056_v20 }
 0xac8   : > { %5867 = vmatprep.subr.bf16.mxu0 %v6541_v5 }
 0xacb   : > { %5868 = vmatpush3.bf16.msra.mxu0 %v6057_v21 }
 0xacc   : > { %5869 = vmatprep.subr.bf16.mxu0 %v6541_v5 }
 0xacf   : > { %5870 = vmatpush3.bf16.msra.mxu0 %v6058_v22 }
 0xad0   : > { %5871 = vmatprep.subr.bf16.mxu0 %v6541_v5  ;;  %v6013_v5 = vunpack.i.l.bf16 %v6012_v38  ;;  %v2198_v38 = vld [vmem:[%s6945_s16 + $0x1c0] sm:$0xff] }
 0xad1   : > { %v5272_v40 = vcombine.high %v2190_v35, %v2198_v38 }
 0xad2   : > { %v1980_v55 = vsel %vm1979_vm4, %v1977_v50, %v6013_v5  ;;  %v5271_v5 = vcombine.low %v2190_v35, %v2198_v38  ;;  %v2206_v50 = vld [vmem:[%s6945_s16 + $0x200] sm:$0xff] }
 0xad3   : > { %5872 = vmatpush3.bf16.msra.mxu0 %v6059_v23 }
 0xad4   : > { %3037 = vmatprep.subr.bf16.mxu0 %v5226_v12  ;;  %v2263_v12 = vld [vmem:[%s6945_s16 + $0x3c8] sm:$0xff] }
 0xad5   : > { %v5337_v13 = vcombine.low %v2255_v43, %v2263_v12  ;;  %v5338_v14 = vcombine.high %v2255_v43, %v2263_v12  ;;  %v2224_v12 = vld [vmem:[%s6945_s16 + $0x290] sm:$0xff] }
 0xb89   : > { %v1899_v48 = vpop.f32.mrb[24].mxu0 }
 0xb8a   : > { %v5849_v24 = vpop.f32.mrb[25].mxu0 }
 0xb8b   : > { %v1902_v25 = vpop.f32.mrb[26].mxu0  ;;  %v2174_v24 = vld [vmem:[%s6945_s16 + $0x100] sm:$0xff] }
 0xb8c   : > { %v5850_v27 = vpop.f32.mrb[27].mxu0  ;;  %v2182_v25 = vld [vmem:[%s6945_s16 + $0x140] sm:$0xff] }
 0xb8d   : > { %v1947_v28 = vpop.f32.mrb[40].mxu1  ;;  %v2175_v27 = vld [vmem:[%s6945_s16 + $0x108] sm:$0xff] }
 0xb8e   : > { %v6015_v29 = vpack.i.bf16 %v1947_v28, %v1899_v48  ;;  %v5855_v30 = vpop.f32.mrb[41].mxu1  ;;  %v5256_v28 = vcombine.high %v2174_v24, %v2182_v25 }
 0xb8f   : > { %v1950_v31 = vpop.f32.mrb[42].mxu1  ;;  %v5255_v30 = vcombine.low %v2174_v24, %v2182_v25 }
 0xb90   : > { %6016 = vrot.lane.b32.xlu0 %v6015_v29, %s6543_s0  ;;  %v5856_v34 = vpop.f32.mrb[43].mxu1  ;;  %v2183_v29 = vld [vmem:[%s6945_s16 + $0x148] sm:$0xff]  ;;  %2998 = vmatprep.subr.bf16.mxu1 %v5256_v28 }
 0xb91   : > { %v5257_v31 = vcombine.low %v2175_v27, %v2183_v29  ;;  %v5258_v34 = vcombine.high %v2175_v27, %v2183_v29  ;;  %2999 = vmatpush1.bf16.msra.mxu1 %v5255_v30 }
 0xb92   : > { %3000 = vmatprep.subr.bf16.mxu1 %v5272_v40  ;;  %v5222_v40 = vld [vmem:[%s773_s11] ss:$0 sm:$0xff] }
 0xb95   : > { %3001 = vmatpush1.bf16.msra.mxu1 %v5271_v5  ;;  %v2168_v5 = vld [vmem:[%s6945_s16 + $0xd0] sm:$0xff] }
 0xc02   : > { %v6017_v46 = vpop.permute.xlu0 %6016 }
 0xc03   : > { %v6019_v53 = vunpack.i.h.bf16 %v6017_v46  ;;  %v6018_v54 = vunpack.i.l.bf16 %v6017_v46  ;;  %v5273_v46 = vcombine.low %v2191_v39, %v2199_v45 }
 0xc05   : > { %v1984_v59 = vsel %vm1982_vm5, %v1981_v57, %v6019_v53  ;;  %v1983_v60 = vsel %vm1982_vm5, %v1980_v55, %v6018_v54  ;;  %v2214_v53 = vld [vmem:[%s6945_s16 + $0x240] sm:$0xff]  ;;  %v2207_v54 = vld [vmem:[%s6945_s16 + $0x208] sm:$0xff] }
 0xc06   : > { %v1985_v61 = vpack.c.bf16 %v1984_v59, %v1983_v60  ;;  %v5288_v55 = vcombine.high %v2206_v50, %v2214_v53  ;;  %v2215_v57 = vld [vmem:[%s6945_s16 + $0x248] sm:$0xff]  ;;  %v5287_v59 = vcombine.low %v2206_v50, %v2214_v53 }
 0xc07   : > { %v5289_v60 = vcombine.low %v2207_v54, %v2215_v57 }
 0xc08   : > { %5874 = vmatmul.mubr.bf16.vlgmr.msra.gmra.mrb[28].mxu0 %v1985_v61  ;;  %v5290_v61 = vcombine.high %v2207_v54, %v2215_v57  ;;  %3002 = vmatprep.subr.bf16.mxu1 %v5288_v55  ;;  %v2176_v57 = vld [vmem:[%s6945_s16 + $0x110] sm:$0xff] }
 0xc09   : > { %3069 = vmatprep.mubr.bf16.mxu0 %v6540_v4  ;;  %3038 = vmatpush1.bf16.msra.mxu0 %v5225_v47  ;;  %v5336_v47 = vcombine.high %v2254_v42, %v2262_v44 }
 0xc0a   : > { %3039 = vmatprep.subr.bf16.mxu0 %v5242_v15  ;;  %3003 = vmatpush1.bf16.msra.mxu1 %v5287_v59  ;;  %v2144_v15 = vld [vmem:[%s6945_s16 + $0x10] sm:$0xff] }
 0xc0b   : > { %v2184_v59 = vld [vmem:[%s6945_s16 + $0x150] sm:$0xff] }
 0xc0d   : > { %3040 = vmatpush1.bf16.msra.mxu0 %v5241_v16  ;;  %v2145_v16 = vld [vmem:[%s6945_s16 + $0x18] sm:$0xff] }
 0xc0e   : > { %3041 = vmatprep.subr.bf16.mxu0 %v5258_v34  ;;  %v5221_v34 = vld [vmem:[%s770_s14] ss:$0 sm:$0xff] }
 0xc11   : > { %3042 = vmatpush1.bf16.msra.mxu0 %v5257_v31 }
 0xc12   : > { %3043 = vmatprep.subr.bf16.mxu0 %v5274_v49  ;;  %v2169_v49 = vld [vmem:[%s6945_s16 + $0xd8] sm:$0xff] }
 0xc15   : > { %3044 = vmatpush1.bf16.msra.mxu0 %v5273_v46  ;;  %v2161_v46 = vld [vmem:[%s6945_s16 + $0x98] sm:$0xff] }
 0xc16   : > { %3045 = vmatprep.subr.bf16.mxu0 %v5290_v61  ;;  %v2185_v61 = vld [vmem:[%s6945_s16 + $0x158] sm:$0xff] }
 0xc19   : > { %3046 = vmatpush1.bf16.msra.mxu0 %v5289_v60  ;;  %v2177_v60 = vld [vmem:[%s6945_s16 + $0x118] sm:$0xff] }
 0xcdb   : > { %v2091_v62 = vpop.f32.mrb[28].mxu0 }
 0xcdc   : > { %v2092_v41 = vadd.f32 %v5212_v56, %v2091_v62  ;;  %v5875_v63 = vpop.f32.mrb[29].mxu0  ;;  %v2230_v62 = vld [vmem:[%s6945_s16 + $0x2c0] sm:$0xff] }
 0xcdd   : > { %v2094_v0 = vpop.f32.mrb[30].mxu0 }
 0xcde   : > { %v2095_v1 = vadd.f32 %v5212_v56, %v2094_v0  ;;  %v5876_v2 = vpop.f32.mrb[31].mxu0  ;;  %v2098_v6 = vadd.f32 %v6228_v3, %v2092_v41  ;;  %v2222_v56 = vld [vmem:[%s6945_s16 + $0x280] sm:$0xff]  ;;  %v2223_v41 = vld [vmem:[%s6945_s16 + $0x288] sm:$0xff] }
 0xcdf   : > { %v5304_v63 = vcombine.high %v2222_v56, %v2230_v62  ;;  %v2231_v0 = vld [vmem:[%s6945_s16 + $0x2c8] sm:$0xff] }
 0xce0   : > { %2102 = vadd.xlane.f32.xlu1 %v2098_v6  ;;  %v2099_v8 = vadd.f32 %v6229_v7, %v2095_v1  ;;  %v5303_v1 = vcombine.low %v2222_v56, %v2230_v62  ;;  %v5305_v2 = vcombine.low %v2223_v41, %v2231_v0  ;;  %v5306_v3 = vcombine.high %v2223_v41, %v2231_v0  ;;  %v2246_v7 = vld [vmem:[%s6945_s16 + $0x340] sm:$0xff]  ;;  %v2192_v0 = vld [vmem:[%s6945_s16 + $0x190] sm:$0xff] }
 0xce1   : > { %3004 = vmatprep.subr.bf16.mxu1 %v5304_v63  ;;  %v5245_v62 = vcombine.low %v2161_v46, %v2169_v49  ;;  %v5260_v41 = vcombine.high %v2176_v57, %v2184_v59  ;;  %v5262_v63 = vcombine.high %v2177_v60, %v2185_v61 }
 0xce2   : > { %2104 = vadd.xlane.f32.xlu0 %v2099_v8  ;;  %3047 = vmatprep.subr.bf16.mxu0 %v5306_v3  ;;  %v2201_v3 = vld [vmem:[%s6945_s16 + $0x1d8] sm:$0xff] }
 0xce3   : > { %3005 = vmatpush1.bf16.msra.mxu1 %v5303_v1  ;;  %3048 = vmatpush1.bf16.msra.mxu0 %v5305_v2  ;;  %v2200_v1 = vld [vmem:[%s6945_s16 + $0x1d0] sm:$0xff]  ;;  %v2193_v2 = vld [vmem:[%s6945_s16 + $0x198] sm:$0xff] }
 0xce4   : > { %v5275_v42 = vcombine.low %v2192_v0, %v2200_v1  ;;  %v5277_v44 = vcombine.low %v2193_v2, %v2201_v3 }
 0xd6d   : > { %v2103_v17 = vpop.xlane.xlu1 %2102 }
 0xd6e   : > { %v2107_v18 = vmul.f32 0.0078125, %v2103_v17  ;;  %v5227_v17 = vcombine.low %v2144_v15, %v2152_v58 }
 0xd6f   : > { %v2105_v19 = vpop.xlane.xlu0 %2104 }
 0xd70   : > { %v7252_v20 = vsub.f32 %v2098_v6, %v2107_v18  ;;  %v2108_v21 = vmul.f32 0.0078125, %v2105_v19  ;;  %v2238_v6 = vld [vmem:[%s6945_s16 + $0x300] sm:$0xff]  ;;  %v5228_v18 = vcombine.high %v2144_v15, %v2152_v58  ;;  %v2153_v19 = vld [vmem:[%s6945_s16 + $0x58] sm:$0xff] }
 0xd71   : > { %v5320_v9 = vcombine.high %v2238_v6, %v2246_v7  ;;  %v5319_v10 = vcombine.low %v2238_v6, %v2246_v7  ;;  %v5259_v6 = vcombine.low %v2176_v57, %v2184_v59  ;;  %v5261_v7 = vcombine.low %v2177_v60, %v2185_v61  ;;  %v2162_v57 = vld [vmem:[%s6945_s16 + $0xa0] sm:$0xff]  ;;  %v2163_v60 = vld [vmem:[%s6945_s16 + $0xa8] sm:$0xff] }
 0xd72   : > { %v7254_v22 = vsub.f32 %v2099_v8, %v2108_v21  ;;  %v2111_v23 = vmul.f32 %v7252_v20, %v7252_v20  ;;  %v2239_v8 = vld [vmem:[%s6945_s16 + $0x308] sm:$0xff]  ;;  %v5229_v21 = vcombine.low %v2145_v16, %v2153_v19  ;;  %v2170_v59 = vld [vmem:[%s6945_s16 + $0xe0] sm:$0xff] }
 0xd73   : > { %v5321_v11 = vcombine.low %v2239_v8, %v2247_v26  ;;  %v5322_v37 = vcombine.high %v2239_v8, %v2247_v26  ;;  %3006 = vmatprep.subr.bf16.mxu1 %v5320_v9  ;;  %v5276_v8 = vcombine.high %v2192_v0, %v2200_v1  ;;  %v5278_v9 = vcombine.high %v2193_v2, %v2201_v3  ;;  %v2208_v26 = vld [vmem:[%s6945_s16 + $0x210] sm:$0xff]  ;;  %v2171_v61 = vld [vmem:[%s6945_s16 + $0xe8] sm:$0xff]  ;;  %v2178_v0 = vld [vmem:[%s6945_s16 + $0x120] sm:$0xff] }
 0xd74   : > { %2113 = vadd.xlane.f32.xlu0 %v2111_v23  ;;  %v2112_v48 = vmul.f32 %v7254_v22, %v7254_v22  ;;  %3007 = vmatpush1.bf16.msra.mxu1 %v5319_v10  ;;  %v5230_v23 = vcombine.high %v2145_v16, %v2153_v19  ;;  %v2216_v10 = vld [vmem:[%s6945_s16 + $0x250] sm:$0xff]  ;;  %v2186_v1 = vld [vmem:[%s6945_s16 + $0x160] sm:$0xff]  ;;  %v2179_v2 = vld [vmem:[%s6945_s16 + $0x128] sm:$0xff] }
 0xd75   : > { %3049 = vmatprep.subr.bf16.mxu0 %v5322_v37  ;;  %3008 = vmatprep.subr.bf16.mxu1 %v5336_v47  ;;  %v2217_v37 = vld [vmem:[%s6945_s16 + $0x258] sm:$0xff]  ;;  %v5292_v43 = vcombine.high %v2208_v26, %v2216_v10  ;;  %v5291_v15 = vcombine.low %v2208_v26, %v2216_v10  ;;  %v2248_v19 = vld [vmem:[%s6945_s16 + $0x350] sm:$0xff]  ;;  %v2187_v3 = vld [vmem:[%s6945_s16 + $0x168] sm:$0xff] }
 0xd76   : > { %3050 = vmatpush1.bf16.msra.mxu0 %v5321_v11  ;;  %v2209_v11 = vld [vmem:[%s6945_s16 + $0x218] sm:$0xff]  ;;  %v2194_v26 = vld [vmem:[%s6945_s16 + $0x1a0] sm:$0xff] }
 0xd77   : > { %3051 = vmatprep.subr.bf16.mxu0 %v5338_v14  ;;  %v5294_v47 = vcombine.high %v2209_v11, %v2217_v37  ;;  %v2233_v14 = vld [vmem:[%s6945_s16 + $0x2d8] sm:$0xff]  ;;  %v5293_v58 = vcombine.low %v2209_v11, %v2217_v37  ;;  %v2202_v10 = vld [vmem:[%s6945_s16 + $0x1e0] sm:$0xff]  ;;  %v2195_v11 = vld [vmem:[%s6945_s16 + $0x1a8] sm:$0xff] }
 0xd78   : > { %2115 = vadd.xlane.f32.xlu0 %v2112_v48  ;;  %3009 = vmatpush1.bf16.msra.mxu1 %v5335_v51  ;;  %v2232_v51 = vld [vmem:[%s6945_s16 + $0x2d0] sm:$0xff]  ;;  %v2203_v37 = vld [vmem:[%s6945_s16 + $0x1e8] sm:$0xff] }
 0xd79   : > { %3080 = vmatprep.subr.bf16.mxu1 %v5228_v18  ;;  %v5308_v16 = vcombine.high %v2224_v12, %v2232_v51  ;;  %v2240_v18 = vld [vmem:[%s6945_s16 + $0x310] sm:$0xff] }
 0xd7a   : > { %3052 = vmatpush1.bf16.msra.mxu0 %v5337_v13  ;;  %v2225_v13 = vld [vmem:[%s6945_s16 + $0x298] sm:$0xff] }
 0xd7b   : > { %3123 = vmatprep.subr.bf16.mxu0 %v5230_v23  ;;  %v2249_v23 = vld [vmem:[%s6945_s16 + $0x358] sm:$0xff] }
 0xe01   : > { %v2114_v48 = vpop.xlane.xlu0 %2113 }
 0xe02   : > { %v2117_v24 = vmul.f32 0.0078125, %v2114_v48  ;;  %v5307_v48 = vcombine.low %v2224_v12, %v2232_v51  ;;  %v2210_v12 = vld [vmem:[%s6945_s16 + $0x220] sm:$0xff] }
 0xe03   : > { %v2218_v51 = vld [vmem:[%s6945_s16 + $0x260] sm:$0xff] }
 0xe04   : > { %v2119_v25 = vadd.f32 1e-05, %v2117_v24  ;;  %v5309_v24 = vcombine.low %v2225_v13, %v2233_v14 }
 0xe05   : > { %v2116_v27 = vpop.xlane.xlu0 %2115 }
 0xe06   : > { %6220 = vrsqrt.f32 %v2119_v25  ;;  %v2118_v28 = vmul.f32 0.0078125, %v2116_v27  ;;  %v5324_v25 = vcombine.high %v2240_v18, %v2248_v19 }
 0xe08   : > { %v2120_v29 = vadd.f32 1e-05, %v2118_v28  ;;  %v2256_v28 = vld [vmem:[%s6945_s16 + $0x390] sm:$0xff] }
 0xe0a   : > { %6222 = vrsqrt.f32 %v2120_v29  ;;  %v2264_v29 = vld [vmem:[%s6945_s16 + $0x3d0] sm:$0xff] }
 0xe10   : > { %v6221_v30 = vpop.eup %6220 }
 0xe11   : > { %v2123_v31 = vmul.f32 %v6221_v30, %v7252_v20  ;;  %v2160_v20 = vld [vmem:[%s6945_s16 + $0x90] sm:$0xff]  ;;  %v2257_v30 = vld [vmem:[%s6945_s16 + $0x398] sm:$0xff] }
 0xe12   : > { %v5244_v55 = vcombine.high %v2160_v20, %v2168_v5  ;;  %v5243_v56 = vcombine.low %v2160_v20, %v2168_v5  ;;  %v2147_v20 = vld [vmem:[%s6945_s16 + $0x28] sm:$0xff] }
 0xe13   : > { %v2131_v38 = vmul.f32 %v5221_v34, %v2123_v31  ;;  %v2265_v31 = vld [vmem:[%s6945_s16 + $0x3d8] sm:$0xff]  ;;  %v2155_v5 = vld [vmem:[%s6945_s16 + $0x68] sm:$0xff] }
 0xe14   : > { %v6223_v35 = vpop.eup %6222 }
 0xe15   : > { %v2124_v39 = vmul.f32 %v6223_v35, %v7254_v22  ;;  %v7304_v50 = vadd.f32 %v5222_v40, %v2131_v38  ;;  %v5246_v22 = vcombine.high %v2161_v46, %v2169_v49  ;;  %v5340_v38 = vcombine.high %v2256_v28, %v2264_v29 }
 0xe16   : > { %v5339_v46 = vcombine.low %v2256_v28, %v2264_v29  ;;  %v5341_v49 = vcombine.low %v2257_v30, %v2265_v31  ;;  %v2242_v28 = vld [vmem:[%s6945_s16 + $0x320] sm:$0xff] }
 0xe17   : > { %v2132_v45 = vmul.f32 %v5221_v34, %v2124_v39  ;;  %v5323_v34 = vcombine.low %v2240_v18, %v2248_v19  ;;  %v5342_v39 = vcombine.high %v2257_v30, %v2265_v31  ;;  %v2226_v18 = vld [vmem:[%s6945_s16 + $0x2a0] sm:$0xff]  ;;  %v2243_v30 = vld [vmem:[%s6945_s16 + $0x328] sm:$0xff] }
 0xe18   : > { %v2234_v19 = vld [vmem:[%s6945_s16 + $0x2e0] sm:$0xff]  ;;  %v2251_v31 = vld [vmem:[%s6945_s16 + $0x368] sm:$0xff] }
 0xe19   : > { %v7306_v53 = vadd.f32 %v5222_v40, %v2132_v45  ;;  %v2146_v40 = vld [vmem:[%s6945_s16 + $0x20] sm:$0xff] }
 0xe1a   : > { %v2154_v45 = vld [vmem:[%s6945_s16 + $0x60] sm:$0xff] }
 0xe1b   : > { %v7310_v54 = vpack.c.bf16 %v7306_v53, %v7304_v50  ;;  %v2250_v29 = vld [vmem:[%s6945_s16 + $0x360] sm:$0xff] }
 0xe1d   : > { %3027 = vmatmul.mubr.bf16.vlgmr.msra.gmra.mrb[44].mxu1 %v7310_v54  ;;  %3070 = vmatmul.mubr.bf16.vlgmr.msra.gmra.mrb[32].mxu0 %v7310_v54 }
 0xe1e   : > { %3081 = vmatpush1.bf16.msra.mxu1 %v5227_v17  ;;  %3124 = vmatpush1.bf16.msra.mxu0 %v5229_v21  ;;  %v5310_v17 = vcombine.high %v2225_v13, %v2233_v14  ;;  %v2241_v21 = vld [vmem:[%s6945_s16 + $0x318] sm:$0xff]  ;;  %v2211_v13 = vld [vmem:[%s6945_s16 + $0x228] sm:$0xff] }
 0xe1f   : > { %3082 = vmatprep.subr.bf16.mxu1 %v5244_v55  ;;  %3125 = vmatprep.subr.bf16.mxu0 %v5246_v22  ;;  %v5326_v27 = vcombine.high %v2241_v21, %v2249_v23  ;;  %v5325_v35 = vcombine.low %v2241_v21, %v2249_v23  ;;  %v5232_v55 = vcombine.high %v2146_v40, %v2154_v45  ;;  %v2219_v14 = vld [vmem:[%s6945_s16 + $0x268] sm:$0xff] }
 0xe20   : > { %3112 = vmatprep.mubr.bf16.mxu1 %v6540_v4  ;;  %3155 = vmatprep.mubr.bf16.mxu0 %v6540_v4  ;;  %v5234_v22 = vcombine.high %v2147_v20, %v2155_v5  ;;  %v2227_v21 = vld [vmem:[%s6945_s16 + $0x2a8] sm:$0xff] }
 0xe21   : > { %v2235_v23 = vld [vmem:[%s6945_s16 + $0x2e8] sm:$0xff] }
 0xe22   : > { %3083 = vmatpush1.bf16.msra.mxu1 %v5243_v56  ;;  %3126 = vmatpush1.bf16.msra.mxu0 %v5245_v62  ;;  %v5231_v56 = vcombine.low %v2146_v40, %v2154_v45  ;;  %v5233_v62 = vcombine.low %v2147_v20, %v2155_v5  ;;  %v2258_v40 = vld [vmem:[%s6945_s16 + $0x3a0] sm:$0xff]  ;;  %v2259_v20 = vld [vmem:[%s6945_s16 + $0x3a8] sm:$0xff] }
 0xe23   : > { %3084 = vmatprep.subr.bf16.mxu1 %v5260_v41  ;;  %3127 = vmatprep.subr.bf16.mxu0 %v5262_v63  ;;  %v5248_v41 = vcombine.high %v2162_v57, %v2170_v59  ;;  %v5250_v63 = vcombine.high %v2163_v60, %v2171_v61  ;;  %v2266_v45 = vld [vmem:[%s6945_s16 + $0x3e0] sm:$0xff]  ;;  %v2267_v5 = vld [vmem:[%s6945_s16 + $0x3e8] sm:$0xff] }
 0xe26   : > { %3085 = vmatpush1.bf16.msra.mxu1 %v5259_v6  ;;  %3128 = vmatpush1.bf16.msra.mxu0 %v5261_v7  ;;  %v5247_v6 = vcombine.low %v2162_v57, %v2170_v59  ;;  %v5249_v7 = vcombine.low %v2163_v60, %v2171_v61  ;;  %v2148_v57 = vld [vmem:[%s6945_s16 + $0x30] sm:$0xff]  ;;  %v2149_v60 = vld [vmem:[%s6945_s16 + $0x38] sm:$0xff] }
 0xe27   : > { %3086 = vmatprep.subr.bf16.mxu1 %v5276_v8  ;;  %3129 = vmatprep.subr.bf16.mxu0 %v5278_v9  ;;  %v5264_v8 = vcombine.high %v2178_v0, %v2186_v1  ;;  %v5266_v9 = vcombine.high %v2179_v2, %v2187_v3  ;;  %v2156_v59 = vld [vmem:[%s6945_s16 + $0x70] sm:$0xff]  ;;  %v2157_v61 = vld [vmem:[%s6945_s16 + $0x78] sm:$0xff] }
 0xe2a   : > { %3087 = vmatpush1.bf16.msra.mxu1 %v5275_v42  ;;  %3130 = vmatpush1.bf16.msra.mxu0 %v5277_v44  ;;  %v5263_v42 = vcombine.low %v2178_v0, %v2186_v1  ;;  %v5265_v44 = vcombine.low %v2179_v2, %v2187_v3  ;;  %v2164_v0 = vld [vmem:[%s6945_s16 + $0xb0] sm:$0xff]  ;;  %v2165_v2 = vld [vmem:[%s6945_s16 + $0xb8] sm:$0xff] }
 0xe2b   : > { %3088 = vmatprep.subr.bf16.mxu1 %v5292_v43  ;;  %3131 = vmatprep.subr.bf16.mxu0 %v5294_v47  ;;  %v5280_v43 = vcombine.high %v2194_v26, %v2202_v10  ;;  %v5282_v47 = vcombine.high %v2195_v11, %v2203_v37  ;;  %v2172_v1 = vld [vmem:[%s6945_s16 + $0xf0] sm:$0xff]  ;;  %v2173_v3 = vld [vmem:[%s6945_s16 + $0xf8] sm:$0xff] }
 0xe2e   : > { %3089 = vmatpush1.bf16.msra.mxu1 %v5291_v15  ;;  %3132 = vmatpush1.bf16.msra.mxu0 %v5293_v58  ;;  %v5279_v15 = vcombine.low %v2194_v26, %v2202_v10  ;;  %v5281_v58 = vcombine.low %v2195_v11, %v2203_v37  ;;  %v2180_v26 = vld [vmem:[%s6945_s16 + $0x130] sm:$0xff]  ;;  %v2181_v11 = vld [vmem:[%s6945_s16 + $0x138] sm:$0xff] }
 0xe2f   : > { %3090 = vmatprep.subr.bf16.mxu1 %v5308_v16  ;;  %3133 = vmatprep.subr.bf16.mxu0 %v5310_v17  ;;  %v5296_v16 = vcombine.high %v2210_v12, %v2218_v51  ;;  %v5298_v17 = vcombine.high %v2211_v13, %v2219_v14  ;;  %v2188_v10 = vld [vmem:[%s6945_s16 + $0x170] sm:$0xff]  ;;  %v2189_v37 = vld [vmem:[%s6945_s16 + $0x178] sm:$0xff] }
 0xe32   : > { %3091 = vmatpush1.bf16.msra.mxu1 %v5307_v48  ;;  %3134 = vmatpush1.bf16.msra.mxu0 %v5309_v24  ;;  %v5295_v48 = vcombine.low %v2210_v12, %v2218_v51  ;;  %v5297_v24 = vcombine.low %v2211_v13, %v2219_v14  ;;  %v2196_v12 = vld [vmem:[%s6945_s16 + $0x1b0] sm:$0xff]  ;;  %v2197_v13 = vld [vmem:[%s6945_s16 + $0x1b8] sm:$0xff] }
 0xe33   : > { %3092 = vmatprep.subr.bf16.mxu1 %v5324_v25  ;;  %3135 = vmatprep.subr.bf16.mxu0 %v5326_v27  ;;  %v5312_v25 = vcombine.high %v2226_v18, %v2234_v19  ;;  %v5314_v27 = vcombine.high %v2227_v21, %v2235_v23  ;;  %v2204_v51 = vld [vmem:[%s6945_s16 + $0x1f0] sm:$0xff]  ;;  %v2205_v14 = vld [vmem:[%s6945_s16 + $0x1f8] sm:$0xff] }
 0xe36   : > { %3093 = vmatpush1.bf16.msra.mxu1 %v5323_v34  ;;  %3136 = vmatpush1.bf16.msra.mxu0 %v5325_v35  ;;  %v5311_v34 = vcombine.low %v2226_v18, %v2234_v19  ;;  %v5313_v35 = vcombine.low %v2227_v21, %v2235_v23  ;;  %v2212_v18 = vld [vmem:[%s6945_s16 + $0x230] sm:$0xff]  ;;  %v2213_v21 = vld [vmem:[%s6945_s16 + $0x238] sm:$0xff] }
 0xe37   : > { %3094 = vmatprep.subr.bf16.mxu1 %v5340_v38  ;;  %3137 = vmatprep.subr.bf16.mxu0 %v5342_v39  ;;  %v5328_v38 = vcombine.high %v2242_v28, %v2250_v29  ;;  %v5330_v39 = vcombine.high %v2243_v30, %v2251_v31  ;;  %v2220_v19 = vld [vmem:[%s6945_s16 + $0x270] sm:$0xff]  ;;  %v2221_v23 = vld [vmem:[%s6945_s16 + $0x278] sm:$0xff] }
 0xe3a   : > { %3095 = vmatpush1.bf16.msra.mxu1 %v5339_v46  ;;  %3138 = vmatpush1.bf16.msra.mxu0 %v5341_v49  ;;  %v5327_v46 = vcombine.low %v2242_v28, %v2250_v29  ;;  %v5329_v49 = vcombine.low %v2243_v30, %v2251_v31  ;;  %v2236_v28 = vld [vmem:[%s6945_s16 + $0x2f0] sm:$0xff]  ;;  %v2229_v29 = vld [vmem:[%s6945_s16 + $0x2b8] sm:$0xff]  ;;  %v5299_v31 = vcombine.low %v2212_v18, %v2220_v19 }
 0xe3b   : > { %3166 = vmatprep.subr.bf16.mxu1 %v5232_v55  ;;  %3209 = vmatprep.subr.bf16.mxu0 %v5234_v22  ;;  %v5344_v55 = vcombine.high %v2258_v40, %v2266_v45  ;;  %v5346_v22 = vcombine.high %v2259_v20, %v2267_v5  ;;  %v2237_v30 = vld [vmem:[%s6945_s16 + $0x2f8] sm:$0xff] }
 0xe3d   : > { %3113 = vmatmul.mubr.bf16.vlgmr.msra.gmra.mrb[48].mxu1 %v7310_v54  ;;  %3156 = vmatmul.mubr.bf16.vlgmr.msra.gmra.mrb[36].mxu0 %v7310_v54 }
 0xe3e   : > { %3167 = vmatpush1.bf16.msra.mxu1 %v5231_v56  ;;  %3210 = vmatpush1.bf16.msra.mxu0 %v5233_v62  ;;  %v5343_v56 = vcombine.low %v2258_v40, %v2266_v45  ;;  %v5345_v62 = vcombine.low %v2259_v20, %v2267_v5  ;;  %v2252_v40 = vld [vmem:[%s6945_s16 + $0x370] sm:$0xff]  ;;  %v2245_v45 = vld [vmem:[%s6945_s16 + $0x338] sm:$0xff] }
 0xe3f   : > { %3168 = vmatprep.subr.bf16.mxu1 %v5248_v41  ;;  %3211 = vmatprep.subr.bf16.mxu0 %v5250_v63  ;;  %v5236_v41 = vcombine.high %v2148_v57, %v2156_v59  ;;  %v5238_v63 = vcombine.high %v2149_v60, %v2157_v61  ;;  %v2253_v20 = vld [vmem:[%s6945_s16 + $0x378] sm:$0xff] }
 0xe40   : > { %3198 = vmatprep.mubr.bf16.mxu1 %v6540_v4  ;;  %3241 = vmatprep.mubr.bf16.mxu0 %v6540_v4 }
 0xe42   : > { %3169 = vmatpush1.bf16.msra.mxu1 %v5247_v6  ;;  %3212 = vmatpush1.bf16.msra.mxu0 %v5249_v7  ;;  %v5235_v6 = vcombine.low %v2148_v57, %v2156_v59  ;;  %v5237_v7 = vcombine.low %v2149_v60, %v2157_v61  ;;  %v2268_v57 = vld [vmem:[%s6945_s16 + $0x3f0] sm:$0xff]  ;;  %v2261_v59 = vld [vmem:[%s6945_s16 + $0x3b8] sm:$0xff] }
 0xe43   : > { %3170 = vmatprep.subr.bf16.mxu1 %v5264_v8  ;;  %3213 = vmatprep.subr.bf16.mxu0 %v5266_v9  ;;  %v5252_v8 = vcombine.high %v2164_v0, %v2172_v1  ;;  %v5254_v9 = vcombine.high %v2165_v2, %v2173_v3  ;;  %v2269_v60 = vld [vmem:[%s6945_s16 + $0x3f8] sm:$0xff] }
 0xe46   : > { %3171 = vmatpush1.bf16.msra.mxu1 %v5263_v42  ;;  %3214 = vmatpush1.bf16.msra.mxu0 %v5265_v44  ;;  %v5251_v42 = vcombine.low %v2164_v0, %v2172_v1  ;;  %v5253_v44 = vcombine.low %v2165_v2, %v2173_v3  ;;  %v5349_v0 = vcombine.low %v2261_v59, %v2269_v60  ;;  %v6060_v1 = vld [vmem:[%s6953_s17 + $0x40] sm:$0xff]  }
 0xe47   : > { %3172 = vmatprep.subr.bf16.mxu1 %v5280_v43  ;;  %3215 = vmatprep.subr.bf16.mxu0 %v5282_v47  ;;  %v5268_v43 = vcombine.high %v2180_v26, %v2188_v10  ;;  %v5270_v47 = vcombine.high %v2181_v11, %v2189_v37  ;;  %v6061_v2 = vld [vmem:[%s6953_s17 + $0xc0] sm:$0xff]  }
 0xe48   : > { %v6062_v3 = vld [vmem:[%s6953_s17] sm:$0xff]  }
 0xe4a   : > { %3173 = vmatpush1.bf16.msra.mxu1 %v5279_v15  ;;  %3216 = vmatpush1.bf16.msra.mxu0 %v5281_v58  ;;  %v5267_v15 = vcombine.low %v2180_v26, %v2188_v10  ;;  %v5269_v58 = vcombine.low %v2181_v11, %v2189_v37  ;;  %v6067_v26 = vld [vmem:[%s6953_s17 + $0x88] sm:$0xff]   ;;  %v6068_v10 = vld [vmem:[%s6953_s17 + $0x50] sm:$0xff]  }
 0xe4b   : > { %3174 = vmatprep.subr.bf16.mxu1 %v5296_v16  ;;  %3217 = vmatprep.subr.bf16.mxu0 %v5298_v17  ;;  %v5284_v16 = vcombine.high %v2196_v12, %v2204_v51  ;;  %v5286_v17 = vcombine.high %v2197_v13, %v2205_v14  ;;  %v6069_v11 = vld [vmem:[%s6953_s17 + $0xd0] sm:$0xff]  }
 0xe4c   : > { %v6070_v37 = vld [vmem:[%s6953_s17 + $0x10] sm:$0xff]  }
 0xe4e   : > { %3175 = vmatpush1.bf16.msra.mxu1 %v5295_v48  ;;  %3218 = vmatpush1.bf16.msra.mxu0 %v5297_v24  ;;  %v5283_v48 = vcombine.low %v2196_v12, %v2204_v51  ;;  %v5300_v24 = vcombine.high %v2212_v18, %v2220_v19  ;;  %v6076_v12 = vld [vmem:[%s6953_s17 + $0x60] sm:$0xff]   ;;  %v6084_v18 = vld [vmem:[%s6953_s17 + $0x70] sm:$0xff]  }
 0xe4f   : > { %3176 = vmatprep.subr.bf16.mxu1 %v5312_v25  ;;  %3219 = vmatprep.subr.bf16.mxu0 %v5314_v27  ;;  %v5302_v25 = vcombine.high %v2213_v21, %v2221_v23  ;;  %v2228_v27 = vld [vmem:[%s6945_s16 + $0x2b0] sm:$0xff]  ;;  %v6077_v51 = vld [vmem:[%s6953_s17 + $0xe0] sm:$0xff]  }
 0xe50   : > { %v5315_v5 = vcombine.low %v2228_v27, %v2236_v28  ;;  %v6085_v19 = vld [vmem:[%s6953_s17 + $0xf0] sm:$0xff]  }
 0xe52   : > { %3177 = vmatpush1.bf16.msra.mxu1 %v5311_v34  ;;  %3220 = vmatpush1.bf16.msra.mxu0 %v5313_v35  ;;  %v5301_v34 = vcombine.low %v2213_v21, %v2221_v23  ;;  %v5316_v35 = vcombine.high %v2228_v27, %v2236_v28  ;;  %v6086_v21 = vld [vmem:[%s6953_s17 + $0x30] sm:$0xff]   ;;  %v6092_v27 = vld [vmem:[%s6953_s17 + $0x140] sm:$0xff]  }
 0xe53   : > { %3178 = vmatprep.subr.bf16.mxu1 %v5328_v38  ;;  %3221 = vmatprep.subr.bf16.mxu0 %v5330_v39  ;;  %v5318_v38 = vcombine.high %v2229_v29, %v2237_v30  ;;  %v2244_v39 = vld [vmem:[%s6945_s16 + $0x330] sm:$0xff]  ;;  %v6093_v28 = vld [vmem:[%s6953_s17 + $0x1c0] sm:$0xff]  }
 0xe54   : > { %v5331_v61 = vcombine.low %v2244_v39, %v2252_v40  ;;  %v6087_v23 = vld [vmem:[%s6953_s17 + $0xb0] sm:$0xff]  }
 0xe56   : > { %3179 = vmatpush1.bf16.msra.mxu1 %v5327_v46  ;;  %3222 = vmatpush1.bf16.msra.mxu0 %v5329_v49  ;;  %v5317_v46 = vcombine.low %v2229_v29, %v2237_v30  ;;  %v5332_v49 = vcombine.high %v2244_v39, %v2252_v40  ;;  %v7449_v29 = vld [vmem:[%s6951_s25] sm:$0xff]  ;;  %v2288_v30 = vsub.s32 3, %v7040_v32 }
 0xe57   : > { %3180 = vmatprep.subr.bf16.mxu1 %v5344_v55  ;;  %3223 = vmatprep.subr.bf16.mxu0 %v5346_v22  ;;  %v5334_v55 = vcombine.high %v2245_v45, %v2253_v20  ;;  %v2260_v22 = vld [vmem:[%s6945_s16 + $0x3b0] sm:$0xff] }
 0xe5a   : > { %3181 = vmatpush1.bf16.msra.mxu1 %v5343_v56  ;;  %3224 = vmatpush1.bf16.msra.mxu0 %v5345_v62  ;;  %v5333_v56 = vcombine.low %v2245_v45, %v2253_v20  ;;  %v5348_v62 = vcombine.high %v2260_v22, %v2268_v57 }
 0xe5b   : > { %3252 = vmatprep.subr.bf16.mxu1 %v5236_v41  ;;  %3295 = vmatprep.subr.bf16.mxu0 %v5238_v63  ;;  %v5350_v41 = vcombine.high %v2261_v59, %v2269_v60  ;;  %v5347_v63 = vcombine.low %v2260_v22, %v2268_v57 }
 0xe5d   : > { %3199 = vmatmul.mubr.bf16.vlgmr.msra.gmra.mrb[52].mxu1 %v7310_v54  ;;  %3242 = vmatmul.mubr.bf16.vlgmr.msra.gmra.mrb[40].mxu0 %v7310_v54 }
 0xe5e   : > { %3253 = vmatpush1.bf16.msra.mxu1 %v5235_v6  ;;  %3296 = vmatpush1.bf16.msra.mxu0 %v5237_v7  ;;  %v6063_v6 = vld [vmem:[%s6953_s17 + $0x80] sm:$0xff]   ;;  %v6064_v7 = vld [vmem:[%s6953_s17 + $0x48] sm:$0xff]  }
 0xe5f   : > { %3254 = vmatprep.subr.bf16.mxu1 %v5252_v8  ;;  %3297 = vmatprep.subr.bf16.mxu0 %v5254_v9  ;;  %v6065_v8 = vld [vmem:[%s6953_s17 + $0xc8] sm:$0xff]  }
 0xe60   : > { %3284 = vmatprep.mubr.bf16.mxu1 %v6540_v4  ;;  %3327 = vmatprep.mubr.bf16.mxu0 %v6540_v4  ;;  %v5285_v4 = vcombine.low %v2197_v13, %v2205_v14  ;;  %v6066_v9 = vld [vmem:[%s6953_s17 + $0x8] sm:$0xff]   ;;  %v6078_v13 = vld [vmem:[%s6953_s17 + $0x20] sm:$0xff]  }
 0xe61   : > { %v6079_v14 = vld [vmem:[%s6953_s17 + $0xa0] sm:$0xff]  }
 0xe62   : > { %3255 = vmatpush1.bf16.msra.mxu1 %v5251_v42  ;;  %3298 = vmatpush1.bf16.msra.mxu0 %v5253_v44  ;;  %v6071_v42 = vld [vmem:[%s6953_s17 + $0x90] sm:$0xff]   ;;  %v6073_v44 = vld [vmem:[%s6953_s17 + $0xd8] sm:$0xff]  }
 0xe63   : > { %3256 = vmatprep.subr.bf16.mxu1 %v5268_v43  ;;  %3299 = vmatprep.subr.bf16.mxu0 %v5270_v47  ;;  %v6074_v43 = vld [vmem:[%s6953_s17 + $0x18] sm:$0xff]  }
 0xe64   : > { %v6075_v47 = vld [vmem:[%s6953_s17 + $0x98] sm:$0xff]  }
 0xe66   : > { %3257 = vmatpush1.bf16.msra.mxu1 %v5267_v15  ;;  %3300 = vmatpush1.bf16.msra.mxu0 %v5269_v58  ;;  %v6080_v15 = vld [vmem:[%s6953_s17 + $0x68] sm:$0xff]  }
 0xe67   : > { %3258 = vmatprep.subr.bf16.mxu1 %v5284_v16  ;;  %3301 = vmatprep.subr.bf16.mxu0 %v5286_v17  ;;  %v6081_v58 = vld [vmem:[%s6953_s17 + $0xe8] sm:$0xff]  }
 0xe68   : > { %v6082_v16 = vld [vmem:[%s6953_s17 + $0x28] sm:$0xff]  }
 0xe69   : > { %v6083_v17 = vld [vmem:[%s6953_s17 + $0xa8] sm:$0xff]  }
 0xe6a   : > { %3259 = vmatpush1.bf16.msra.mxu1 %v5283_v48  ;;  %3302 = vmatpush1.bf16.msra.mxu0 %v5285_v4  ;;  %v6088_v48 = vld [vmem:[%s6953_s17 + $0x78] sm:$0xff]  }
 0xe6b   : > { %3260 = vmatprep.subr.bf16.mxu1 %v5300_v24  ;;  %3303 = vmatprep.subr.bf16.mxu0 %v5302_v25  ;;  %v6089_v4 = vld [vmem:[%s6953_s17 + $0xf8] sm:$0xff]  }
 0xe6c   : > { %v6090_v24 = vld [vmem:[%s6953_s17 + $0x38] sm:$0xff]  }
 0xe6d   : > { %v6091_v25 = vld [vmem:[%s6953_s17 + $0xb8] sm:$0xff]  }
 0xe6e   : > { %3261 = vmatpush1.bf16.msra.mxu1 %v5299_v31  ;;  %3304 = vmatpush1.bf16.msra.mxu0 %v5301_v34  ;;  %v2277_v31 = vrot.slane %v7449_v29, %v7048_v36  ;;  %v2285_v34 = vrot.slane %v7449_v29, %v7074_v52 }
 0xe6f   : > { %3262 = vmatprep.subr.bf16.mxu1 %v5316_v35  ;;  %3305 = vmatprep.subr.bf16.mxu0 %v5318_v38  ;;  %v2281_v35 = vrot.slane %v7449_v29, %v7043_v33  ;;  %v2289_v38 = vrot.slane %v7449_v29, %v2288_v30 }
 0xe72   : > { %3263 = vmatpush1.bf16.msra.mxu1 %v5315_v5  ;;  %3306 = vmatpush1.bf16.msra.mxu0 %v5317_v46 }
 0xe73   : > { %3264 = vmatprep.subr.bf16.mxu1 %v5332_v49  ;;  %3307 = vmatprep.subr.bf16.mxu0 %v5334_v55 }
 0xe76   : > { %3265 = vmatpush1.bf16.msra.mxu1 %v5331_v61  ;;  %3308 = vmatpush1.bf16.msra.mxu0 %v5333_v56 }
 0xe77   : > { %3266 = vmatprep.subr.bf16.mxu1 %v5348_v62  ;;  %3309 = vmatprep.subr.bf16.mxu0 %v5350_v41 }
 0xe7a   : > { %3267 = vmatpush1.bf16.msra.mxu1 %v5347_v63  ;;  %3310 = vmatpush1.bf16.msra.mxu0 %v5349_v0 }
 0xe7b   : > { %5556 = vmatprep.subr.bf16.mxu1 %v6060_v1  ;;  %5578 = vmatprep.subr.bf16.mxu0 %v6061_v2 }
 0xe7d   : > { %3285 = vmatmul.mubr.bf16.vlgmr.msra.gmra.mrb[56].mxu1 %v7310_v54  ;;  %3328 = vmatmul.mubr.bf16.vlgmr.msra.gmra.mrb[44].mxu0 %v7310_v54  ;;  %v6072_v54 = vld [vmem:[%s6953_s17 + $0x58] sm:$0xff]  }
 0xe7e   : > { %5557 = vmatpush3.bf16.msra.mxu1 %v6062_v3  ;;  %5579 = vmatpush3.bf16.msra.mxu0 %v6063_v6 }
 0xe7f   : > { %5558 = vmatprep.subr.bf16.mxu1 %v6064_v7  ;;  %5580 = vmatprep.subr.bf16.mxu0 %v6065_v8 }
 0xe82   : > { %5559 = vmatpush3.bf16.msra.mxu1 %v6066_v9  ;;  %5581 = vmatpush3.bf16.msra.mxu0 %v6067_v26 }
 0xe83   : > { %5560 = vmatprep.subr.bf16.mxu1 %v6068_v10  ;;  %5582 = vmatprep.subr.bf16.mxu0 %v6069_v11 }
 0xe86   : > { %5561 = vmatpush3.bf16.msra.mxu1 %v6070_v37  ;;  %5583 = vmatpush3.bf16.msra.mxu0 %v6071_v42  ;;  %v6094_v37 = vld [vmem:[%s6953_s17 + $0x100] sm:$0xff]  }
 0xe87   : > { %5562 = vmatprep.subr.bf16.mxu1 %v6072_v54  ;;  %5584 = vmatprep.subr.bf16.mxu0 %v6073_v44  ;;  %v6095_v42 = vld [vmem:[%s6953_s17 + $0x180] sm:$0xff]   ;;  %v6096_v54 = vld [vmem:[%s6953_s17 + $0x148] sm:$0xff]  }
 0xe88   : > { %v6097_v44 = vld [vmem:[%s6953_s17 + $0x1c8] sm:$0xff]  }
 0xe8a   : > { %5563 = vmatpush3.bf16.msra.mxu1 %v6074_v43  ;;  %5585 = vmatpush3.bf16.msra.mxu0 %v6075_v47  ;;  %v6098_v43 = vld [vmem:[%s6953_s17 + $0x108] sm:$0xff]  }
 0xe8b   : > { %5564 = vmatprep.subr.bf16.mxu1 %v6076_v12  ;;  %5586 = vmatprep.subr.bf16.mxu0 %v6077_v51  ;;  %v6099_v47 = vld [vmem:[%s6953_s17 + $0x188] sm:$0xff]   ;;  %v6100_v12 = vld [vmem:[%s6953_s17 + $0x150] sm:$0xff]  }
 0xe8c   : > { %v6101_v51 = vld [vmem:[%s6953_s17 + $0x1d0] sm:$0xff]  }
 0xe8e   : > { %5565 = vmatpush3.bf16.msra.mxu1 %v6078_v13  ;;  %5587 = vmatpush3.bf16.msra.mxu0 %v6079_v14  ;;  %v6102_v13 = vld [vmem:[%s6953_s17 + $0x110] sm:$0xff]  }
 0xe8f   : > { %5566 = vmatprep.subr.bf16.mxu1 %v6080_v15  ;;  %5588 = vmatprep.subr.bf16.mxu0 %v6081_v58  ;;  %v6103_v14 = vld [vmem:[%s6953_s17 + $0x190] sm:$0xff]   ;;  %v6104_v15 = vld [vmem:[%s6953_s17 + $0x158] sm:$0xff]  }
 0xe90   : > { %v6105_v58 = vld [vmem:[%s6953_s17 + $0x1d8] sm:$0xff]  }
 0xe92   : > { %5567 = vmatpush3.bf16.msra.mxu1 %v6082_v16  ;;  %5589 = vmatpush3.bf16.msra.mxu0 %v6083_v17  ;;  %v6106_v16 = vld [vmem:[%s6953_s17 + $0x118] sm:$0xff]  }
 0xe93   : > { %5568 = vmatprep.subr.bf16.mxu1 %v6084_v18  ;;  %5590 = vmatprep.subr.bf16.mxu0 %v6085_v19  ;;  %v6107_v17 = vld [vmem:[%s6953_s17 + $0x198] sm:$0xff]   ;;  %v6108_v18 = vld [vmem:[%s6953_s17 + $0x160] sm:$0xff]  }
 0xe94   : > { %v6109_v19 = vld [vmem:[%s6953_s17 + $0x1e0] sm:$0xff]  }
 0xe96   : > { %5569 = vmatpush3.bf16.msra.mxu1 %v6086_v21  ;;  %5591 = vmatpush3.bf16.msra.mxu0 %v6087_v23  ;;  %v6110_v21 = vld [vmem:[%s6953_s17 + $0x120] sm:$0xff]  }
 0xe97   : > { %5570 = vmatprep.subr.bf16.mxu1 %v6088_v48  ;;  %5592 = vmatprep.subr.bf16.mxu0 %v6089_v4  ;;  %v6111_v23 = vld [vmem:[%s6953_s17 + $0x1a0] sm:$0xff]   ;;  %v6112_v48 = vld [vmem:[%s6953_s17 + $0x168] sm:$0xff]  }
 0xe98   : > { %v6113_v4 = vld [vmem:[%s6953_s17 + $0x1e8] sm:$0xff]  }
 0xe9a   : > { %5571 = vmatpush3.bf16.msra.mxu1 %v6090_v24  ;;  %5593 = vmatpush3.bf16.msra.mxu0 %v6091_v25  ;;  %v2292_v24 = vsub.s32 4, %v7040_v32  ;;  %v2300_v25 = vsub.s32 6, %v7040_v32 }
 0xe9b   : > { %5600 = vmatprep.subr.bf16.mxu1 %v6092_v27  ;;  %5622 = vmatprep.subr.bf16.mxu0 %v6093_v28  ;;  %v2296_v27 = vsub.s32 5, %v7040_v32  ;;  %v2304_v28 = vsub.s32 7, %v7040_v32 }
 0xef0   : > { %v3028_v39 = vpop.f32.mrb[44].mxu1  ;;  %v3071_v40 = vpop.f32.mrb[32].mxu0 }
 0xef1   : > { %v3029_v45 = vadd.f32 %v3028_v39, %v2277_v31  ;;  %v3072_v20 = vadd.f32 %v3071_v40, %v2285_v34  ;;  %v3030_v5 = vpop.f32.mrb[45].mxu1  ;;  %v3073_v46 = vpop.f32.mrb[33].mxu0  ;;  %v6116_v39 = vld [vmem:[%s6953_s17 + $0x170] sm:$0xff]  }
 0xef2   : > { %v3031_v49 = vadd.f32 %v3030_v5, %v2281_v35  ;;  %v3074_v55 = vadd.f32 %v3073_v46, %v2289_v38  ;;  %v3032_v22 = vpop.f32.mrb[46].mxu1  ;;  %v3075_v57 = vpop.f32.mrb[34].mxu0  ;;  %v6117_v40 = vld [vmem:[%s6953_s17 + $0x1f0] sm:$0xff]  }
 0xef3   : > { %v3033_v59 = vadd.f32 %v3032_v22, %v2277_v31  ;;  %v3076_v60 = vadd.f32 %v3075_v57, %v2285_v34  ;;  %v3034_v61 = vpop.f32.mrb[47].mxu1  ;;  %v3077_v56 = vpop.f32.mrb[35].mxu0  ;;  %v3338_v63 = vmax.f32 %v3029_v45, 0.0  ;;  %v3340_v0 = vmax.f32 %v3072_v20, 0.0  ;;  %v6114_v31 = vld [vmem:[%s6953_s17 + $0x128] sm:$0xff]  }
 0xef4   : > { %v3035_v62 = vadd.f32 %v3034_v61, %v2281_v35  ;;  %v3078_v41 = vadd.f32 %v3077_v56, %v2289_v38  ;;  %v3339_v3 = vmax.f32 %v3031_v49, 0.0  ;;  %v3341_v6 = vmax.f32 %v3074_v55, 0.0  ;;  %v6115_v34 = vld [vmem:[%s6953_s17 + $0x1a8] sm:$0xff]   ;;  %v6118_v49 = vld [vmem:[%s6953_s17 + $0x130] sm:$0xff]   ;;  %v6120_v61 = vld [vmem:[%s6953_s17 + $0x178] sm:$0xff]  }
 0xef5   : > { %v3354_v1 = vmax.f32 %v3033_v59, 0.0  ;;  %v3356_v2 = vmax.f32 %v3076_v60, 0.0  ;;  %v2293_v35 = vrot.slane %v7449_v29, %v2292_v24  ;;  %v2301_v38 = vrot.slane %v7449_v29, %v2300_v25  ;;  %v6119_v55 = vld [vmem:[%s6953_s17 + $0x1b0] sm:$0xff]   ;;  %v6121_v56 = vld [vmem:[%s6953_s17 + $0x1f8] sm:$0xff]  }
 0xef6   : > { %v3355_v7 = vmax.f32 %v3035_v62, 0.0  ;;  %v3357_v8 = vmax.f32 %v3078_v41, 0.0  ;;  %v2297_v45 = vrot.slane %v7449_v29, %v2296_v27  ;;  %v2305_v20 = vrot.slane %v7449_v29, %v2304_v28 }
 0xef7   : > { %v3370_v9 = vpack.c.bf16 %v3354_v1, %v3338_v63  ;;  %v3372_v26 = vpack.c.bf16 %v3356_v2, %v3340_v0 }
 0xef8   : > { %v3371_v10 = vpack.c.bf16 %v3355_v7, %v3339_v3  ;;  %v3373_v11 = vpack.c.bf16 %v3357_v8, %v3341_v6  ;;  %v6122_v8 = vld [vmem:[%s6953_s17 + $0x138] sm:$0xff]  }
 0xefa   : > { %4449 = vmatprep.mubr.bf16.mxu1 %v3371_v10  ;;  %4490 = vmatprep.mubr.bf16.mxu0 %v3373_v11 }
 0xefb   : > { %4450 = vmatmul.mubr.bf16.vlgmr.msra.gmra.mrb[60].mxu1 %v3370_v9  ;;  %4491 = vmatmul.mubr.bf16.vlgmr.msra.gmra.mrb[48].mxu0 %v3372_v26  ;;  %v6123_v9 = vld [vmem:[%s6953_s17 + $0x1b8] sm:$0xff]  }
 0xefc   : > { %5601 = vmatpush3.bf16.msra.mxu1 %v6094_v37  ;;  %5623 = vmatpush3.bf16.msra.mxu0 %v6095_v42  ;;  %v6124_v42 = vld [vmem:[%s6953_s17 + $0x240] sm:$0xff]  }
 0xefd   : > { %5602 = vmatprep.subr.bf16.mxu1 %v6096_v54  ;;  %5624 = vmatprep.subr.bf16.mxu0 %v6097_v44  ;;  %v6125_v54 = vld [vmem:[%s6953_s17 + $0x2c0] sm:$0xff]  }
 0xf00   : > { %5603 = vmatpush3.bf16.msra.mxu1 %v6098_v43  ;;  %5625 = vmatpush3.bf16.msra.mxu0 %v6099_v47 }
 0xf01   : > { %5604 = vmatprep.subr.bf16.mxu1 %v6100_v12  ;;  %5626 = vmatprep.subr.bf16.mxu0 %v6101_v51 }
 0xf04   : > { %5605 = vmatpush3.bf16.msra.mxu1 %v6102_v13  ;;  %5627 = vmatpush3.bf16.msra.mxu0 %v6103_v14 }
 0xf05   : > { %5606 = vmatprep.subr.bf16.mxu1 %v6104_v15  ;;  %5628 = vmatprep.subr.bf16.mxu0 %v6105_v58  ;;  %v6126_v58 = vld [vmem:[%s6953_s17 + $0x200] sm:$0xff]  }
 0xf08   : > { %5607 = vmatpush3.bf16.msra.mxu1 %v6106_v16  ;;  %5629 = vmatpush3.bf16.msra.mxu0 %v6107_v17  ;;  %v6127_v16 = vld [vmem:[%s6953_s17 + $0x280] sm:$0xff]   ;;  %v6128_v17 = vld [vmem:[%s6953_s17 + $0x248] sm:$0xff]  }
 0xf09   : > { %5608 = vmatprep.subr.bf16.mxu1 %v6108_v18  ;;  %5630 = vmatprep.subr.bf16.mxu0 %v6109_v19  ;;  %v6129_v18 = vld [vmem:[%s6953_s17 + $0x2c8] sm:$0xff]  }
 0xf0a   : > { %v6130_v19 = vld [vmem:[%s6953_s17 + $0x208] sm:$0xff]  }
 0xf0c   : > { %5609 = vmatpush3.bf16.msra.mxu1 %v6110_v21  ;;  %5631 = vmatpush3.bf16.msra.mxu0 %v6111_v23  ;;  %v6131_v21 = vld [vmem:[%s6953_s17 + $0x288] sm:$0xff]   ;;  %v6132_v23 = vld [vmem:[%s6953_s17 + $0x250] sm:$0xff]  }
 0xf0d   : > { %5610 = vmatprep.subr.bf16.mxu1 %v6112_v48  ;;  %5632 = vmatprep.subr.bf16.mxu0 %v6113_v4  ;;  %v6133_v48 = vld [vmem:[%s6953_s17 + $0x2d0] sm:$0xff]  }
 0xf0e   : > { %v6134_v4 = vld [vmem:[%s6953_s17 + $0x210] sm:$0xff]  }
 0xf10   : > { %v3114_v5 = vpop.f32.mrb[48].mxu1  ;;  %v3157_v46 = vpop.f32.mrb[36].mxu0  ;;  %5611 = vmatpush3.bf16.msra.mxu1 %v6114_v31  ;;  %5633 = vmatpush3.bf16.msra.mxu0 %v6115_v34  ;;  %v6135_v31 = vld [vmem:[%s6953_s17 + $0x290] sm:$0xff]   ;;  %v6136_v34 = vld [vmem:[%s6953_s17 + $0x258] sm:$0xff]  }
 0xf11   : > { %v3115_v22 = vadd.f32 %v3114_v5, %v2293_v35  ;;  %v3158_v57 = vadd.f32 %v3157_v46, %v2301_v38  ;;  %v3116_v59 = vpop.f32.mrb[49].mxu1  ;;  %v3159_v60 = vpop.f32.mrb[37].mxu0  ;;  %5612 = vmatprep.subr.bf16.mxu1 %v6116_v39  ;;  %5634 = vmatprep.subr.bf16.mxu0 %v6117_v40  ;;  %v6139_v39 = vld [vmem:[%s6953_s17 + $0x298] sm:$0xff]   ;;  %v6140_v40 = vld [vmem:[%s6953_s17 + $0x260] sm:$0xff]   ;;  %v6144_v46 = vld [vmem:[%s6953_s17 + $0x268] sm:$0xff]  }
 0xf12   : > { %v3117_v62 = vadd.f32 %v3116_v59, %v2297_v45  ;;  %v3160_v41 = vadd.f32 %v3159_v60, %v2305_v20  ;;  %v3118_v63 = vpop.f32.mrb[50].mxu1  ;;  %v3161_v29 = vpop.f32.mrb[38].mxu0  ;;  %v6143_v5 = vld [vmem:[%s6953_s17 + $0x2a0] sm:$0xff]  }
 0xf13   : > { %v3119_v0 = vadd.f32 %v3118_v63, %v2293_v35  ;;  %v3162_v1 = vadd.f32 %v3161_v29, %v2301_v38  ;;  %v3120_v2 = vpop.f32.mrb[51].mxu1  ;;  %v3163_v3 = vpop.f32.mrb[39].mxu0  ;;  %v3342_v26 = vmax.f32 %v3115_v22, 0.0  ;;  %v3344_v10 = vmax.f32 %v3158_v57, 0.0  ;;  %v6137_v35 = vld [vmem:[%s6953_s17 + $0x2d8] sm:$0xff]   ;;  %v6146_v22 = vld [vmem:[%s6953_s17 + $0x228] sm:$0xff]  }
 0xf14   : > { %v3121_v6 = vadd.f32 %v3120_v2, %v2297_v45  ;;  %v3164_v7 = vadd.f32 %v3163_v3, %v2305_v20  ;;  %5613 = vmatpush3.bf16.msra.mxu1 %v6118_v49  ;;  %5635 = vmatpush3.bf16.msra.mxu0 %v6119_v55  ;;  %v3343_v44 = vmax.f32 %v3117_v62, 0.0  ;;  %v3345_v43 = vmax.f32 %v3160_v41, 0.0  ;;  %v6138_v38 = vld [vmem:[%s6953_s17 + $0x218] sm:$0xff]   ;;  %v6141_v45 = vld [vmem:[%s6953_s17 + $0x2e0] sm:$0xff]   ;;  %v6145_v49 = vld [vmem:[%s6953_s17 + $0x2e8] sm:$0xff]  }
 0xf15   : > { %v3358_v11 = vmax.f32 %v3119_v0, 0.0  ;;  %v3360_v37 = vmax.f32 %v3162_v1, 0.0  ;;  %5614 = vmatprep.subr.bf16.mxu1 %v6120_v61  ;;  %5636 = vmatprep.subr.bf16.mxu0 %v6121_v56  ;;  %v6142_v20 = vld [vmem:[%s6953_s17 + $0x220] sm:$0xff]   ;;  %v7530_v55 = vld [vmem:[%s6951_s25 + $0x8] sm:$0xff]  ;;  %v6148_v61 = vld [vmem:[%s6953_s17 + $0x270] sm:$0xff]  }
 0xf16   : > { %v3359_v47 = vmax.f32 %v3121_v6, 0.0  ;;  %v3361_v12 = vmax.f32 %v3164_v7, 0.0  ;;  %v6147_v57 = vld [vmem:[%s6953_s17 + $0x2a8] sm:$0xff]   ;;  %v2309_v59 = vrot.slane %v7530_v55, %v7048_v36  ;;  %v2317_v60 = vrot.slane %v7530_v55, %v7074_v52  ;;  %v6149_v56 = vld [vmem:[%s6953_s17 + $0x2f0] sm:$0xff]   ;;  %v6152_v6 = vld [vmem:[%s6953_s17 + $0x278] sm:$0xff]  }
 0xf17   : > { %v3374_v51 = vpack.c.bf16 %v3358_v11, %v3342_v26  ;;  %v3376_v13 = vpack.c.bf16 %v3360_v37, %v3344_v10  ;;  %v2313_v62 = vrot.slane %v7530_v55, %v7043_v33  ;;  %v2321_v41 = vrot.slane %v7530_v55, %v2288_v30  ;;  %v6150_v0 = vld [vmem:[%s6953_s17 + $0x230] sm:$0xff]   ;;  %v6153_v33 = vld [vmem:[%s6953_s17 + $0x2f8] sm:$0xff]  }
 0xf18   : > { %v3375_v14 = vpack.c.bf16 %v3359_v47, %v3343_v44  ;;  %v3377_v15 = vpack.c.bf16 %v3361_v12, %v3345_v43  ;;  %5615 = vmatpush3.bf16.msra.mxu1 %v6122_v8  ;;  %5637 = vmatpush3.bf16.msra.mxu0 %v6123_v9  ;;  %v6151_v36 = vld [vmem:[%s6953_s17 + $0x2b0] sm:$0xff]   ;;  %v6154_v44 = vld [vmem:[%s6953_s17 + $0x238] sm:$0xff]  }
 0xf19   : > { %5644 = vmatprep.subr.bf16.mxu1 %v6124_v42  ;;  %5666 = vmatprep.subr.bf16.mxu0 %v6125_v54  ;;  %v6155_v43 = vld [vmem:[%s6953_s17 + $0x2b8] sm:$0xff]  }
 0xf1a   : > { %4531 = vmatprep.mubr.bf16.mxu1 %v3375_v14  ;;  %4572 = vmatprep.mubr.bf16.mxu0 %v3377_v15  ;;  %v6156_v14 = vld [vmem:[%s6953_s17 + $0x340] sm:$0xff]  }
 0xf1b   : > { %4532 = vmatmul.mubr.bf16.vlgmr.msra.gmra.mrb[64].mxu1 %v3374_v51  ;;  %4573 = vmatmul.mubr.bf16.vlgmr.msra.gmra.mrb[52].mxu0 %v3376_v13  ;;  %v6157_v15 = vld [vmem:[%s6953_s17 + $0x3c0] sm:$0xff]  }
 0xf1c   : > { %5645 = vmatpush3.bf16.msra.mxu1 %v6126_v58  ;;  %5667 = vmatpush3.bf16.msra.mxu0 %v6127_v16 }
 0xf1d   : > { %5646 = vmatprep.subr.bf16.mxu1 %v6128_v17  ;;  %5668 = vmatprep.subr.bf16.mxu0 %v6129_v18 }
 0xf20   : > { %5647 = vmatpush3.bf16.msra.mxu1 %v6130_v19  ;;  %5669 = vmatpush3.bf16.msra.mxu0 %v6131_v21 }
 0xf21   : > { %5648 = vmatprep.subr.bf16.mxu1 %v6132_v23  ;;  %5670 = vmatprep.subr.bf16.mxu0 %v6133_v48 }
 0xf24   : > { %5649 = vmatpush3.bf16.msra.mxu1 %v6134_v4  ;;  %5671 = vmatpush3.bf16.msra.mxu0 %v6135_v31  ;;  %v6158_v4 = vld [vmem:[%s6953_s17 + $0x300] sm:$0xff]  }
 0xf25   : > { %5650 = vmatprep.subr.bf16.mxu1 %v6136_v34  ;;  %5672 = vmatprep.subr.bf16.mxu0 %v6137_v35  ;;  %v6159_v31 = vld [vmem:[%s6953_s17 + $0x380] sm:$0xff]   ;;  %v6160_v34 = vld [vmem:[%s6953_s17 + $0x348] sm:$0xff]  }
 0xf26   : > { %v6161_v35 = vld [vmem:[%s6953_s17 + $0x3c8] sm:$0xff]  }
 0xf28   : > { %5651 = vmatpush3.bf16.msra.mxu1 %v6138_v38  ;;  %5673 = vmatpush3.bf16.msra.mxu0 %v6139_v39  ;;  %v6162_v38 = vld [vmem:[%s6953_s17 + $0x308] sm:$0xff]  }
 0xf29   : > { %5652 = vmatprep.subr.bf16.mxu1 %v6140_v40  ;;  %5674 = vmatprep.subr.bf16.mxu0 %v6141_v45  ;;  %v6163_v39 = vld [vmem:[%s6953_s17 + $0x388] sm:$0xff]   ;;  %v6164_v40 = vld [vmem:[%s6953_s17 + $0x350] sm:$0xff]  }
 0xf2a   : > { %v6165_v45 = vld [vmem:[%s6953_s17 + $0x3d0] sm:$0xff]  }
 0xf2c   : > { %5653 = vmatpush3.bf16.msra.mxu1 %v6142_v20  ;;  %5675 = vmatpush3.bf16.msra.mxu0 %v6143_v5  ;;  %v6166_v20 = vld [vmem:[%s6953_s17 + $0x310] sm:$0xff]  }
 0xf2d   : > { %5654 = vmatprep.subr.bf16.mxu1 %v6144_v46  ;;  %5676 = vmatprep.subr.bf16.mxu0 %v6145_v49  ;;  %v6167_v5 = vld [vmem:[%s6953_s17 + $0x390] sm:$0xff]   ;;  %v6168_v46 = vld [vmem:[%s6953_s17 + $0x358] sm:$0xff]  }
 0xf2e   : > { %v6169_v49 = vld [vmem:[%s6953_s17 + $0x3d8] sm:$0xff]  }
 0xf30   : > { %v3200_v63 = vpop.f32.mrb[52].mxu1  ;;  %v3243_v29 = vpop.f32.mrb[40].mxu0  ;;  %5655 = vmatpush3.bf16.msra.mxu1 %v6146_v22  ;;  %5677 = vmatpush3.bf16.msra.mxu0 %v6147_v57  ;;  %v6170_v22 = vld [vmem:[%s6953_s17 + $0x318] sm:$0xff]  }
 0xf31   : > { %v3201_v1 = vadd.f32 %v3200_v63, %v2309_v59  ;;  %v3244_v2 = vadd.f32 %v3243_v29, %v2317_v60  ;;  %v3202_v52 = vpop.f32.mrb[53].mxu1  ;;  %v3245_v3 = vpop.f32.mrb[41].mxu0  ;;  %5656 = vmatprep.subr.bf16.mxu1 %v6148_v61  ;;  %5678 = vmatprep.subr.bf16.mxu0 %v6149_v56  ;;  %v6171_v57 = vld [vmem:[%s6953_s17 + $0x398] sm:$0xff]   ;;  %v6174_v61 = vld [vmem:[%s6953_s17 + $0x320] sm:$0xff]   ;;  %v6178_v63 = vld [vmem:[%s6953_s17 + $0x328] sm:$0xff]  }
 0xf32   : > { %v3203_v7 = vadd.f32 %v3202_v52, %v2313_v62  ;;  %v3246_v8 = vadd.f32 %v3245_v3, %v2321_v41  ;;  %v3204_v9 = vpop.f32.mrb[54].mxu1  ;;  %v3247_v30 = vpop.f32.mrb[42].mxu0  ;;  %v6175_v56 = vld [vmem:[%s6953_s17 + $0x3a0] sm:$0xff]   ;;  %v6179_v29 = vld [vmem:[%s6953_s17 + $0x3a8] sm:$0xff]   ;;  %v2329_v52 = vrot.slane %v7530_v55, %v2296_v27  ;;  %v2337_v3 = vrot.slane %v7530_v55, %v2304_v28  ;;  %v6185_v27 = vld [vmem:[%s6953_s17 + $0x3f8] sm:$0xff]  }
 0xf33   : > { %v3205_v26 = vadd.f32 %v3204_v9, %v2309_v59  ;;  %v3248_v10 = vadd.f32 %v3247_v30, %v2317_v60  ;;  %v3206_v11 = vpop.f32.mrb[55].mxu1  ;;  %v3249_v37 = vpop.f32.mrb[43].mxu0  ;;  %v3346_v47 = vmax.f32 %v3201_v1, 0.0  ;;  %v3348_v12 = vmax.f32 %v3244_v2, 0.0  ;;  %v6172_v59 = vld [vmem:[%s6953_s17 + $0x360] sm:$0xff]   ;;  %v6180_v1 = vld [vmem:[%s6953_s17 + $0x370] sm:$0xff]  }
 0xf34   : > { %v3207_v42 = vadd.f32 %v3206_v11, %v2313_v62  ;;  %v3250_v54 = vadd.f32 %v3249_v37, %v2321_v41  ;;  %5657 = vmatpush3.bf16.msra.mxu1 %v6150_v0  ;;  %5679 = vmatpush3.bf16.msra.mxu0 %v6151_v36  ;;  %v3347_v58 = vmax.f32 %v3203_v7, 0.0  ;;  %v3349_v16 = vmax.f32 %v3246_v8, 0.0  ;;  %v6173_v60 = vld [vmem:[%s6953_s17 + $0x3e0] sm:$0xff]   ;;  %v6176_v62 = vld [vmem:[%s6953_s17 + $0x368] sm:$0xff]   ;;  %v6181_v2 = vld [vmem:[%s6953_s17 + $0x3f0] sm:$0xff]  }
 0xf35   : > { %v3362_v51 = vmax.f32 %v3205_v26, 0.0  ;;  %v3364_v13 = vmax.f32 %v3248_v10, 0.0  ;;  %5658 = vmatprep.subr.bf16.mxu1 %v6152_v6  ;;  %5680 = vmatprep.subr.bf16.mxu0 %v6153_v33  ;;  %v6177_v41 = vld [vmem:[%s6953_s17 + $0x3e8] sm:$0xff]   ;;  %v2325_v0 = vrot.slane %v7530_v55, %v2292_v24  ;;  %v2333_v36 = vrot.slane %v7530_v55, %v2300_v25  ;;  %v6182_v24 = vld [vmem:[%s6953_s17 + $0x330] sm:$0xff]   ;;  %v6184_v26 = vld [vmem:[%s6953_s17 + $0x378] sm:$0xff]  }
 0xf36   : > { %v3363_v17 = vmax.f32 %v3207_v42, 0.0  ;;  %v3365_v18 = vmax.f32 %v3250_v54, 0.0  ;;  %v6183_v7 = vld [vmem:[%s6953_s17 + $0x3b0] sm:$0xff]  }
 0xf37   : > { %v3378_v19 = vpack.c.bf16 %v3362_v51, %v3346_v47  ;;  %v3380_v21 = vpack.c.bf16 %v3364_v13, %v3348_v12  ;;  %v6186_v47 = vld [vmem:[%s6953_s17 + $0x338] sm:$0xff]  }
 0xf38   : > { %v3379_v23 = vpack.c.bf16 %v3363_v17, %v3347_v58  ;;  %v3381_v48 = vpack.c.bf16 %v3365_v18, %v3349_v16  ;;  %5659 = vmatpush3.bf16.msra.mxu1 %v6154_v44  ;;  %5681 = vmatpush3.bf16.msra.mxu0 %v6155_v43  ;;  %v6187_v12 = vld [vmem:[%s6953_s17 + $0x3b8] sm:$0xff]  }
 0xf39   : > { %5688 = vmatprep.subr.bf16.mxu1 %v6156_v14  ;;  %5710 = vmatprep.subr.bf16.mxu0 %v6157_v15 }
 0xf3a   : > { %4613 = vmatprep.mubr.bf16.mxu1 %v3379_v23  ;;  %4654 = vmatprep.mubr.bf16.mxu0 %v3381_v48 }
 0xf3b   : > { %4614 = vmatmul.mubr.bf16.vlgmr.msra.gmra.mrb[68].mxu1 %v3378_v19  ;;  %4655 = vmatmul.mubr.bf16.vlgmr.msra.gmra.mrb[56].mxu0 %v3380_v21 }
 0xf3c   : > { %5689 = vmatpush3.bf16.msra.mxu1 %v6158_v4  ;;  %5711 = vmatpush3.bf16.msra.mxu0 %v6159_v31 }
 0xf3d   : > { %5690 = vmatprep.subr.bf16.mxu1 %v6160_v34  ;;  %5712 = vmatprep.subr.bf16.mxu0 %v6161_v35  ;;  %v5351_v34 = vld [vmem:[%s776_s3] ss:$0 sm:$0xff] }
 0xf40   : > { %5691 = vmatpush3.bf16.msra.mxu1 %v6162_v38  ;;  %5713 = vmatpush3.bf16.msra.mxu0 %v6163_v39 }
 0xf41   : > { %5692 = vmatprep.subr.bf16.mxu1 %v6164_v40  ;;  %5714 = vmatprep.subr.bf16.mxu0 %v6165_v45 }
 0xf44   : > { %5693 = vmatpush3.bf16.msra.mxu1 %v6166_v20  ;;  %5715 = vmatpush3.bf16.msra.mxu0 %v6167_v5 }
 0xf45   : > { %5694 = vmatprep.subr.bf16.mxu1 %v6168_v46  ;;  %5716 = vmatprep.subr.bf16.mxu0 %v6169_v49 }
 0xf48   : > { %5695 = vmatpush3.bf16.msra.mxu1 %v6170_v22  ;;  %5717 = vmatpush3.bf16.msra.mxu0 %v6171_v57 }
 0xf49   : > { %5696 = vmatprep.subr.bf16.mxu1 %v6172_v59  ;;  %5718 = vmatprep.subr.bf16.mxu0 %v6173_v60 }
 0xf4c   : > { %5697 = vmatpush3.bf16.msra.mxu1 %v6174_v61  ;;  %5719 = vmatpush3.bf16.msra.mxu0 %v6175_v56 }
 0xf4d   : > { %5698 = vmatprep.subr.bf16.mxu1 %v6176_v62  ;;  %5720 = vmatprep.subr.bf16.mxu0 %v6177_v41 }
 0xf50   : > { %v3286_v6 = vpop.f32.mrb[56].mxu1  ;;  %v3329_v33 = vpop.f32.mrb[44].mxu0  ;;  %5699 = vmatpush3.bf16.msra.mxu1 %v6178_v63  ;;  %5721 = vmatpush3.bf16.msra.mxu0 %v6179_v29 }
 0xf51   : > { %v3287_v8 = vadd.f32 %v3286_v6, %v2325_v0  ;;  %v3330_v25 = vadd.f32 %v3329_v33, %v2333_v36  ;;  %v3288_v9 = vpop.f32.mrb[57].mxu1  ;;  %v3331_v30 = vpop.f32.mrb[45].mxu0  ;;  %5700 = vmatprep.subr.bf16.mxu1 %v6180_v1  ;;  %5722 = vmatprep.subr.bf16.mxu0 %v6181_v2 }
 0xf52   : > { %v3289_v10 = vadd.f32 %v3288_v9, %v2329_v52  ;;  %v3332_v32 = vadd.f32 %v3331_v30, %v2337_v3  ;;  %v3290_v11 = vpop.f32.mrb[58].mxu1  ;;  %v3333_v28 = vpop.f32.mrb[46].mxu0 }
 0xf53   : > { %v3291_v55 = vadd.f32 %v3290_v11, %v2325_v0  ;;  %v3334_v37 = vadd.f32 %v3333_v28, %v2333_v36  ;;  %v3292_v42 = vpop.f32.mrb[59].mxu1  ;;  %v3335_v54 = vpop.f32.mrb[47].mxu0  ;;  %v3350_v51 = vmax.f32 %v3287_v8, 0.0  ;;  %v3352_v13 = vmax.f32 %v3330_v25, 0.0 }
 0xf54   : > { %v3293_v44 = vadd.f32 %v3292_v42, %v2329_v52  ;;  %v3336_v43 = vadd.f32 %v3335_v54, %v2337_v3  ;;  %5701 = vmatpush3.bf16.msra.mxu1 %v6182_v24  ;;  %5723 = vmatpush3.bf16.msra.mxu0 %v6183_v7  ;;  %v3351_v58 = vmax.f32 %v3289_v10, 0.0  ;;  %v3353_v16 = vmax.f32 %v3332_v32, 0.0 }
 0xf55   : > { %v3366_v14 = vmax.f32 %v3291_v55, 0.0  ;;  %v3368_v15 = vmax.f32 %v3334_v37, 0.0  ;;  %5702 = vmatprep.subr.bf16.mxu1 %v6184_v26  ;;  %5724 = vmatprep.subr.bf16.mxu0 %v6185_v27 }
 0xf56   : > { %v3367_v17 = vmax.f32 %v3293_v44, 0.0  ;;  %v3369_v18 = vmax.f32 %v3336_v43, 0.0 }
 0xf57   : > { %v3382_v19 = vpack.c.bf16 %v3366_v14, %v3350_v51  ;;  %v3384_v21 = vpack.c.bf16 %v3368_v15, %v3352_v13 }
 0xf58   : > { %v3383_v23 = vpack.c.bf16 %v3367_v17, %v3351_v58  ;;  %v3385_v48 = vpack.c.bf16 %v3369_v18, %v3353_v16  ;;  %5703 = vmatpush3.bf16.msra.mxu1 %v6186_v47  ;;  %5725 = vmatpush3.bf16.msra.mxu0 %v6187_v12 }
 0xf5a   : > { %4695 = vmatprep.mubr.bf16.mxu1 %v3383_v23  ;;  %4736 = vmatprep.mubr.bf16.mxu0 %v3385_v48 }
 0xf5b   : > { %4696 = vmatmul.mubr.bf16.vlgmr.msra.gmra.mrb[72].mxu1 %v3382_v19  ;;  %4737 = vmatmul.mubr.bf16.vlgmr.msra.gmra.mrb[60].mxu0 %v3384_v21 }
 0xfce   : > { %v5572_v4 = vpop.f32.mrb[60].mxu1  ;;  %v5594_v31 = vpop.f32.mrb[48].mxu0 }
 0xfcf   : > { %v5573_v35 = vpop.f32.mrb[61].mxu1  ;;  %v5595_v38 = vpop.f32.mrb[49].mxu0 }
 0xfd0   : > { %v5574_v39 = vadd.f32 %v5573_v35, %v5572_v4  ;;  %v5596_v40 = vadd.f32 %v5595_v38, %v5594_v31  ;;  %v5575_v45 = vpop.f32.mrb[62].mxu1  ;;  %v5597_v20 = vpop.f32.mrb[50].mxu0 }
 0xfd1   : > { %v5576_v5 = vpop.f32.mrb[63].mxu1  ;;  %v5598_v46 = vpop.f32.mrb[51].mxu0 }
 0xfd2   : > { %v4452_v49 = vadd.f32 %v5574_v39, %v5351_v34  ;;  %v5577_v22 = vadd.f32 %v5576_v5, %v5575_v45  ;;  %v5599_v57 = vadd.f32 %v5598_v46, %v5597_v20 }
 0xfd4   : > { %v4493_v59 = vadd.f32 %v5596_v40, %v4452_v49  ;;  %v4455_v60 = vadd.f32 %v5577_v22, %v5351_v34 }
 0xfd6   : > { %v4496_v61 = vadd.f32 %v5599_v57, %v4455_v60 }
 0xfee   : > { %v5616_v56 = vpop.f32.mrb[64].mxu1  ;;  %v5638_v62 = vpop.f32.mrb[52].mxu0 }
 0xfef   : > { %v5617_v41 = vpop.f32.mrb[65].mxu1  ;;  %v5639_v63 = vpop.f32.mrb[53].mxu0 }
 0xff0   : > { %v5618_v29 = vadd.f32 %v5617_v41, %v5616_v56  ;;  %v5640_v0 = vadd.f32 %v5639_v63, %v5638_v62  ;;  %v5619_v36 = vpop.f32.mrb[66].mxu1  ;;  %v5641_v1 = vpop.f32.mrb[54].mxu0  ;;  %v5480_v62 = vld [vmem:[%s779_s13] ss:$0 sm:$0xff]  ;;  %s7753_s13 = sld [smem:[#allocation39_spill]] (!%p5482_p13) }
 0xff1   : > { %v5620_v2 = vpop.f32.mrb[67].mxu1  ;;  %v5642_v52 = vpop.f32.mrb[55].mxu0 }
 0xff2   : > { %v4534_v3 = vadd.f32 %v5618_v29, %v4493_v59  ;;  %v5621_v6 = vadd.f32 %v5620_v2, %v5619_v36  ;;  %v5643_v33 = vadd.f32 %v5642_v52, %v5641_v1  ;;  %v5481_v29 = vld [vmem:[%s782_s28] ss:$0 sm:$0xff] }
 0xff4   : > { %v4575_v24 = vadd.f32 %v5640_v0, %v4534_v3  ;;  %v4537_v7 = vadd.f32 %v5621_v6, %v4496_v61  ;;  %v6230_v3 = vld [vmem:[#allocation14] sm:$0xff] (!%p5482_p13)   ;;  %v6546_v6 = vmov (!%p5482_p13), 0.0  }
 0xff5   : > { %5877 = vmatprep.subr.bf16.mxu0 (!%p5482_p13), %v6546_v6  ;;  %5893 = vmatprep.mubr.msk.bf16.mxu0 (!%p5482_p13), %vm6547_vm6, %v6546_v6 }
 0xff6   : > { %v4578_v8 = vadd.f32 %v5643_v33, %v4537_v7  ;;  %5878 = vmatpush3.bf16.msra.mxu0 (!%p5482_p13), %v6230_v3  ;;  %v6231_v33 = vld [vmem:[#allocation14 + $0x8] sm:$0xff] (!%p5482_p13)   ;;  %v6233_v7 = vld [vmem:[#allocation14 + $0x18] sm:$0xff] (!%p5482_p13)  }
 0xff7   : > { %5879 = vmatprep.subr.bf16.mxu0 (!%p5482_p13), %v6546_v6 }
 0xffa   : > { %5880 = vmatpush3.bf16.msra.mxu0 (!%p5482_p13), %v6231_v33 }
 0xffb   : > { %5881 = vmatprep.subr.bf16.mxu0 (!%p5482_p13), %v6546_v6 }
0x100e   : > { %v5660_v25 = vpop.f32.mrb[68].mxu1  ;;  %v5682_v9 = vpop.f32.mrb[56].mxu0 }
0x100f   : > { %v5661_v30 = vpop.f32.mrb[69].mxu1  ;;  %v5683_v26 = vpop.f32.mrb[57].mxu0 }
0x1010   : > { %v5662_v27 = vadd.f32 %v5661_v30, %v5660_v25  ;;  %v5684_v10 = vadd.f32 %v5683_v26, %v5682_v9  ;;  %v5663_v32 = vpop.f32.mrb[70].mxu1  ;;  %v5685_v11 = vpop.f32.mrb[58].mxu0  ;;  %v6235_v25 = vld [vmem:[#allocation14 + $0x28] sm:$0xff] (!%p5482_p13)   ;;  %v6236_v9 = vld [vmem:[#allocation14 + $0x30] sm:$0xff] (!%p5482_p13)   ;;  %v6237_v30 = vld [vmem:[#allocation14 + $0x38] sm:$0xff] (!%p5482_p13)  }
0x1011   : > { %v5664_v28 = vpop.f32.mrb[71].mxu1  ;;  %v5686_v55 = vpop.f32.mrb[59].mxu0 }
0x1012   : > { %v4616_v37 = vadd.f32 %v5662_v27, %v4575_v24  ;;  %v5665_v42 = vadd.f32 %v5664_v28, %v5663_v32  ;;  %v5687_v54 = vadd.f32 %v5686_v55, %v5685_v11  ;;  %v6232_v24 = vld [vmem:[#allocation14 + $0x10] sm:$0xff] (!%p5482_p13)   ;;  %v5483_v27 = vld [vmem:[%s7753_s13] ss:$0 sm:$0xff] (!%p5482_p13) }
0x1013   : > { %5882 = vmatpush3.bf16.msra.mxu0 (!%p5482_p13), %v6232_v24 }
0x1014   : > { %v4657_v44 = vadd.f32 %v5684_v10, %v4616_v37  ;;  %v4619_v43 = vadd.f32 %v5665_v42, %v4578_v8  ;;  %5883 = vmatprep.subr.bf16.mxu0 (!%p5482_p13), %v6546_v6  ;;  %v6234_v8 = vld [vmem:[#allocation14 + $0x20] sm:$0xff] (!%p5482_p13)  }
0x1016   : > { %v4660_v47 = vadd.f32 %v5687_v54, %v4619_v43 }
0x1017   : > { %5884 = vmatpush3.bf16.msra.mxu0 (!%p5482_p13), %v6233_v7 }
0x1018   : > { %5885 = vmatprep.subr.bf16.mxu0 (!%p5482_p13), %v6546_v6 }
0x101b   : > { %5886 = vmatpush3.bf16.msra.mxu0 (!%p5482_p13), %v6234_v8 }
0x101c   : > { %5887 = vmatprep.subr.bf16.mxu0 (!%p5482_p13), %v6546_v6 }
0x101f   : > { %5888 = vmatpush3.bf16.msra.mxu0 (!%p5482_p13), %v6235_v25 }
0x1020   : > { %5889 = vmatprep.subr.bf16.mxu0 (!%p5482_p13), %v6546_v6 }
0x1023   : > { %5890 = vmatpush3.bf16.msra.mxu0 (!%p5482_p13), %v6236_v9 }
0x1024   : > { %5891 = vmatprep.subr.bf16.mxu0 (!%p5482_p13), %v6546_v6 }
0x1027   : > { %5892 = vmatpush3.bf16.msra.mxu0 (!%p5482_p13), %v6237_v30 }
0x102e   : > { %v5704_v12 = vpop.f32.mrb[72].mxu1  ;;  %v5726_v51 = vpop.f32.mrb[60].mxu0 }
0x102f   : > { %v5705_v13 = vpop.f32.mrb[73].mxu1  ;;  %v5727_v14 = vpop.f32.mrb[61].mxu0 }
0x1030   : > { %v5706_v15 = vadd.f32 %v5705_v13, %v5704_v12  ;;  %v5728_v58 = vadd.f32 %v5727_v14, %v5726_v51  ;;  %v5707_v16 = vpop.f32.mrb[74].mxu1  ;;  %v5729_v17 = vpop.f32.mrb[62].mxu0 }
0x1031   : > { %v5708_v18 = vpop.f32.mrb[75].mxu1  ;;  %v5730_v19 = vpop.f32.mrb[63].mxu0 }
0x1032   : > { %v4698_v21 = vadd.f32 %v5706_v15, %v4657_v44  ;;  %v5709_v23 = vadd.f32 %v5708_v18, %v5707_v16  ;;  %v5731_v48 = vadd.f32 %v5730_v19, %v5729_v17 }
0x1034   : > { %v4739_v4 = vadd.f32 %v5728_v58, %v4698_v21  ;;  %v4701_v31 = vadd.f32 %v5709_v23, %v4660_v47 }
0x1036   : > { %v4742_v34 = vadd.f32 %v5731_v48, %v4701_v31  ;;  %v4745_v35 = vadd.f32 %v4739_v4, %v7304_v50 }
0x1038   : > { %4749 = vadd.xlane.f32.xlu1 %v4745_v35  ;;  %v4746_v38 = vadd.f32 %v4742_v34, %v7306_v53 }
0x103a   : > { %4751 = vadd.xlane.f32.xlu0 %v4746_v38 }
0x10c5   : > { %v4750_v39 = vpop.xlane.xlu1 %4749 }
0x10c6   : > { %v4753_v40 = vmul.f32 0.0078125, %v4750_v39 }
0x10c7   : > { %v4752_v45 = vpop.xlane.xlu0 %4751 }
0x10c8   : > { %v4755_v20 = vsub.f32 %v4745_v35, %v4753_v40  ;;  %v4754_v5 = vmul.f32 0.0078125, %v4752_v45 }
0x10ca   : > { %v4756_v46 = vsub.f32 %v4746_v38, %v4754_v5  ;;  %v4757_v49 = vmul.f32 %v4755_v20, %v4755_v20 }
0x10cc   : > { %4759 = vadd.xlane.f32.xlu1 %v4757_v49  ;;  %v4758_v22 = vmul.f32 %v4756_v46, %v4756_v46 }
0x10ce   : > { %4761 = vadd.xlane.f32.xlu0 %v4758_v22 }
0x1159   : > { %v4760_v57 = vpop.xlane.xlu1 %4759 }
0x115a   : > { %v4763_v59 = vmul.f32 0.0078125, %v4760_v57 }
0x115b   : > { %v4762_v60 = vpop.xlane.xlu0 %4761 }
0x115c   : > { %v4765_v50 = vadd.f32 1e-05, %v4763_v59  ;;  %v4764_v61 = vmul.f32 0.0078125, %v4762_v60 }
0x115e   : > { %6224 = vrsqrt.f32 %v4765_v50  ;;  %v4766_v53 = vadd.f32 1e-05, %v4764_v61 }
0x1160   : > { %6226 = vrsqrt.f32 %v4766_v53 }
0x1168   : > { %v6225_v56 = vpop.eup %6224 }
0x1169   : > { %v4769_v41 = vmul.f32 %v6225_v56, %v4755_v20 }
0x116a   : > { %v6227_v63 = vpop.eup %6226 }
0x116b   : > { %v4777_v0 = vmul.f32 %v5480_v62, %v4769_v41  ;;  %v4770_v36 = vmul.f32 %v6227_v63, %v4756_v46  ;;  %4792 = sbr.rel (%p5482_p13) target bundleno = 4684 (0x124c), region = 116 }
0x116d   : > { %v4785_v1 = vadd.f32 %v5481_v29, %v4777_v0  ;;  %v4778_v2 = vmul.f32 %v5480_v62, %v4770_v36 }
0x116f   : > { %4787 = vst [vmem:[#allocation2] sm:$0xff] %v4785_v1  ;;  %v4786_v52 = vadd.f32 %v5481_v29, %v4778_v2 }
0x1171   : > { %4788 = vst [vmem:[#allocation2 + $0x8] sm:$0xff] %v4786_v52  ;;  %v4793_v26 = vpack.c.bf16 (!%p5482_p13), %v4786_v52, %v4785_v1 }
0x1173   : > { %5894 = vmatmul.mubr.bf16.vlgmr.msra.gmra.mrb[0].mxu0 %v4793_v26 }
0x1246   : > { %v4899_v10 = vpop.f32.mrb[0].mxu0 }
0x1247   : > { %v4900_v32 = vadd.f32 %v5483_v27, %v4899_v10  ;;  %v5895_v11 = vpop.f32.mrb[1].mxu0 }
0x1248   : > { %v4902_v28 = vpop.f32.mrb[2].mxu0 }
0x1249   : > { %4906 = vst [vmem:[#allocation15] sm:$0xff] %v4900_v32  ;;  %v4903_v55 = vadd.f32 %v5483_v27, %v4902_v28  ;;  %v5896_v37 = vpop.f32.mrb[3].mxu0 }
0x124b   : > { %4907 = vst [vmem:[#allocation15 + $0x8] sm:$0xff] %v4903_v55 }
0x124c PF: > { %p5951_p3 = scmp.eq.s32.totalorder %s6650_s22, 1  ;;  %s6548_s2 = smov [#allocation15]  }
0x124d   : > { %s4914_s4 = sshll.u32 %s6548_s2, 4  ;;  %s4915_s4 = int_to_ptr.vmem [resolvable:$true] %s4914_s4 }
0x124e   : > { %s6444_s28 = scalar_lea.vmem %s4915_s4, 256  ;;  %p6451_p7 = scmp.lt.s32.totalorder %s4915_s4, %s4915_s4 }
0x124f   : > { %p6445_p2 = scmp.ne.s32.totalorder %s4915_s4, %s6444_s28  ;;  %p6452_p10 = scmp.lt.s32.totalorder %s6444_s28, %s6444_s28 }
0x1251   : > { %p6446_p1 = pnand %p6445_p2, %p5951_p3  ;;  %p6453_p6 = por %p6452_p10, %p6451_p7 }
0x1253   : > { %p6447_p11 = pneg %p6446_p1 }
0x1255   : > { %p6454_p0 = pnand %p6453_p6, %p6447_p11 }
0x1257   : > { %6457 = shalt.err (!%p6454_p0)
}
0x1258   : > { %s7754_s18 = sld [smem:[#allocation40_spill]] }
0x125e   : > { %s7755_s1 = smov %s7754_s18  ;;  %s6458_s6 = scalar_lea.hbm %s7754_s18, 256 }
0x125f   : > { %p6459_p4 = scmp.ne.s32.totalorder %s7755_s1, %s6458_s6  ;;  %p6464_p5 = scmp.lt.u32.totalorder %s6458_s6, %s7755_s1 }
0x1261   : > { %p6460_p12 = pnand %p6459_p4, %p5951_p3 }
0x1263   : > { %p6461_p8 = pneg %p6460_p12 }
0x1265   : > { %p6466_p9 = pnand %p6464_p5, %p6461_p8 }
0x1267   : > { %6469 = shalt.err (!%p6466_p9)
}
0x1268   : > { %s6549_s24 = smov 128   ;;  %s6550_s29 = smov 8  }
0x1269   : > { %5920 = dma.vmem_to_hbm [thread:$0]  (%p5951_p3), %s4915_s4, 256, %s7755_s1, [#allocation5], %s6549_s24, %s6549_s24, %s6550_s29  }
0x126a   : > { %6507 = dma.done.wait (%p5951_p3), [#allocation5], 256  }
0x126b   : > { %6509 = vsyncadd (%p5951_p3), [#allocation5], 4294967040 }
0x126c PF: > { %s7756_s21 = sld [smem:[#allocation23_spill]]  ;;  %s7757_s16 = sld [smem:[#allocation22_spill]] }
0x126d   : > { %s7758_s20 = sld [smem:[#allocation24_spill]]  ;;  %s7759_s18 = smov %s6516_s19 }
0x1272   : > { %p33_p13 = scmp.ge.s32.totalorder %s7756_s21, 4   ;;  %s7760_s19 = smov %s7757_s16 }
0x1274   :  { %35 = sbr.rel (!%p33_p13) target bundleno = 25 (0x19), region = 203 }
0x127b   :  { %4930 = vsyncpa [#allocation4], 1 }
0x127c   :  { %4932 = vsyncpa [#allocation4 + $0x1], 1 }
0x127d   :  { %4933 = vsyncpa [#allocation7], 1 }
0x127e   :  { %4935 = vsyncpa [#allocation7 + $0x1], 1 }
0x127f   :  { %4936 = vsyncpa [#allocation10], 1 }
0x1280   :  { %4938 = vsyncpa [#allocation10 + $0x1], 1 }
0x1281   :  { %4939 = vsyncpa [#allocation13], 1 }
0x1282   :  { %4941 = vsyncpa [#allocation13 + $0x1], 1 }
0x1283   :  { %4942 = vsyncpa [#allocation5], 1 }
0x1284   :  { %4944 = vsyncpa [#allocation5 + $0x1], 1 }

</bundles_post_ra>
